<compile_context>
chip_gen: v7x
topology: tpu7x:2x2x1
jax: 0.10.0
libtpu: 0.0.40
codegen_flags: <defaults>
</compile_context>

<pallas_src>
import math

import jax
import jax.numpy as jnp
import numpy as np
from jax import lax
from jax.experimental import pallas as pl
from jax.experimental.pallas import tpu as pltpu

_GN_EPS = 1e-5
_NUM_GROUPS = 8
_INV_SQRT2 = 0.7071067811865476


def _erf(z):
    # Abramowitz & Stegun 7.1.26 rational approximation (|err| < 1.5e-7).  The divide is
    # routed to the EUP (approximate reciprocal) so it co-issues with the exp.
    az = jnp.abs(z)
    t = pl.reciprocal(1.0 + 0.3275911 * az, approx=True)
    poly = t * (0.254829592 + t * (-0.284496736 + t * (1.421413741
                + t * (-1.453152027 + t * 1.061405429))))
    erf_abs = 1.0 - poly * jnp.exp(-az * az)
    return jnp.where(z >= 0.0, erf_abs, -erf_abs)


def _encoder1d_kernel(xp_ref, w_ref, gamma_ref, beta_ref, gmat_ref, sel_ref,
                      out_ref, pool_ref, xs_ref):
    f32 = jnp.float32
    bt, cin = xp_ref.shape[0], xp_ref.shape[1]
    cout, L = out_ref.shape[1], out_ref.shape[2]
    kpad, nw = xs_ref.shape
    chunk = sel_ref.shape[0]
    hc = chunk // 2

    # ---- stage the packed bf16 operand: rows = [x(l-1); x(l); x(l+1); 1; 0-pad], lanes = Bt*L ----
    # Tail (bias + K-pad) rows are rewritten every step: scratch persists, but under "parallel"
    # batch sharding each TensorCore has its own scratch copy, so a program_id==0 one-time
    # init would leave the second core's copy uninitialized.
    tail = kpad - 3 * cin
    xs_ref[pl.ds(3 * cin, tail), :] = (
        lax.broadcasted_iota(jnp.int32, (tail, nw), 0) == 0).astype(xs_ref.dtype)
    for b in range(bt):                       # bt is small by construction (<= 256 // L)
        for t in range(3):
            xs_ref[pl.ds(t * cin, cin), pl.ds(b * L, L)] = xp_ref[b, :, pl.ds(t, L)]

    # ---- ONE fused bf16 MXU matmul (f32 accumulate): conv taps + bias and 1x1 residual + bias ----
    yr = jnp.dot(w_ref[...], xs_ref[...], preferred_element_type=f32)   # (2*cout, bt*L)
    y = yr[:cout, :]
    res = yr[cout:, :]

    n = (cout // _NUM_GROUPS) * L
    inv_n = 1.0 / n
    gmat = gmat_ref[...]
    gamma = gamma_ref[...]
    beta = beta_ref[...]
    sel = sel_ref[...]

    for b in range(bt):
        seg = y[:, b * L:(b + 1) * L]                            # (cout, L) f32
        # GroupNorm(8): one-pass per-sample stats, group-reduced by ONE gmat matmul (N=2).
        rs = jnp.sum(seg, axis=1, keepdims=True)                 # (cout, 1)
        rq = jnp.sum(seg * seg, axis=1, keepdims=True)           # (cout, 1)
        g = jnp.dot(gmat, jnp.concatenate([rs, rq], axis=1),
                    preferred_element_type=f32)                  # (cout, 2) group sums
        mean = g[:, 0:1] * inv_n
        var = g[:, 1:2] * inv_n - mean * mean
        # precombined scale/shift: single multiply-add on the (cout, L) tile
        scale = lax.rsqrt(var + _GN_EPS) * gamma
        shift = beta - mean * scale
        y_n = seg * scale + shift
        # GELU (exact-erf form via rational approximation); Dropout1d is identity in eval.
        act = 0.5 * y_n * (1.0 + _erf(y_n * _INV_SQRT2))
        o = act + res[:, b * L:(b + 1) * L]
        out_ref[b] = o.astype(out_ref.dtype)

        # ---- MaxPool1d(2): merged even|odd selector, one matmul per chunk, VPU max of halves.
        # Re-read from out_ref so the full activation does not stay live across chunks.
        for c in range(L // chunk):
            seg_o = out_ref[b, :, pl.ds(c * chunk, chunk)].astype(f32)
            r = jnp.dot(seg_o, sel, preferred_element_type=f32)          # (cout, chunk)
            pool_ref[b, :, pl.ds(c * hc, hc)] = jnp.maximum(
                r[:, :hc], r[:, hc:]).astype(pool_ref.dtype)


def _pick_bt(B, L, max_lanes=256):
    # Pack Bt samples along lanes per grid step so the fused matmul N = Bt*L approaches
    # the 256-wide MXU ...
    bt = 1
    for d in range(1, B + 1):
        if B % d == 0 and d * L <= max_lanes:
            bt = d
    # ... but keep >= 2 "parallel" grid steps whenever B allows so both v7x TCs get work.
    while bt > 1 and B // bt < 2:
        bt = max(d for d in range(1, bt) if B % d == 0)
    return bt


def _vmem_limit_bytes(est):
    # Generation-aware cap: ~75% of per-core VMEM (v7x: 64 MiB total, v5e/v6e: 128 MiB),
    # leaving headroom for pipeline double-buffers and internal scratch.
    try:
        cap = pltpu.get_tpu_info().vmem_capacity_bytes
    except Exception:
        cap = 64 * 2 ** 20
    budget = (3 * cap) // 4
    return int(min(budget, max(32 * 2 ** 20, 2 * est)))


def encoder1d_forward(x, params):
    B, cin, L = x.shape
    cout = params["w_res"].shape[0]
    assert L % 2 == 0 and cout % _NUM_GROUPS == 0
    f32, bf16 = jnp.float32, jnp.bfloat16

    bt = _pick_bt(B, L)
    grid = (B // bt,)
    nw = bt * L

    # ---------- host-side (plain JAX) constant / weight prep ----------
    # Matmul operands are bf16 (MXU-native); accumulation and GN/GELU math stay f32.
    xp = jnp.pad(x.astype(f32), ((0, 0), (0, 0), (1, 1))).astype(bf16)      # (B, cin, L+2)

    kdim = 3 * cin + 1
    kpad = -(-kdim // 16) * 16                 # sublane-aligned K for the packed bf16 operand
    w0, w1, w2 = (params["w_conv"][k].astype(f32) for k in range(3))
    z = jnp.zeros((cout, cin), f32)
    zp = jnp.zeros((cout, kpad - kdim), f32)
    top = jnp.concatenate([w0, w1, w2, params["b_conv"].astype(f32), zp], axis=1)
    bot = jnp.concatenate([z, params["w_res"].astype(f32), z,
                           params["b_res"].astype(f32), zp], axis=1)
    w_full = jnp.concatenate([top, bot], axis=0).astype(bf16)               # (2*cout, kpad)

    gc = cout // _NUM_GROUPS
    ch = jnp.arange(cout)
    gmat = ((ch[:, None] // gc) == (ch[None, :] // gc)).astype(f32)         # (cout, cout)

    # Merged even|odd MaxPool selector: one matmul per chunk, halves are contiguous lane slices.
    if L % 256 == 0:
        chunk = 256
    elif L % 128 == 0:
        chunk = 128
    else:
        chunk = L                                                            # small / irregular L
    hc = chunk // 2
    rr = jnp.arange(chunk)[:, None]
    cc = jnp.arange(chunk)[None, :]
    sel = jnp.where(cc < hc, rr == 2 * cc, rr == 2 * (cc - hc) + 1).astype(f32)

    # rough VMEM budget: double-buffered I/O blocks + resident constants + scratch + temporaries
    est = (2 * bt * cin * (L + 2) * 2 + 2 * bt * cout * (L + L // 2) * 4
           + 2 * cout * kpad * 2 + cout * cout * 4 + 2 * cout * 4 + chunk * chunk * 4
           + kpad * nw * 2 + 12 * cout * nw * 4)
    vmem_limit = _vmem_limit_bytes(est)

    def build(single_buffer_consts):
        def cspec(shape):
            imap = lambda g: (0,) * len(shape)
            if single_buffer_consts:
                # constants never change across the grid -> single buffer halves their VMEM
                return pl.BlockSpec(shape, imap, pipeline_mode=pl.Buffered(1))
            return pl.BlockSpec(shape, imap)

        return pl.pallas_call(
            _encoder1d_kernel,
            out_shape=(jax.ShapeDtypeStruct((B, cout, L), x.dtype),
                       jax.ShapeDtypeStruct((B, cout, L // 2), x.dtype)),
            grid=grid,
            in_specs=[
                pl.BlockSpec((bt, cin, L + 2), lambda g: (g, 0, 0)),   # packed, padded bf16 x
                cspec((2 * cout, kpad)),                               # stacked conv/res weights + biases
                cspec((cout, 1)),                                      # GN gamma
                cspec((cout, 1)),                                      # GN beta
                cspec((cout, cout)),                                   # group-membership matrix
                cspec((chunk, chunk)),                                 # merged maxpool selector
            ],
            out_specs=(pl.BlockSpec((bt, cout, L), lambda g: (g, 0, 0)),
                       pl.BlockSpec((bt, cout, L // 2), lambda g: (g, 0, 0))),
            scratch_shapes=[pltpu.VMEM((kpad, nw), bf16)],
            compiler_params=pltpu.CompilerParams(
                dimension_semantics=("parallel",),
                vmem_limit_bytes=vmem_limit),
        )

    args = (xp, w_full, params["gamma"].astype(f32), params["beta"].astype(f32), gmat, sel)
    try:
        out, pooled = jax.block_until_ready(build(True)(*args))
    except Exception:
        # fallback for jax versions without BlockSpec(pipeline_mode=pl.Buffered(1))
        out, pooled = jax.block_until_ready(build(False)(*args))
    return out, pooled


def reference_forward(x, p):
    # Pure-JAX reference mirroring the PyTorch module (eval mode), all-f32.
    B, cin, L = x.shape
    cout = p["w_res"].shape[0]
    xp = jnp.pad(x, ((0, 0), (0, 0), (1, 1)))
    y = (jnp.einsum("oc,bcl->bol", p["w_conv"][0], xp[:, :, 0:L])
         + jnp.einsum("oc,bcl->bol", p["w_conv"][1], xp[:, :, 1:L + 1])
         + jnp.einsum("oc,bcl->bol", p["w_conv"][2], xp[:, :, 2:L + 2])
         + p["b_conv"][None])
    gc = cout // _NUM_GROUPS
    yg = y.reshape(B, _NUM_GROUPS, gc, L)
    mean = yg.mean(axis=(2, 3), keepdims=True)
    var = yg.var(axis=(2, 3), keepdims=True)
    yn = ((yg - mean) / jnp.sqrt(var + _GN_EPS)).reshape(B, cout, L)
    yn = yn * p["gamma"][None] + p["beta"][None]
    act = jax.nn.gelu(yn, approximate=False)
    res = jnp.einsum("oc,bcl->bol", p["w_res"], x) + p["b_res"][None]
    out = act + res
    pooled = jnp.max(out.reshape(B, cout, L // 2, 2), axis=-1)
    return out, pooled


if __name__ == "__main__":
    B, CIN, COUT, L = 4, 4, 32, 16

    key = jax.random.PRNGKey(0)
    kx, kw, kb, kwr, kbr = jax.random.split(key, 5)
    bound3 = 1.0 / math.sqrt(CIN * 3)
    bound1 = 1.0 / math.sqrt(CIN)
    params = {
        # w_conv[k] corresponds to PyTorch Conv1d weight[:, :, k]  (tap-major layout)
        "w_conv": jax.random.uniform(kw, (3, COUT, CIN), jnp.float32, -bound3, bound3),
        "b_conv": jax.random.uniform(kb, (COUT, 1), jnp.float32, -bound3, bound3),
        "w_res": jax.random.uniform(kwr, (COUT, CIN), jnp.float32, -bound1, bound1),
        "b_res": jax.random.uniform(kbr, (COUT, 1), jnp.float32, -bound1, bound1),
        "gamma": jnp.ones((COUT, 1), jnp.float32),   # PyTorch GroupNorm default init
        "beta": jnp.zeros((COUT, 1), jnp.float32),
    }
    x = jax.random.normal(kx, (B, CIN, L), jnp.float32)

    out, pooled = jax.block_until_ready(encoder1d_forward(x, params))

    # (1) Tight check against a reference using the kernel's precision policy (matmul
    #     operands rounded to bf16, everything else f32): validates the kernel logic.
    bf = lambda a: a.astype(jnp.bfloat16).astype(jnp.float32)
    params_bf = dict(params)
    for k in ("w_conv", "b_conv", "w_res", "b_res"):
        params_bf[k] = bf(params[k])
    mref_out, mref_pool = reference_forward(bf(x), params_bf)
    np.testing.assert_allclose(np.asarray(out), np.asarray(mref_out), rtol=5e-3, atol=5e-3)
    np.testing.assert_allclose(np.asarray(pooled), np.asarray(mref_pool), rtol=5e-3, atol=5e-3)

    # (2) Looser check against the full-f32 module semantics (difference = bf16 MXU
    #     operand rounding with f32 accumulation).
    ref_out, ref_pool = reference_forward(x, params)
    np.testing.assert_allclose(np.asarray(out), np.asarray(ref_out), rtol=2e-2, atol=2e-2)
    np.testing.assert_allclose(np.asarray(pooled), np.asarray(ref_pool), rtol=2e-2, atol=2e-2)

    print("KERNEL_OK")
</pallas_src>

<mosaic_0001>
module attributes {stable_mosaic.version = 11 : i64} {
  func.func @_encoder1d_kernel(%arg0: i32, %arg1: memref<2x4x18xbf16, #tpu.memory_space<vmem>>, %arg2: memref<64x16xbf16, #tpu.memory_space<vmem>>, %arg3: memref<32x1xf32, #tpu.memory_space<vmem>>, %arg4: memref<32x1xf32, #tpu.memory_space<vmem>>, %arg5: memref<32x32xf32, #tpu.memory_space<vmem>>, %arg6: memref<16x16xf32, #tpu.memory_space<vmem>>, %arg7: memref<2x32x16xf32, #tpu.memory_space<vmem>>, %arg8: memref<2x32x8xf32, #tpu.memory_space<vmem>>, %arg9: memref<16x32xbf16, #tpu.memory_space<vmem>>) attributes {dimension_semantics = [#tpu.dimension_semantics<parallel>], iteration_bounds = array<i64: 2>, scalar_prefetch = 0 : i64, scratch_operands = 1 : i64, tpu.core_type = #tpu.core_type<tc>, window_params = [{transform_indices = @transform_0, window_bounds = array<i64: 2, 4, 18>}, {pipeline_mode = #tpu.pipeline_mode<synchronous>, transform_indices = @transform_1, window_bounds = array<i64: 64, 16>}, {pipeline_mode = #tpu.pipeline_mode<synchronous>, transform_indices = @transform_2, window_bounds = array<i64: 32, 1>}, {pipeline_mode = #tpu.pipeline_mode<synchronous>, transform_indices = @transform_3, window_bounds = array<i64: 32, 1>}, {pipeline_mode = #tpu.pipeline_mode<synchronous>, transform_indices = @transform_4, window_bounds = array<i64: 32, 32>}, {pipeline_mode = #tpu.pipeline_mode<synchronous>, transform_indices = @transform_5, window_bounds = array<i64: 16, 16>}, {transform_indices = @transform_6, window_bounds = array<i64: 2, 32, 16>}, {transform_indices = @transform_7, window_bounds = array<i64: 2, 32, 8>}]} {
    %0 = tpu.iota {dimensions = array<i32: 0>} : vector<4x32xi32>
    %c0_i32 = arith.constant 0 : i32
    %1 = vector.broadcast %c0_i32 : i32 to vector<4x32xi32>
    %2 = arith.cmpi eq, %0, %1 : vector<4x32xi32>
    %3 = arith.extui %2 : vector<4x32xi1> to vector<4x32xi32>
    %4 = arith.sitofp %3 : vector<4x32xi32> to vector<4x32xf32>
    %5 = arith.truncf %4 : vector<4x32xf32> to vector<4x32xbf16>
    %c12 = arith.constant 12 : index
    %c0 = arith.constant 0 : index
    %6 = vector.load %arg9[%c12, %c0] : memref<16x32xbf16, #tpu.memory_space<vmem>>, vector<4x32xbf16>
    tpu.vector_store %arg9[%c12, %c0], %5 {strides = array<i32>} : memref<16x32xbf16, #tpu.memory_space<vmem>>, vector<4x32xbf16>,
    %c0_0 = arith.constant 0 : index
    %c0_1 = arith.constant 0 : index
    %c0_2 = arith.constant 0 : index
    %7 = vector.load %arg1[%c0_0, %c0_1, %c0_2] : memref<2x4x18xbf16, #tpu.memory_space<vmem>>, vector<1x4x16xbf16>
    %8 = vector.shape_cast %7 : vector<1x4x16xbf16> to vector<4x16xbf16>
    %c0_3 = arith.constant 0 : index
    %c0_4 = arith.constant 0 : index
    %9 = vector.load %arg9[%c0_3, %c0_4] : memref<16x32xbf16, #tpu.memory_space<vmem>>, vector<4x16xbf16>
    tpu.vector_store %arg9[%c0_3, %c0_4], %8 {strides = array<i32>} : memref<16x32xbf16, #tpu.memory_space<vmem>>, vector<4x16xbf16>,
    %c0_5 = arith.constant 0 : index
    %c0_6 = arith.constant 0 : index
    %c1 = arith.constant 1 : index
    %10 = vector.load %arg1[%c0_5, %c0_6, %c1] : memref<2x4x18xbf16, #tpu.memory_space<vmem>>, vector<1x4x16xbf16>
    %11 = vector.shape_cast %10 : vector<1x4x16xbf16> to vector<4x16xbf16>
    %c4 = arith.constant 4 : index
    %c0_7 = arith.constant 0 : index
    %12 = vector.load %arg9[%c4, %c0_7] : memref<16x32xbf16, #tpu.memory_space<vmem>>, vector<4x16xbf16>
    tpu.vector_store %arg9[%c4, %c0_7], %11 {strides = array<i32>} : memref<16x32xbf16, #tpu.memory_space<vmem>>, vector<4x16xbf16>,
    %c0_8 = arith.constant 0 : index
    %c0_9 = arith.constant 0 : index
    %c2 = arith.constant 2 : index
    %13 = vector.load %arg1[%c0_8, %c0_9, %c2] : memref<2x4x18xbf16, #tpu.memory_space<vmem>>, vector<1x4x16xbf16>
    %14 = vector.shape_cast %13 : vector<1x4x16xbf16> to vector<4x16xbf16>
    %c8 = arith.constant 8 : index
    %c0_10 = arith.constant 0 : index
    %15 = vector.load %arg9[%c8, %c0_10] : memref<16x32xbf16, #tpu.memory_space<vmem>>, vector<4x16xbf16>
    tpu.vector_store %arg9[%c8, %c0_10], %14 {strides = array<i32>} : memref<16x32xbf16, #tpu.memory_space<vmem>>, vector<4x16xbf16>,
    %c1_11 = arith.constant 1 : index
    %c0_12 = arith.constant 0 : index
    %c0_13 = arith.constant 0 : index
    %16 = vector.load %arg1[%c1_11, %c0_12, %c0_13] : memref<2x4x18xbf16, #tpu.memory_space<vmem>>, vector<1x4x16xbf16>
    %17 = vector.shape_cast %16 : vector<1x4x16xbf16> to vector<4x16xbf16>
    %c0_14 = arith.constant 0 : index
    %c16 = arith.constant 16 : index
    %18 = vector.load %arg9[%c0_14, %c16] : memref<16x32xbf16, #tpu.memory_space<vmem>>, vector<4x16xbf16>
    tpu.vector_store %arg9[%c0_14, %c16], %17 {strides = array<i32>} : memref<16x32xbf16, #tpu.memory_space<vmem>>, vector<4x16xbf16>,
    %c1_15 = arith.constant 1 : index
    %c0_16 = arith.constant 0 : index
    %c1_17 = arith.constant 1 : index
    %19 = vector.load %arg1[%c1_15, %c0_16, %c1_17] : memref<2x4x18xbf16, #tpu.memory_space<vmem>>, vector<1x4x16xbf16>
    %20 = vector.shape_cast %19 : vector<1x4x16xbf16> to vector<4x16xbf16>
    %c4_18 = arith.constant 4 : index
    %c16_19 = arith.constant 16 : index
    %21 = vector.load %arg9[%c4_18, %c16_19] : memref<16x32xbf16, #tpu.memory_space<vmem>>, vector<4x16xbf16>
    tpu.vector_store %arg9[%c4_18, %c16_19], %20 {strides = array<i32>} : memref<16x32xbf16, #tpu.memory_space<vmem>>, vector<4x16xbf16>,
    %c1_20 = arith.constant 1 : index
    %c0_21 = arith.constant 0 : index
    %c2_22 = arith.constant 2 : index
    %22 = vector.load %arg1[%c1_20, %c0_21, %c2_22] : memref<2x4x18xbf16, #tpu.memory_space<vmem>>, vector<1x4x16xbf16>
    %23 = vector.shape_cast %22 : vector<1x4x16xbf16> to vector<4x16xbf16>
    %c8_23 = arith.constant 8 : index
    %c16_24 = arith.constant 16 : index
    %24 = vector.load %arg9[%c8_23, %c16_24] : memref<16x32xbf16, #tpu.memory_space<vmem>>, vector<4x16xbf16>
    tpu.vector_store %arg9[%c8_23, %c16_24], %23 {strides = array<i32>} : memref<16x32xbf16, #tpu.memory_space<vmem>>, vector<4x16xbf16>,
    %c0_25 = arith.constant 0 : index
    %c0_26 = arith.constant 0 : index
    %25 = vector.load %arg2[%c0_25, %c0_26] : memref<64x16xbf16, #tpu.memory_space<vmem>>, vector<64x16xbf16>
    %c0_27 = arith.constant 0 : index
    %c0_28 = arith.constant 0 : index
    %26 = vector.load %arg9[%c0_27, %c0_28] : memref<16x32xbf16, #tpu.memory_space<vmem>>, vector<16x32xbf16>
    %cst = arith.constant dense<0.000000e+00> : vector<64x32xf32>
    %27 = tpu.matmul %25, %26, %cst {dimension_numbers = #tpu.dot_dimension_numbers<[1], [0], [0], [1], [0, 0, 1, 1], [], []>} : vector<64x16xbf16>, vector<16x32xbf16>, vector<64x32xf32> -> vector<64x32xf32>
    %28 = vector.extract_strided_slice %27 {offsets = [0, 0], sizes = [32, 32], strides = [1, 1]} : vector<64x32xf32> to vector<32x32xf32>
    %29 = vector.extract_strided_slice %27 {offsets = [32, 0], sizes = [32, 32], strides = [1, 1]} : vector<64x32xf32> to vector<32x32xf32>
    %c0_29 = arith.constant 0 : index
    %c0_30 = arith.constant 0 : index
    %30 = vector.load %arg5[%c0_29, %c0_30] : memref<32x32xf32, #tpu.memory_space<vmem>>, vector<32x32xf32>
    %c0_31 = arith.constant 0 : index
    %c0_32 = arith.constant 0 : index
    %31 = vector.load %arg3[%c0_31, %c0_32] : memref<32x1xf32, #tpu.memory_space<vmem>>, vector<32x1xf32>
    %c0_33 = arith.constant 0 : index
    %c0_34 = arith.constant 0 : index
    %32 = vector.load %arg4[%c0_33, %c0_34] : memref<32x1xf32, #tpu.memory_space<vmem>>, vector<32x1xf32>
    %c0_35 = arith.constant 0 : index
    %c0_36 = arith.constant 0 : index
    %33 = vector.load %arg6[%c0_35, %c0_36] : memref<16x16xf32, #tpu.memory_space<vmem>>, vector<16x16xf32>
    %34 = vector.extract_strided_slice %28 {offsets = [0, 0], sizes = [32, 16], strides = [1, 1]} : vector<32x32xf32> to vector<32x16xf32>
    %cst_37 = arith.constant dense<0.000000e+00> : vector<32xf32>
    %35 = vector.multi_reduction <add>, %34, %cst_37 [1] : vector<32x16xf32> to vector<32xf32>
    %36 = vector.shape_cast %35 : vector<32xf32> to vector<32x1xf32>
    %37 = arith.mulf %34, %34 : vector<32x16xf32>
    %cst_38 = arith.constant dense<0.000000e+00> : vector<32xf32>
    %38 = vector.multi_reduction <add>, %37, %cst_38 [1] : vector<32x16xf32> to vector<32xf32>
    %39 = vector.shape_cast %38 : vector<32xf32> to vector<32x1xf32>
    %40 = tpu.concatenate %36, %39 in 1 : vector<32x1xf32>, vector<32x1xf32> -> vector<32x2xf32>
    %cst_39 = arith.constant dense<0.000000e+00> : vector<32x2xf32>
    %41 = tpu.matmul %30, %40, %cst_39 {dimension_numbers = #tpu.dot_dimension_numbers<[1], [0], [0], [1], [0, 0, 1, 1], [], []>} : vector<32x32xf32>, vector<32x2xf32>, vector<32x2xf32> -> vector<32x2xf32>
    %42 = vector.extract_strided_slice %41 {offsets = [0, 0], sizes = [32, 1], strides = [1, 1]} : vector<32x2xf32> to vector<32x1xf32>
    %cst_40 = arith.constant 1.562500e-02 : f32
    %43 = vector.broadcast %cst_40 : f32 to vector<32x1xf32>
    %44 = arith.mulf %42, %43 : vector<32x1xf32>
    %45 = vector.extract_strided_slice %41 {offsets = [0, 1], sizes = [32, 1], strides = [1, 1]} : vector<32x2xf32> to vector<32x1xf32>
    %cst_41 = arith.constant 1.562500e-02 : f32
    %46 = vector.broadcast %cst_41 : f32 to vector<32x1xf32>
    %47 = arith.mulf %45, %46 : vector<32x1xf32>
    %48 = arith.mulf %44, %44 : vector<32x1xf32>
    %49 = arith.subf %47, %48 : vector<32x1xf32>
    %cst_42 = arith.constant 9.99999974E-6 : f32
    %50 = vector.broadcast %cst_42 : f32 to vector<32x1xf32>
    %51 = arith.addf %49, %50 : vector<32x1xf32>
    %52 = math.rsqrt %51 : vector<32x1xf32>
    %53 = arith.mulf %52, %31 : vector<32x1xf32>
    %54 = arith.mulf %44, %53 : vector<32x1xf32>
    %55 = arith.subf %32, %54 : vector<32x1xf32>
    %56 = vector.broadcast %53 : vector<32x1xf32> to vector<32x16xf32>
    %57 = arith.mulf %34, %56 : vector<32x16xf32>
    %58 = vector.broadcast %55 : vector<32x1xf32> to vector<32x16xf32>
    %59 = arith.addf %57, %58 : vector<32x16xf32>
    %cst_43 = arith.constant 5.000000e-01 : f32
    %60 = vector.broadcast %cst_43 : f32 to vector<32x16xf32>
    %61 = arith.mulf %60, %59 : vector<32x16xf32>
    %cst_44 = arith.constant 0.707106769 : f32
    %62 = vector.broadcast %cst_44 : f32 to vector<32x16xf32>
    %63 = arith.mulf %59, %62 : vector<32x16xf32>
    %64 = math.absf %63 : vector<32x16xf32>
    %cst_45 = arith.constant 0.327591091 : f32
    %65 = vector.broadcast %cst_45 : f32 to vector<32x16xf32>
    %66 = arith.mulf %65, %64 : vector<32x16xf32>
    %cst_46 = arith.constant 1.000000e+00 : f32
    %67 = vector.broadcast %cst_46 : f32 to vector<32x16xf32>
    %68 = arith.addf %67, %66 : vector<32x16xf32>
    %69 = tpu.reciprocal %68 {approx = true} : vector<32x16xf32> -> vector<32x16xf32>
    %cst_47 = arith.constant 1.06140542 : f32
    %70 = vector.broadcast %cst_47 : f32 to vector<32x16xf32>
    %71 = arith.mulf %69, %70 : vector<32x16xf32>
    %cst_48 = arith.constant -1.45315206 : f32
    %72 = vector.broadcast %cst_48 : f32 to vector<32x16xf32>
    %73 = arith.addf %72, %71 : vector<32x16xf32>
    %74 = arith.mulf %69, %73 : vector<32x16xf32>
    %cst_49 = arith.constant 1.42141378 : f32
    %75 = vector.broadcast %cst_49 : f32 to vector<32x16xf32>
    %76 = arith.addf %75, %74 : vector<32x16xf32>
    %77 = arith.mulf %69, %76 : vector<32x16xf32>
    %cst_50 = arith.constant -0.284496725 : f32
    %78 = vector.broadcast %cst_50 : f32 to vector<32x16xf32>
    %79 = arith.addf %78, %77 : vector<32x16xf32>
    %80 = arith.mulf %69, %79 : vector<32x16xf32>
    %cst_51 = arith.constant 0.254829586 : f32
    %81 = vector.broadcast %cst_51 : f32 to vector<32x16xf32>
    %82 = arith.addf %81, %80 : vector<32x16xf32>
    %83 = arith.mulf %69, %82 : vector<32x16xf32>
    %cst_52 = arith.constant 0.000000e+00 : f32
    %84 = vector.broadcast %cst_52 : f32 to vector<32x16xf32>
    %85 = arith.subf %84, %64 : vector<32x16xf32>
    %86 = arith.mulf %85, %64 : vector<32x16xf32>
    %87 = math.exp %86 : vector<32x16xf32>
    %88 = arith.mulf %83, %87 : vector<32x16xf32>
    %cst_53 = arith.constant 1.000000e+00 : f32
    %89 = vector.broadcast %cst_53 : f32 to vector<32x16xf32>
    %90 = arith.subf %89, %88 : vector<32x16xf32>
    %cst_54 = arith.constant 0.000000e+00 : f32
    %91 = vector.broadcast %cst_54 : f32 to vector<32x16xf32>
    %92 = arith.cmpf oge, %63, %91 : vector<32x16xf32>
    %cst_55 = arith.constant 0.000000e+00 : f32
    %93 = vector.broadcast %cst_55 : f32 to vector<32x16xf32>
    %94 = arith.subf %93, %90 : vector<32x16xf32>
    %95 = arith.select %92, %90, %94 : vector<32x16xi1>, vector<32x16xf32>
    %cst_56 = arith.constant 1.000000e+00 : f32
    %96 = vector.broadcast %cst_56 : f32 to vector<32x16xf32>
    %97 = arith.addf %96, %95 : vector<32x16xf32>
    %98 = arith.mulf %61, %97 : vector<32x16xf32>
    %99 = vector.extract_strided_slice %29 {offsets = [0, 0], sizes = [32, 16], strides = [1, 1]} : vector<32x32xf32> to vector<32x16xf32>
    %100 = arith.addf %98, %99 : vector<32x16xf32>
    %c0_57 = arith.constant 0 : index
    %c0_58 = arith.constant 0 : index
    %c0_59 = arith.constant 0 : index
    %101 = vector.load %arg7[%c0_57, %c0_58, %c0_59] : memref<2x32x16xf32, #tpu.memory_space<vmem>>, vector<1x32x16xf32>
    %102 = vector.shape_cast %101 : vector<1x32x16xf32> to vector<32x16xf32>
    %103 = vector.shape_cast %100 : vector<32x16xf32> to vector<1x32x16xf32>
    tpu.vector_store %arg7[%c0_57, %c0_58, %c0_59], %103 {strides = array<i32>} : memref<2x32x16xf32, #tpu.memory_space<vmem>>, vector<1x32x16xf32>,
    %c0_60 = arith.constant 0 : index
    %c0_61 = arith.constant 0 : index
    %c0_62 = arith.constant 0 : index
    %104 = vector.load %arg7[%c0_60, %c0_61, %c0_62] : memref<2x32x16xf32, #tpu.memory_space<vmem>>, vector<1x32x16xf32>
    %105 = vector.shape_cast %104 : vector<1x32x16xf32> to vector<32x16xf32>
    %cst_63 = arith.constant dense<0.000000e+00> : vector<32x16xf32>
    %106 = tpu.matmul %105, %33, %cst_63 {dimension_numbers = #tpu.dot_dimension_numbers<[1], [0], [0], [1], [0, 0, 1, 1], [], []>} : vector<32x16xf32>, vector<16x16xf32>, vector<32x16xf32> -> vector<32x16xf32>
    %107 = vector.extract_strided_slice %106 {offsets = [0, 0], sizes = [32, 8], strides = [1, 1]} : vector<32x16xf32> to vector<32x8xf32>
    %108 = vector.extract_strided_slice %106 {offsets = [0, 8], sizes = [32, 8], strides = [1, 1]} : vector<32x16xf32> to vector<32x8xf32>
    %109 = arith.maximumf %107, %108 : vector<32x8xf32>
    %c0_64 = arith.constant 0 : index
    %c0_65 = arith.constant 0 : index
    %c0_66 = arith.constant 0 : index
    %110 = vector.load %arg8[%c0_64, %c0_65, %c0_66] : memref<2x32x8xf32, #tpu.memory_space<vmem>>, vector<1x32x8xf32>
    %111 = vector.shape_cast %110 : vector<1x32x8xf32> to vector<32x8xf32>
    %112 = vector.shape_cast %109 : vector<32x8xf32> to vector<1x32x8xf32>
    tpu.vector_store %arg8[%c0_64, %c0_65, %c0_66], %112 {strides = array<i32>} : memref<2x32x8xf32, #tpu.memory_space<vmem>>, vector<1x32x8xf32>,
    %113 = vector.extract_strided_slice %28 {offsets = [0, 16], sizes = [32, 16], strides = [1, 1]} : vector<32x32xf32> to vector<32x16xf32>
    %cst_67 = arith.constant dense<0.000000e+00> : vector<32xf32>
    %114 = vector.multi_reduction <add>, %113, %cst_67 [1] : vector<32x16xf32> to vector<32xf32>
    %115 = vector.shape_cast %114 : vector<32xf32> to vector<32x1xf32>
    %116 = arith.mulf %113, %113 : vector<32x16xf32>
    %cst_68 = arith.constant dense<0.000000e+00> : vector<32xf32>
    %117 = vector.multi_reduction <add>, %116, %cst_68 [1] : vector<32x16xf32> to vector<32xf32>
    %118 = vector.shape_cast %117 : vector<32xf32> to vector<32x1xf32>
    %119 = tpu.concatenate %115, %118 in 1 : vector<32x1xf32>, vector<32x1xf32> -> vector<32x2xf32>
    %cst_69 = arith.constant dense<0.000000e+00> : vector<32x2xf32>
    %120 = tpu.matmul %30, %119, %cst_69 {dimension_numbers = #tpu.dot_dimension_numbers<[1], [0], [0], [1], [0, 0, 1, 1], [], []>} : vector<32x32xf32>, vector<32x2xf32>, vector<32x2xf32> -> vector<32x2xf32>
    %121 = vector.extract_strided_slice %120 {offsets = [0, 0], sizes = [32, 1], strides = [1, 1]} : vector<32x2xf32> to vector<32x1xf32>
    %cst_70 = arith.constant 1.562500e-02 : f32
    %122 = vector.broadcast %cst_70 : f32 to vector<32x1xf32>
    %123 = arith.mulf %121, %122 : vector<32x1xf32>
    %124 = vector.extract_strided_slice %120 {offsets = [0, 1], sizes = [32, 1], strides = [1, 1]} : vector<32x2xf32> to vector<32x1xf32>
    %cst_71 = arith.constant 1.562500e-02 : f32
    %125 = vector.broadcast %cst_71 : f32 to vector<32x1xf32>
    %126 = arith.mulf %124, %125 : vector<32x1xf32>
    %127 = arith.mulf %123, %123 : vector<32x1xf32>
    %128 = arith.subf %126, %127 : vector<32x1xf32>
    %cst_72 = arith.constant 9.99999974E-6 : f32
    %129 = vector.broadcast %cst_72 : f32 to vector<32x1xf32>
    %130 = arith.addf %128, %129 : vector<32x1xf32>
    %131 = math.rsqrt %130 : vector<32x1xf32>
    %132 = arith.mulf %131, %31 : vector<32x1xf32>
    %133 = arith.mulf %123, %132 : vector<32x1xf32>
    %134 = arith.subf %32, %133 : vector<32x1xf32>
    %135 = vector.broadcast %132 : vector<32x1xf32> to vector<32x16xf32>
    %136 = arith.mulf %113, %135 : vector<32x16xf32>
    %137 = vector.broadcast %134 : vector<32x1xf32> to vector<32x16xf32>
    %138 = arith.addf %136, %137 : vector<32x16xf32>
    %cst_73 = arith.constant 5.000000e-01 : f32
    %139 = vector.broadcast %cst_73 : f32 to vector<32x16xf32>
    %140 = arith.mulf %139, %138 : vector<32x16xf32>
    %cst_74 = arith.constant 0.707106769 : f32
    %141 = vector.broadcast %cst_74 : f32 to vector<32x16xf32>
    %142 = arith.mulf %138, %141 : vector<32x16xf32>
    %143 = math.absf %142 : vector<32x16xf32>
    %cst_75 = arith.constant 0.327591091 : f32
    %144 = vector.broadcast %cst_75 : f32 to vector<32x16xf32>
    %145 = arith.mulf %144, %143 : vector<32x16xf32>
    %cst_76 = arith.constant 1.000000e+00 : f32
    %146 = vector.broadcast %cst_76 : f32 to vector<32x16xf32>
    %147 = arith.addf %146, %145 : vector<32x16xf32>
    %148 = tpu.reciprocal %147 {approx = true} : vector<32x16xf32> -> vector<32x16xf32>
    %cst_77 = arith.constant 1.06140542 : f32
    %149 = vector.broadcast %cst_77 : f32 to vector<32x16xf32>
    %150 = arith.mulf %148, %149 : vector<32x16xf32>
    %cst_78 = arith.constant -1.45315206 : f32
    %151 = vector.broadcast %cst_78 : f32 to vector<32x16xf32>
    %152 = arith.addf %151, %150 : vector<32x16xf32>
    %153 = arith.mulf %148, %152 : vector<32x16xf32>
    %cst_79 = arith.constant 1.42141378 : f32
    %154 = vector.broadcast %cst_79 : f32 to vector<32x16xf32>
    %155 = arith.addf %154, %153 : vector<32x16xf32>
    %156 = arith.mulf %148, %155 : vector<32x16xf32>
    %cst_80 = arith.constant -0.284496725 : f32
    %157 = vector.broadcast %cst_80 : f32 to vector<32x16xf32>
    %158 = arith.addf %157, %156 : vector<32x16xf32>
    %159 = arith.mulf %148, %158 : vector<32x16xf32>
    %cst_81 = arith.constant 0.254829586 : f32
    %160 = vector.broadcast %cst_81 : f32 to vector<32x16xf32>
    %161 = arith.addf %160, %159 : vector<32x16xf32>
    %162 = arith.mulf %148, %161 : vector<32x16xf32>
    %cst_82 = arith.constant 0.000000e+00 : f32
    %163 = vector.broadcast %cst_82 : f32 to vector<32x16xf32>
    %164 = arith.subf %163, %143 : vector<32x16xf32>
    %165 = arith.mulf %164, %143 : vector<32x16xf32>
    %166 = math.exp %165 : vector<32x16xf32>
    %167 = arith.mulf %162, %166 : vector<32x16xf32>
    %cst_83 = arith.constant 1.000000e+00 : f32
    %168 = vector.broadcast %cst_83 : f32 to vector<32x16xf32>
    %169 = arith.subf %168, %167 : vector<32x16xf32>
    %cst_84 = arith.constant 0.000000e+00 : f32
    %170 = vector.broadcast %cst_84 : f32 to vector<32x16xf32>
    %171 = arith.cmpf oge, %142, %170 : vector<32x16xf32>
    %cst_85 = arith.constant 0.000000e+00 : f32
    %172 = vector.broadcast %cst_85 : f32 to vector<32x16xf32>
    %173 = arith.subf %172, %169 : vector<32x16xf32>
    %174 = arith.select %171, %169, %173 : vector<32x16xi1>, vector<32x16xf32>
    %cst_86 = arith.constant 1.000000e+00 : f32
    %175 = vector.broadcast %cst_86 : f32 to vector<32x16xf32>
    %176 = arith.addf %175, %174 : vector<32x16xf32>
    %177 = arith.mulf %140, %176 : vector<32x16xf32>
    %178 = vector.extract_strided_slice %29 {offsets = [0, 16], sizes = [32, 16], strides = [1, 1]} : vector<32x32xf32> to vector<32x16xf32>
    %179 = arith.addf %177, %178 : vector<32x16xf32>
    %c1_87 = arith.constant 1 : index
    %c0_88 = arith.constant 0 : index
    %c0_89 = arith.constant 0 : index
    %180 = vector.load %arg7[%c1_87, %c0_88, %c0_89] : memref<2x32x16xf32, #tpu.memory_space<vmem>>, vector<1x32x16xf32>
    %181 = vector.shape_cast %180 : vector<1x32x16xf32> to vector<32x16xf32>
    %182 = vector.shape_cast %179 : vector<32x16xf32> to vector<1x32x16xf32>
    tpu.vector_store %arg7[%c1_87, %c0_88, %c0_89], %182 {strides = array<i32>} : memref<2x32x16xf32, #tpu.memory_space<vmem>>, vector<1x32x16xf32>,
    %c1_90 = arith.constant 1 : index
    %c0_91 = arith.constant 0 : index
    %c0_92 = arith.constant 0 : index
    %183 = vector.load %arg7[%c1_90, %c0_91, %c0_92] : memref<2x32x16xf32, #tpu.memory_space<vmem>>, vector<1x32x16xf32>
    %184 = vector.shape_cast %183 : vector<1x32x16xf32> to vector<32x16xf32>
    %cst_93 = arith.constant dense<0.000000e+00> : vector<32x16xf32>
    %185 = tpu.matmul %184, %33, %cst_93 {dimension_numbers = #tpu.dot_dimension_numbers<[1], [0], [0], [1], [0, 0, 1, 1], [], []>} : vector<32x16xf32>, vector<16x16xf32>, vector<32x16xf32> -> vector<32x16xf32>
    %186 = vector.extract_strided_slice %185 {offsets = [0, 0], sizes = [32, 8], strides = [1, 1]} : vector<32x16xf32> to vector<32x8xf32>
    %187 = vector.extract_strided_slice %185 {offsets = [0, 8], sizes = [32, 8], strides = [1, 1]} : vector<32x16xf32> to vector<32x8xf32>
    %188 = arith.maximumf %186, %187 : vector<32x8xf32>
    %c1_94 = arith.constant 1 : index
    %c0_95 = arith.constant 0 : index
    %c0_96 = arith.constant 0 : index
    %189 = vector.load %arg8[%c1_94, %c0_95, %c0_96] : memref<2x32x8xf32, #tpu.memory_space<vmem>>, vector<1x32x8xf32>
    %190 = vector.shape_cast %189 : vector<1x32x8xf32> to vector<32x8xf32>
    %191 = vector.shape_cast %188 : vector<32x8xf32> to vector<1x32x8xf32>
    tpu.vector_store %arg8[%c1_94, %c0_95, %c0_96], %191 {strides = array<i32>} : memref<2x32x8xf32, #tpu.memory_space<vmem>>, vector<1x32x8xf32>,
    return
  }
  func.func @transform_0(%arg0: i32) -> (i32, i32, i32) {
    %c0_i32 = arith.constant 0 : i32
    %c0_i32_0 = arith.constant 0 : i32
    %c0_i32_1 = arith.constant 0 : i32
    return %arg0, %c0_i32, %c0_i32_0 : i32, i32, i32
  }
  func.func @transform_1(%arg0: i32) -> (i32, i32) {
    %c0_i32 = arith.constant 0 : i32
    %c0_i32_0 = arith.constant 0 : i32
    %c0_i32_1 = arith.constant 0 : i32
    return %c0_i32, %c0_i32_0 : i32, i32
  }
  func.func @transform_2(%arg0: i32) -> (i32, i32) {
    %c0_i32 = arith.constant 0 : i32
    %c0_i32_0 = arith.constant 0 : i32
    %c0_i32_1 = arith.constant 0 : i32
    return %c0_i32, %c0_i32_0 : i32, i32
  }
  func.func @transform_3(%arg0: i32) -> (i32, i32) {
    %c0_i32 = arith.constant 0 : i32
    %c0_i32_0 = arith.constant 0 : i32
    %c0_i32_1 = arith.constant 0 : i32
    return %c0_i32, %c0_i32_0 : i32, i32
  }
  func.func @transform_4(%arg0: i32) -> (i32, i32) {
    %c0_i32 = arith.constant 0 : i32
    %c0_i32_0 = arith.constant 0 : i32
    %c0_i32_1 = arith.constant 0 : i32
    return %c0_i32, %c0_i32_0 : i32, i32
  }
  func.func @transform_5(%arg0: i32) -> (i32, i32) {
    %c0_i32 = arith.constant 0 : i32
    %c0_i32_0 = arith.constant 0 : i32
    %c0_i32_1 = arith.constant 0 : i32
    return %c0_i32, %c0_i32_0 : i32, i32
  }
  func.func @transform_6(%arg0: i32) -> (i32, i32, i32) {
    %c0_i32 = arith.constant 0 : i32
    %c0_i32_0 = arith.constant 0 : i32
    %c0_i32_1 = arith.constant 0 : i32
    return %arg0, %c0_i32, %c0_i32_0 : i32, i32, i32
  }
  func.func @transform_7(%arg0: i32) -> (i32, i32, i32) {
    %c0_i32 = arith.constant 0 : i32
    %c0_i32_0 = arith.constant 0 : i32
    %c0_i32_1 = arith.constant 0 : i32
    return %arg0, %c0_i32, %c0_i32_0 : i32, i32, i32
  }
}

module attributes {stable_mosaic.version = 11 : i64} {
  func.func @_encoder1d_kernel(%arg0: i32, %arg1: memref<2x4x18xbf16, #tpu.memory_space<vmem>>, %arg2: memref<64x16xbf16, #tpu.memory_space<vmem>>, %arg3: memref<32x1xf32, #tpu.memory_space<vmem>>, %arg4: memref<32x1xf32, #tpu.memory_space<vmem>>, %arg5: memref<32x32xf32, #tpu.memory_space<vmem>>, %arg6: memref<16x16xf32, #tpu.memory_space<vmem>>, %arg7: memref<2x32x16xf32, #tpu.memory_space<vmem>>, %arg8: memref<2x32x8xf32, #tpu.memory_space<vmem>>, %arg9: memref<16x32xbf16, #tpu.memory_space<vmem>>) attributes {dimension_semantics = [#tpu.dimension_semantics<parallel>], iteration_bounds = array<i64: 2>, scalar_prefetch = 0 : i64, scratch_operands = 1 : i64, tpu.core_type = #tpu.core_type<tc>, window_params = [{transform_indices = @transform_0, window_bounds = array<i64: 2, 4, 18>}, {pipeline_mode = #tpu.pipeline_mode<synchronous>, transform_indices = @transform_1, window_bounds = array<i64: 64, 16>}, {pipeline_mode = #tpu.pipeline_mode<synchronous>, transform_indices = @transform_2, window_bounds = array<i64: 32, 1>}, {pipeline_mode = #tpu.pipeline_mode<synchronous>, transform_indices = @transform_3, window_bounds = array<i64: 32, 1>}, {pipeline_mode = #tpu.pipeline_mode<synchronous>, transform_indices = @transform_4, window_bounds = array<i64: 32, 32>}, {pipeline_mode = #tpu.pipeline_mode<synchronous>, transform_indices = @transform_5, window_bounds = array<i64: 16, 16>}, {transform_indices = @transform_6, window_bounds = array<i64: 2, 32, 16>}, {transform_indices = @transform_7, window_bounds = array<i64: 2, 32, 8>}]} {
    %0 = tpu.iota {dimensions = array<i32: 0>} : vector<4x32xi32>
    %c0_i32 = arith.constant 0 : i32
    %1 = vector.broadcast %c0_i32 : i32 to vector<4x32xi32>
    %2 = arith.cmpi eq, %0, %1 : vector<4x32xi32>
    %3 = arith.extui %2 : vector<4x32xi1> to vector<4x32xi32>
    %4 = arith.sitofp %3 : vector<4x32xi32> to vector<4x32xf32>
    %5 = arith.truncf %4 : vector<4x32xf32> to vector<4x32xbf16>
    %c12 = arith.constant 12 : index
    %c0 = arith.constant 0 : index
    %6 = vector.load %arg9[%c12, %c0] : memref<16x32xbf16, #tpu.memory_space<vmem>>, vector<4x32xbf16>
    tpu.vector_store %arg9[%c12, %c0], %5 {strides = array<i32>} : memref<16x32xbf16, #tpu.memory_space<vmem>>, vector<4x32xbf16>,
    %c0_0 = arith.constant 0 : index
    %c0_1 = arith.constant 0 : index
    %c0_2 = arith.constant 0 : index
    %7 = vector.load %arg1[%c0_0, %c0_1, %c0_2] : memref<2x4x18xbf16, #tpu.memory_space<vmem>>, vector<1x4x16xbf16>
    %8 = vector.shape_cast %7 : vector<1x4x16xbf16> to vector<4x16xbf16>
    %c0_3 = arith.constant 0 : index
    %c0_4 = arith.constant 0 : index
    %9 = vector.load %arg9[%c0_3, %c0_4] : memref<16x32xbf16, #tpu.memory_space<vmem>>, vector<4x16xbf16>
    tpu.vector_store %arg9[%c0_3, %c0_4], %8 {strides = array<i32>} : memref<16x32xbf16, #tpu.memory_space<vmem>>, vector<4x16xbf16>,
    %c0_5 = arith.constant 0 : index
    %c0_6 = arith.constant 0 : index
    %c1 = arith.constant 1 : index
    %10 = vector.load %arg1[%c0_5, %c0_6, %c1] : memref<2x4x18xbf16, #tpu.memory_space<vmem>>, vector<1x4x16xbf16>
    %11 = vector.shape_cast %10 : vector<1x4x16xbf16> to vector<4x16xbf16>
    %c4 = arith.constant 4 : index
    %c0_7 = arith.constant 0 : index
    %12 = vector.load %arg9[%c4, %c0_7] : memref<16x32xbf16, #tpu.memory_space<vmem>>, vector<4x16xbf16>
    tpu.vector_store %arg9[%c4, %c0_7], %11 {strides = array<i32>} : memref<16x32xbf16, #tpu.memory_space<vmem>>, vector<4x16xbf16>,
    %c0_8 = arith.constant 0 : index
    %c0_9 = arith.constant 0 : index
    %c2 = arith.constant 2 : index
    %13 = vector.load %arg1[%c0_8, %c0_9, %c2] : memref<2x4x18xbf16, #tpu.memory_space<vmem>>, vector<1x4x16xbf16>
    %14 = vector.shape_cast %13 : vector<1x4x16xbf16> to vector<4x16xbf16>
    %c8 = arith.constant 8 : index
    %c0_10 = arith.constant 0 : index
    %15 = vector.load %arg9[%c8, %c0_10] : memref<16x32xbf16, #tpu.memory_space<vmem>>, vector<4x16xbf16>
    tpu.vector_store %arg9[%c8, %c0_10], %14 {strides = array<i32>} : memref<16x32xbf16, #tpu.memory_space<vmem>>, vector<4x16xbf16>,
    %c1_11 = arith.constant 1 : index
    %c0_12 = arith.constant 0 : index
    %c0_13 = arith.constant 0 : index
    %16 = vector.load %arg1[%c1_11, %c0_12, %c0_13] : memref<2x4x18xbf16, #tpu.memory_space<vmem>>, vector<1x4x16xbf16>
    %17 = vector.shape_cast %16 : vector<1x4x16xbf16> to vector<4x16xbf16>
    %c0_14 = arith.constant 0 : index
    %c16 = arith.constant 16 : index
    %18 = vector.load %arg9[%c0_14, %c16] : memref<16x32xbf16, #tpu.memory_space<vmem>>, vector<4x16xbf16>
    tpu.vector_store %arg9[%c0_14, %c16], %17 {strides = array<i32>} : memref<16x32xbf16, #tpu.memory_space<vmem>>, vector<4x16xbf16>,
    %c1_15 = arith.constant 1 : index
    %c0_16 = arith.constant 0 : index
    %c1_17 = arith.constant 1 : index
    %19 = vector.load %arg1[%c1_15, %c0_16, %c1_17] : memref<2x4x18xbf16, #tpu.memory_space<vmem>>, vector<1x4x16xbf16>
    %20 = vector.shape_cast %19 : vector<1x4x16xbf16> to vector<4x16xbf16>
    %c4_18 = arith.constant 4 : index
    %c16_19 = arith.constant 16 : index
    %21 = vector.load %arg9[%c4_18, %c16_19] : memref<16x32xbf16, #tpu.memory_space<vmem>>, vector<4x16xbf16>
    tpu.vector_store %arg9[%c4_18, %c16_19], %20 {strides = array<i32>} : memref<16x32xbf16, #tpu.memory_space<vmem>>, vector<4x16xbf16>,
    %c1_20 = arith.constant 1 : index
    %c0_21 = arith.constant 0 : index
    %c2_22 = arith.constant 2 : index
    %22 = vector.load %arg1[%c1_20, %c0_21, %c2_22] : memref<2x4x18xbf16, #tpu.memory_space<vmem>>, vector<1x4x16xbf16>
    %23 = vector.shape_cast %22 : vector<1x4x16xbf16> to vector<4x16xbf16>
    %c8_23 = arith.constant 8 : index
    %c16_24 = arith.constant 16 : index
    %24 = vector.load %arg9[%c8_23, %c16_24] : memref<16x32xbf16, #tpu.memory_space<vmem>>, vector<4x16xbf16>
    tpu.vector_store %arg9[%c8_23, %c16_24], %23 {strides = array<i32>} : memref<16x32xbf16, #tpu.memory_space<vmem>>, vector<4x16xbf16>,
    %c0_25 = arith.constant 0 : index
    %c0_26 = arith.constant 0 : index
    %25 = vector.load %arg2[%c0_25, %c0_26] : memref<64x16xbf16, #tpu.memory_space<vmem>>, vector<64x16xbf16>
    %c0_27 = arith.constant 0 : index
    %c0_28 = arith.constant 0 : index
    %26 = vector.load %arg9[%c0_27, %c0_28] : memref<16x32xbf16, #tpu.memory_space<vmem>>, vector<16x32xbf16>
    %cst = arith.constant dense<0.000000e+00> : vector<64x32xf32>
    %27 = tpu.matmul %25, %26, %cst {dimension_numbers = #tpu.dot_dimension_numbers<[1], [0], [0], [1], [0, 0, 1, 1], [], []>} : vector<64x16xbf16>, vector<16x32xbf16>, vector<64x32xf32> -> vector<64x32xf32>
    %28 = vector.extract_strided_slice %27 {offsets = [0, 0], sizes = [32, 32], strides = [1, 1]} : vector<64x32xf32> to vector<32x32xf32>
    %29 = vector.extract_strided_slice %27 {offsets = [32, 0], sizes = [32, 32], strides = [1, 1]} : vector<64x32xf32> to vector<32x32xf32>
    %c0_29 = arith.constant 0 : index
    %c0_30 = arith.constant 0 : index
    %30 = vector.load %arg5[%c0_29, %c0_30] : memref<32x32xf32, #tpu.memory_space<vmem>>, vector<32x32xf32>
    %c0_31 = arith.constant 0 : index
    %c0_32 = arith.constant 0 : index
    %31 = vector.load %arg3[%c0_31, %c0_32] : memref<32x1xf32, #tpu.memory_space<vmem>>, vector<32x1xf32>
    %c0_33 = arith.constant 0 : index
    %c0_34 = arith.constant 0 : index
    %32 = vector.load %arg4[%c0_33, %c0_34] : memref<32x1xf32, #tpu.memory_space<vmem>>, vector<32x1xf32>
    %c0_35 = arith.constant 0 : index
    %c0_36 = arith.constant 0 : index
    %33 = vector.load %arg6[%c0_35, %c0_36] : memref<16x16xf32, #tpu.memory_space<vmem>>, vector<16x16xf32>
    %34 = vector.extract_strided_slice %28 {offsets = [0, 0], sizes = [32, 16], strides = [1, 1]} : vector<32x32xf32> to vector<32x16xf32>
    %cst_37 = arith.constant dense<0.000000e+00> : vector<32xf32>
    %35 = vector.multi_reduction <add>, %34, %cst_37 [1] : vector<32x16xf32> to vector<32xf32>
    %36 = vector.shape_cast %35 : vector<32xf32> to vector<32x1xf32>
    %37 = arith.mulf %34, %34 : vector<32x16xf32>
    %cst_38 = arith.constant dense<0.000000e+00> : vector<32xf32>
    %38 = vector.multi_reduction <add>, %37, %cst_38 [1] : vector<32x16xf32> to vector<32xf32>
    %39 = vector.shape_cast %38 : vector<32xf32> to vector<32x1xf32>
    %40 = tpu.concatenate %36, %39 in 1 : vector<32x1xf32>, vector<32x1xf32> -> vector<32x2xf32>
    %cst_39 = arith.constant dense<0.000000e+00> : vector<32x2xf32>
    %41 = tpu.matmul %30, %40, %cst_39 {dimension_numbers = #tpu.dot_dimension_numbers<[1], [0], [0], [1], [0, 0, 1, 1], [], []>} : vector<32x32xf32>, vector<32x2xf32>, vector<32x2xf32> -> vector<32x2xf32>
    %42 = vector.extract_strided_slice %41 {offsets = [0, 0], sizes = [32, 1], strides = [1, 1]} : vector<32x2xf32> to vector<32x1xf32>
    %cst_40 = arith.constant 1.562500e-02 : f32
    %43 = vector.broadcast %cst_40 : f32 to vector<32x1xf32>
    %44 = arith.mulf %42, %43 : vector<32x1xf32>
    %45 = vector.extract_strided_slice %41 {offsets = [0, 1], sizes = [32, 1], strides = [1, 1]} : vector<32x2xf32> to vector<32x1xf32>
    %cst_41 = arith.constant 1.562500e-02 : f32
    %46 = vector.broadcast %cst_41 : f32 to vector<32x1xf32>
    %47 = arith.mulf %45, %46 : vector<32x1xf32>
    %48 = arith.mulf %44, %44 : vector<32x1xf32>
    %49 = arith.subf %47, %48 : vector<32x1xf32>
    %cst_42 = arith.constant 9.99999974E-6 : f32
    %50 = vector.broadcast %cst_42 : f32 to vector<32x1xf32>
    %51 = arith.addf %49, %50 : vector<32x1xf32>
    %52 = math.rsqrt %51 : vector<32x1xf32>
    %53 = arith.mulf %52, %31 : vector<32x1xf32>
    %54 = arith.mulf %44, %53 : vector<32x1xf32>
    %55 = arith.subf %32, %54 : vector<32x1xf32>
    %56 = vector.broadcast %53 : vector<32x1xf32> to vector<32x16xf32>
    %57 = arith.mulf %34, %56 : vector<32x16xf32>
    %58 = vector.broadcast %55 : vector<32x1xf32> to vector<32x16xf32>
    %59 = arith.addf %57, %58 : vector<32x16xf32>
    %cst_43 = arith.constant 5.000000e-01 : f32
    %60 = vector.broadcast %cst_43 : f32 to vector<32x16xf32>
    %61 = arith.mulf %60, %59 : vector<32x16xf32>
    %cst_44 = arith.constant 0.707106769 : f32
    %62 = vector.broadcast %cst_44 : f32 to vector<32x16xf32>
    %63 = arith.mulf %59, %62 : vector<32x16xf32>
    %64 = math.absf %63 : vector<32x16xf32>
    %cst_45 = arith.constant 0.327591091 : f32
    %65 = vector.broadcast %cst_45 : f32 to vector<32x16xf32>
    %66 = arith.mulf %65, %64 : vector<32x16xf32>
    %cst_46 = arith.constant 1.000000e+00 : f32
    %67 = vector.broadcast %cst_46 : f32 to vector<32x16xf32>
    %68 = arith.addf %67, %66 : vector<32x16xf32>
    %69 = tpu.reciprocal %68 {approx = true} : vector<32x16xf32> -> vector<32x16xf32>
    %cst_47 = arith.constant 1.06140542 : f32
    %70 = vector.broadcast %cst_47 : f32 to vector<32x16xf32>
    %71 = arith.mulf %69, %70 : vector<32x16xf32>
    %cst_48 = arith.constant -1.45315206 : f32
    %72 = vector.broadcast %cst_48 : f32 to vector<32x16xf32>
    %73 = arith.addf %72, %71 : vector<32x16xf32>
    %74 = arith.mulf %69, %73 : vector<32x16xf32>
    %cst_49 = arith.constant 1.42141378 : f32
    %75 = vector.broadcast %cst_49 : f32 to vector<32x16xf32>
    %76 = arith.addf %75, %74 : vector<32x16xf32>
    %77 = arith.mulf %69, %76 : vector<32x16xf32>
    %cst_50 = arith.constant -0.284496725 : f32
    %78 = vector.broadcast %cst_50 : f32 to vector<32x16xf32>
    %79 = arith.addf %78, %77 : vector<32x16xf32>
    %80 = arith.mulf %69, %79 : vector<32x16xf32>
    %cst_51 = arith.constant 0.254829586 : f32
    %81 = vector.broadcast %cst_51 : f32 to vector<32x16xf32>
    %82 = arith.addf %81, %80 : vector<32x16xf32>
    %83 = arith.mulf %69, %82 : vector<32x16xf32>
    %cst_52 = arith.constant 0.000000e+00 : f32
    %84 = vector.broadcast %cst_52 : f32 to vector<32x16xf32>
    %85 = arith.subf %84, %64 : vector<32x16xf32>
    %86 = arith.mulf %85, %64 : vector<32x16xf32>
    %87 = math.exp %86 : vector<32x16xf32>
    %88 = arith.mulf %83, %87 : vector<32x16xf32>
    %cst_53 = arith.constant 1.000000e+00 : f32
    %89 = vector.broadcast %cst_53 : f32 to vector<32x16xf32>
    %90 = arith.subf %89, %88 : vector<32x16xf32>
    %cst_54 = arith.constant 0.000000e+00 : f32
    %91 = vector.broadcast %cst_54 : f32 to vector<32x16xf32>
    %92 = arith.cmpf oge, %63, %91 : vector<32x16xf32>
    %cst_55 = arith.constant 0.000000e+00 : f32
    %93 = vector.broadcast %cst_55 : f32 to vector<32x16xf32>
    %94 = arith.subf %93, %90 : vector<32x16xf32>
    %95 = arith.select %92, %90, %94 : vector<32x16xi1>, vector<32x16xf32>
    %cst_56 = arith.constant 1.000000e+00 : f32
    %96 = vector.broadcast %cst_56 : f32 to vector<32x16xf32>
    %97 = arith.addf %96, %95 : vector<32x16xf32>
    %98 = arith.mulf %61, %97 : vector<32x16xf32>
    %99 = vector.extract_strided_slice %29 {offsets = [0, 0], sizes = [32, 16], strides = [1, 1]} : vector<32x32xf32> to vector<32x16xf32>
    %100 = arith.addf %98, %99 : vector<32x16xf32>
    %c0_57 = arith.constant 0 : index
    %c0_58 = arith.constant 0 : index
    %c0_59 = arith.constant 0 : index
    %101 = vector.load %arg7[%c0_57, %c0_58, %c0_59] : memref<2x32x16xf32, #tpu.memory_space<vmem>>, vector<1x32x16xf32>
    %102 = vector.shape_cast %101 : vector<1x32x16xf32> to vector<32x16xf32>
    %103 = vector.shape_cast %100 : vector<32x16xf32> to vector<1x32x16xf32>
    tpu.vector_store %arg7[%c0_57, %c0_58, %c0_59], %103 {strides = array<i32>} : memref<2x32x16xf32, #tpu.memory_space<vmem>>, vector<1x32x16xf32>,
    %c0_60 = arith.constant 0 : index
    %c0_61 = arith.constant 0 : index
    %c0_62 = arith.constant 0 : index
    %104 = vector.load %arg7[%c0_60, %c0_61, %c0_62] : memref<2x32x16xf32, #tpu.memory_space<vmem>>, vector<1x32x16xf32>
    %105 = vector.shape_cast %104 : vector<1x32x16xf32> to vector<32x16xf32>
    %cst_63 = arith.constant dense<0.000000e+00> : vector<32x16xf32>
    %106 = tpu.matmul %105, %33, %cst_63 {dimension_numbers = #tpu.dot_dimension_numbers<[1], [0], [0], [1], [0, 0, 1, 1], [], []>} : vector<32x16xf32>, vector<16x16xf32>, vector<32x16xf32> -> vector<32x16xf32>
    %107 = vector.extract_strided_slice %106 {offsets = [0, 0], sizes = [32, 8], strides = [1, 1]} : vector<32x16xf32> to vector<32x8xf32>
    %108 = vector.extract_strided_slice %106 {offsets = [0, 8], sizes = [32, 8], strides = [1, 1]} : vector<32x16xf32> to vector<32x8xf32>
    %109 = arith.maximumf %107, %108 : vector<32x8xf32>
    %c0_64 = arith.constant 0 : index
    %c0_65 = arith.constant 0 : index
    %c0_66 = arith.constant 0 : index
    %110 = vector.load %arg8[%c0_64, %c0_65, %c0_66] : memref<2x32x8xf32, #tpu.memory_space<vmem>>, vector<1x32x8xf32>
    %111 = vector.shape_cast %110 : vector<1x32x8xf32> to vector<32x8xf32>
    %112 = vector.shape_cast %109 : vector<32x8xf32> to vector<1x32x8xf32>
    tpu.vector_store %arg8[%c0_64, %c0_65, %c0_66], %112 {strides = array<i32>} : memref<2x32x8xf32, #tpu.memory_space<vmem>>, vector<1x32x8xf32>,
    %113 = vector.extract_strided_slice %28 {offsets = [0, 16], sizes = [32, 16], strides = [1, 1]} : vector<32x32xf32> to vector<32x16xf32>
    %cst_67 = arith.constant dense<0.000000e+00> : vector<32xf32>
    %114 = vector.multi_reduction <add>, %113, %cst_67 [1] : vector<32x16xf32> to vector<32xf32>
    %115 = vector.shape_cast %114 : vector<32xf32> to vector<32x1xf32>
    %116 = arith.mulf %113, %113 : vector<32x16xf32>
    %cst_68 = arith.constant dense<0.000000e+00> : vector<32xf32>
    %117 = vector.multi_reduction <add>, %116, %cst_68 [1] : vector<32x16xf32> to vector<32xf32>
    %118 = vector.shape_cast %117 : vector<32xf32> to vector<32x1xf32>
    %119 = tpu.concatenate %115, %118 in 1 : vector<32x1xf32>, vector<32x1xf32> -> vector<32x2xf32>
    %cst_69 = arith.constant dense<0.000000e+00> : vector<32x2xf32>
    %120 = tpu.matmul %30, %119, %cst_69 {dimension_numbers = #tpu.dot_dimension_numbers<[1], [0], [0], [1], [0, 0, 1, 1], [], []>} : vector<32x32xf32>, vector<32x2xf32>, vector<32x2xf32> -> vector<32x2xf32>
    %121 = vector.extract_strided_slice %120 {offsets = [0, 0], sizes = [32, 1], strides = [1, 1]} : vector<32x2xf32> to vector<32x1xf32>
    %cst_70 = arith.constant 1.562500e-02 : f32
    %122 = vector.broadcast %cst_70 : f32 to vector<32x1xf32>
    %123 = arith.mulf %121, %122 : vector<32x1xf32>
    %124 = vector.extract_strided_slice %120 {offsets = [0, 1], sizes = [32, 1], strides = [1, 1]} : vector<32x2xf32> to vector<32x1xf32>
    %cst_71 = arith.constant 1.562500e-02 : f32
    %125 = vector.broadcast %cst_71 : f32 to vector<32x1xf32>
    %126 = arith.mulf %124, %125 : vector<32x1xf32>
    %127 = arith.mulf %123, %123 : vector<32x1xf32>
    %128 = arith.subf %126, %127 : vector<32x1xf32>
    %cst_72 = arith.constant 9.99999974E-6 : f32
    %129 = vector.broadcast %cst_72 : f32 to vector<32x1xf32>
    %130 = arith.addf %128, %129 : vector<32x1xf32>
    %131 = math.rsqrt %130 : vector<32x1xf32>
    %132 = arith.mulf %131, %31 : vector<32x1xf32>
    %133 = arith.mulf %123, %132 : vector<32x1xf32>
    %134 = arith.subf %32, %133 : vector<32x1xf32>
    %135 = vector.broadcast %132 : vector<32x1xf32> to vector<32x16xf32>
    %136 = arith.mulf %113, %135 : vector<32x16xf32>
    %137 = vector.broadcast %134 : vector<32x1xf32> to vector<32x16xf32>
    %138 = arith.addf %136, %137 : vector<32x16xf32>
    %cst_73 = arith.constant 5.000000e-01 : f32
    %139 = vector.broadcast %cst_73 : f32 to vector<32x16xf32>
    %140 = arith.mulf %139, %138 : vector<32x16xf32>
    %cst_74 = arith.constant 0.707106769 : f32
    %141 = vector.broadcast %cst_74 : f32 to vector<32x16xf32>
    %142 = arith.mulf %138, %141 : vector<32x16xf32>
    %143 = math.absf %142 : vector<32x16xf32>
    %cst_75 = arith.constant 0.327591091 : f32
    %144 = vector.broadcast %cst_75 : f32 to vector<32x16xf32>
    %145 = arith.mulf %144, %143 : vector<32x16xf32>
    %cst_76 = arith.constant 1.000000e+00 : f32
    %146 = vector.broadcast %cst_76 : f32 to vector<32x16xf32>
    %147 = arith.addf %146, %145 : vector<32x16xf32>
    %148 = tpu.reciprocal %147 {approx = true} : vector<32x16xf32> -> vector<32x16xf32>
    %cst_77 = arith.constant 1.06140542 : f32
    %149 = vector.broadcast %cst_77 : f32 to vector<32x16xf32>
    %150 = arith.mulf %148, %149 : vector<32x16xf32>
    %cst_78 = arith.constant -1.45315206 : f32
    %151 = vector.broadcast %cst_78 : f32 to vector<32x16xf32>
    %152 = arith.addf %151, %150 : vector<32x16xf32>
    %153 = arith.mulf %148, %152 : vector<32x16xf32>
    %cst_79 = arith.constant 1.42141378 : f32
    %154 = vector.broadcast %cst_79 : f32 to vector<32x16xf32>
    %155 = arith.addf %154, %153 : vector<32x16xf32>
    %156 = arith.mulf %148, %155 : vector<32x16xf32>
    %cst_80 = arith.constant -0.284496725 : f32
    %157 = vector.broadcast %cst_80 : f32 to vector<32x16xf32>
    %158 = arith.addf %157, %156 : vector<32x16xf32>
    %159 = arith.mulf %148, %158 : vector<32x16xf32>
    %cst_81 = arith.constant 0.254829586 : f32
    %160 = vector.broadcast %cst_81 : f32 to vector<32x16xf32>
    %161 = arith.addf %160, %159 : vector<32x16xf32>
    %162 = arith.mulf %148, %161 : vector<32x16xf32>
    %cst_82 = arith.constant 0.000000e+00 : f32
    %163 = vector.broadcast %cst_82 : f32 to vector<32x16xf32>
    %164 = arith.subf %163, %143 : vector<32x16xf32>
    %165 = arith.mulf %164, %143 : vector<32x16xf32>
    %166 = math.exp %165 : vector<32x16xf32>
    %167 = arith.mulf %162, %166 : vector<32x16xf32>
    %cst_83 = arith.constant 1.000000e+00 : f32
    %168 = vector.broadcast %cst_83 : f32 to vector<32x16xf32>
    %169 = arith.subf %168, %167 : vector<32x16xf32>
    %cst_84 = arith.constant 0.000000e+00 : f32
    %170 = vector.broadcast %cst_84 : f32 to vector<32x16xf32>
    %171 = arith.cmpf oge, %142, %170 : vector<32x16xf32>
    %cst_85 = arith.constant 0.000000e+00 : f32
    %172 = vector.broadcast %cst_85 : f32 to vector<32x16xf32>
    %173 = arith.subf %172, %169 : vector<32x16xf32>
    %174 = arith.select %171, %169, %173 : vector<32x16xi1>, vector<32x16xf32>
    %cst_86 = arith.constant 1.000000e+00 : f32
    %175 = vector.broadcast %cst_86 : f32 to vector<32x16xf32>
    %176 = arith.addf %175, %174 : vector<32x16xf32>
    %177 = arith.mulf %140, %176 : vector<32x16xf32>
    %178 = vector.extract_strided_slice %29 {offsets = [0, 16], sizes = [32, 16], strides = [1, 1]} : vector<32x32xf32> to vector<32x16xf32>
    %179 = arith.addf %177, %178 : vector<32x16xf32>
    %c1_87 = arith.constant 1 : index
    %c0_88 = arith.constant 0 : index
    %c0_89 = arith.constant 0 : index
    %180 = vector.load %arg7[%c1_87, %c0_88, %c0_89] : memref<2x32x16xf32, #tpu.memory_space<vmem>>, vector<1x32x16xf32>
    %181 = vector.shape_cast %180 : vector<1x32x16xf32> to vector<32x16xf32>
    %182 = vector.shape_cast %179 : vector<32x16xf32> to vector<1x32x16xf32>
    tpu.vector_store %arg7[%c1_87, %c0_88, %c0_89], %182 {strides = array<i32>} : memref<2x32x16xf32, #tpu.memory_space<vmem>>, vector<1x32x16xf32>,
    %c1_90 = arith.constant 1 : index
    %c0_91 = arith.constant 0 : index
    %c0_92 = arith.constant 0 : index
    %183 = vector.load %arg7[%c1_90, %c0_91, %c0_92] : memref<2x32x16xf32, #tpu.memory_space<vmem>>, vector<1x32x16xf32>
    %184 = vector.shape_cast %183 : vector<1x32x16xf32> to vector<32x16xf32>
    %cst_93 = arith.constant dense<0.000000e+00> : vector<32x16xf32>
    %185 = tpu.matmul %184, %33, %cst_93 {dimension_numbers = #tpu.dot_dimension_numbers<[1], [0], [0], [1], [0, 0, 1, 1], [], []>} : vector<32x16xf32>, vector<16x16xf32>, vector<32x16xf32> -> vector<32x16xf32>
    %186 = vector.extract_strided_slice %185 {offsets = [0, 0], sizes = [32, 8], strides = [1, 1]} : vector<32x16xf32> to vector<32x8xf32>
    %187 = vector.extract_strided_slice %185 {offsets = [0, 8], sizes = [32, 8], strides = [1, 1]} : vector<32x16xf32> to vector<32x8xf32>
    %188 = arith.maximumf %186, %187 : vector<32x8xf32>
    %c1_94 = arith.constant 1 : index
    %c0_95 = arith.constant 0 : index
    %c0_96 = arith.constant 0 : index
    %189 = vector.load %arg8[%c1_94, %c0_95, %c0_96] : memref<2x32x8xf32, #tpu.memory_space<vmem>>, vector<1x32x8xf32>
    %190 = vector.shape_cast %189 : vector<1x32x8xf32> to vector<32x8xf32>
    %191 = vector.shape_cast %188 : vector<32x8xf32> to vector<1x32x8xf32>
    tpu.vector_store %arg8[%c1_94, %c0_95, %c0_96], %191 {strides = array<i32>} : memref<2x32x8xf32, #tpu.memory_space<vmem>>, vector<1x32x8xf32>,
    return
  }
  func.func @transform_0(%arg0: i32) -> (i32, i32, i32) {
    %c0_i32 = arith.constant 0 : i32
    %c0_i32_0 = arith.constant 0 : i32
    %c0_i32_1 = arith.constant 0 : i32
    return %arg0, %c0_i32, %c0_i32_0 : i32, i32, i32
  }
  func.func @transform_1(%arg0: i32) -> (i32, i32) {
    %c0_i32 = arith.constant 0 : i32
    %c0_i32_0 = arith.constant 0 : i32
    %c0_i32_1 = arith.constant 0 : i32
    return %c0_i32, %c0_i32_0 : i32, i32
  }
  func.func @transform_2(%arg0: i32) -> (i32, i32) {
    %c0_i32 = arith.constant 0 : i32
    %c0_i32_0 = arith.constant 0 : i32
    %c0_i32_1 = arith.constant 0 : i32
    return %c0_i32, %c0_i32_0 : i32, i32
  }
  func.func @transform_3(%arg0: i32) -> (i32, i32) {
    %c0_i32 = arith.constant 0 : i32
    %c0_i32_0 = arith.constant 0 : i32
    %c0_i32_1 = arith.constant 0 : i32
    return %c0_i32, %c0_i32_0 : i32, i32
  }
  func.func @transform_4(%arg0: i32) -> (i32, i32) {
    %c0_i32 = arith.constant 0 : i32
    %c0_i32_0 = arith.constant 0 : i32
    %c0_i32_1 = arith.constant 0 : i32
    return %c0_i32, %c0_i32_0 : i32, i32
  }
  func.func @transform_5(%arg0: i32) -> (i32, i32) {
    %c0_i32 = arith.constant 0 : i32
    %c0_i32_0 = arith.constant 0 : i32
    %c0_i32_1 = arith.constant 0 : i32
    return %c0_i32, %c0_i32_0 : i32, i32
  }
  func.func @transform_6(%arg0: i32) -> (i32, i32, i32) {
    %c0_i32 = arith.constant 0 : i32
    %c0_i32_0 = arith.constant 0 : i32
    %c0_i32_1 = arith.constant 0 : i32
    return %arg0, %c0_i32, %c0_i32_0 : i32, i32, i32
  }
  func.func @transform_7(%arg0: i32) -> (i32, i32, i32) {
    %c0_i32 = arith.constant 0 : i32
    %c0_i32_0 = arith.constant 0 : i32
    %c0_i32_1 = arith.constant 0 : i32
    return %arg0, %c0_i32, %c0_i32_0 : i32, i32, i32
  }
}

</mosaic_0001>

<bundles_post_ra>
// kernel: tpu_custom_call.1
= control target key start
LH: loop header
LB: loop body
LE: loop exit
PB: predicated region body
PF: predicated region fallthrough
CT: control target
= control target key end

     0   :  { %s1927_s24 = smov 0   ;;  %s2362_s0 = inlined_call_operand.vmem [shape: bf16[4,4,18], index: 0, kind: input, shape index: {}]   ;;  %s2363_s1 = inlined_call_operand.vmem [shape: bf16[64,16], index: 1, kind: input, shape index: {}]   ;;  %s2364_s2 = inlined_call_operand.vmem [shape: f32[32,1], index: 2, kind: input, shape index: {}]   ;;  %s2365_s3 = inlined_call_operand.vmem [shape: f32[32,1], index: 3, kind: input, shape index: {}]   ;;  %s2366_s4 = inlined_call_operand.vmem [shape: f32[32,32], index: 4, kind: input, shape index: {}]   ;;  %s2367_s5 = inlined_call_operand.vmem [shape: f32[16,16], index: 5, kind: input, shape index: {}]   ;;  %s2368_s6 = inlined_call_operand.vmem [shape: f32[4,32,16], index: 6, kind: output, shape index: {0}]   ;;  %s2369_s7 = inlined_call_operand.vmem [shape: f32[4,32,8], index: 7, kind: output, shape index: {1}]  }
   0x1 LB: > { %s1606_s25 = sadd.s32 4294967295, %s1873_s24   ;;  %p1610_p0 = scmp.ge.s32.totalorder %s1873_s24, 1  ;;  %s1873_s24 = sphi %s1927_s24, %s18_s24  }
   0x2   : > { %p241_p1 = scmp.lt.s32.totalorder %s1873_s24, 3 }
   0x4   : > { %p242_p2 = pnand %p1610_p0, %p241_p1 }
   0x5   : > { %s1611_s26 = sshll.u32 (!%p242_p2), %s1606_s25, 1  ;;  %v301_v0 = vlaneseq (!%p242_p2)  ;;  %v1875_v1 = vmov (!%p242_p2), 1983009808   ;;  %v1876_v5 = vmov (!%p242_p2), 0.0   ;;  %vm310_vm1 = vcmask (!%p242_p2), 261126   ;;  %s1877_s8 = smov (!%p242_p2), 16  }
   0x6   : > { %245 = sbr.rel (%p242_p2) target bundleno = 1762 (0x6e2), region = 44  ;;  %p281_p3 = scmp.lt.s32.totalorder (!%p242_p2), %s1611_s26, 3  ;;  %v319_v2 = vunpack.c.l.s4 (!%p242_p2), %v1875_v1  ;;  %vm313_vm2 = vcmask (!%p242_p2), 123904   ;;  %v1815_v19 = vld [vmem:[%s2363_s1] sm:$0xff] (!%p242_p2)   ;;  %vm419_vm3 = vcmask (!%p242_p2), 130048   ;;  %vm358_vm4 = vcmask (!%p242_p2), 255104  }
   0x7   : > { %v302_v3 = vshrl.u32 (!%p242_p2), %v301_v0, 7  ;;  %s1878_s9 = smov (!%p242_p2), 126   ;;  %s1879_s10 = smov (!%p242_p2), 127   ;;  %1701 = vmatprep.mubr.msk.bf16.mxu0 (!%p242_p2), %vm419_vm3, %v1815_v19  ;;  %vm343_vm5 = vcmask (!%p242_p2), 128004   ;;  %vm328_vm6 = vcmask (!%p242_p2), 125954   ;;  %vm373_vm7 = vcmask (!%p242_p2), 257154  }
   0x8   : > { %v320_v4 = vunpack.c.0.s8 (!%p242_p2), %v319_v2  ;;  %s1880_s11 = smov (!%p242_p2), 15   ;;  %s1881_s14 = smov (!%p242_p2), 14   ;;  %vm388_vm8 = vcmask (!%p242_p2), 259204   ;;  %v1816_v26 = vld [vmem:[%s2363_s1 + $0x8] sm:$0xff] (!%p242_p2)   ;;  %v1817_v55 = vld [vmem:[%s2363_s1 + $0x10] sm:$0xff] (!%p242_p2)   ;;  %v1818_v56 = vld [vmem:[%s2363_s1 + $0x18] sm:$0xff] (!%p242_p2)  }
   0x9   : > { %vm303_vm0 = vcmp.eq.s32.totalorder (!%p242_p2), %v302_v3, 0  ;;  %s1882_s17 = smov (!%p242_p2), 112   ;;  %v497_v61 = vld [vmem:[%s2366_s4] sm:$0xff] (!%p242_p2)  ;;  %vm544_vm9 = vcmask (!%p242_p2), 261120   ;;  %vm539_vm10 = vcmask (!%p242_p2), 7168  }
   0xa   : > { %v1619_v6 = vsel (!%p242_p2), %vm303_vm0, 1.0, %v1876_v5  ;;  %v323_v9 = vsub.s32 (!%p242_p2), %v320_v4, %v302_v3  ;;  %1717 = vmatprep.mubr.msk.f32.mxu1 (!%p242_p2), %vm544_vm9, %v497_v61 }
   0xb   : > { %v306_v7 = vpack.c.bf16 (!%p242_p2), %v1619_v6, %v1619_v6 }
   0xd   : > { %s2371_s26 = smov (!%p281_p3, %s1611_s26), 3  ;;  %v308_v12 = vrot.slane %v306_v7, 2 }
   0xe   : > { %s1612_s27 = sshll.u32 %s2371_s26, 1 }
   0xf   : > { %s284_s30 = scalar_lea.vmem %s2362_s0, %s1612_s27  ;;  %311 = vst.msk [vmem:[#allocation2] sm:$0xc0] %vm310_vm1, %v308_v12 }
  0x10   : > { %v1620_v8 = vld.sshfl [vmem:[%s284_s30] sm:$0x3 pattern:$0x76325410] }
  0x11   : > { %v339_v10 = vcombine.low %v1620_v8, %v1620_v8  ;;  %v1622_v11 = vld.sshfl [vmem:[%s284_s30 + $0x2] sm:$0x3 pattern:$0x76325410]  ;;  %v312_v15 = vld [vmem:[%s284_s30] sm:$0x3] }
  0x12   : > { %355 = vrot.lane.b32.xlu1 %v1622_v11, %s1877_s8  ;;  %v1813_v13 = vld [vmem:[%s284_s30] ss:$0 sps:$4 sm:$0x33]   ;;  %v1814_v14 = vld [vmem:[%s284_s30 + $0x2] ss:$0 sps:$4 sm:$0x33]   ;;  %v384_v18 = vcombine.low %v1622_v11, %v1622_v11 }
  0x13   : > { %340 = vrot.lane.b32.xlu0 %v339_v10, %s1878_s9  ;;  %v324_v16 = vrot.slane %v1813_v13, %v323_v9  ;;  %314 = vst.msk [vmem:[#allocation2] sm:$0x3] %vm313_vm2, %v312_v15  ;;  %v369_v17 = vrot.slane %v1814_v14, %v323_v9  ;;  %v498_v14 = vld [vmem:[%s2366_s4 + $0x8] sm:$0xff]  ;;  %s1883_s9 = smov 1  }
  0x16   : > { %370 = vrot.lane.b32.xlu1 %v369_v17, %s1880_s11  ;;  %s1664_s11 = sshll.u32 %s2371_s26, 5 }
  0x17   : > { %325 = vrot.lane.b32.xlu0 %v324_v16, %s1879_s10  ;;  %v499_v16 = vld [vmem:[%s2366_s4 + $0x10] sm:$0xff]  ;;  %s298_s18 = scalar_lea.vmem %s2369_s7, %s1664_s11 }
  0x1b   : > { %385 = vrot.lane.b32.xlu0 %v384_v18, %s1881_s14  ;;  %s1886_s14 = smov 120  }
  0x84   : > { %v356_v20 = vpop.permute.xlu1 %355 }
  0x85   : > { %v341_v21 = vpop.permute.xlu0 %340  ;;  %359 = vst.msk [vmem:[#allocation2] sm:$0x3] %vm358_vm4, %v356_v20  ;;  %v500_v20 = vld [vmem:[%s2366_s4 + $0x18] sm:$0xff] }
  0x86   : > { %344 = vst.msk [vmem:[#allocation2] sm:$0x30] %vm343_vm5, %v341_v21 }
  0x88   : > { %v371_v23 = vpop.permute.xlu1 %370 }
  0x89   : > { %v326_v22 = vpop.permute.xlu0 %325 }
  0x8a   : > { %329 = vst.msk [vmem:[#allocation2] sm:$0xc] %vm328_vm6, %v326_v22 }
  0x8b   : > { %374 = vst.msk [vmem:[#allocation2] sm:$0xc] %vm373_vm7, %v371_v23 }
  0x8d   : > { %v386_v24 = vpop.permute.xlu0 %385 }
  0x8e   : > { %389 = vst.msk [vmem:[#allocation2] sm:$0x30] %vm388_vm8, %v386_v24 }
  0x95   : > { %v398_v25 = vld [vmem:[#allocation2] sm:$0xff] }
  0x96   : > { %1699 = vmatprep.subr.bf16.mxu0 %v398_v25 }
  0x97   : > { %1700 = vmatpush3.bf16.msra.mxu0 %v398_v25 }
  0x9a   : > { %1702 = vmatmul.mubr.msk.bf16.vlgmr.msra.gmra.mrb[0].mxu0 %vm419_vm3, %v1816_v26 }
  0x9b   : > { %1705 = vmatprep.mubr.msk.bf16.mxu0 %vm419_vm3, %v1817_v55 }
  0xa2   : > { %1706 = vmatmul.mubr.msk.bf16.gmra.mrb[4].mxu0 %vm419_vm3, %v1818_v56 }
  0xa3   : > { %1741 = vmatprep.mubr.msk.f32.mxu0 %vm544_vm9, %v497_v61 }
 0x16d   : > { %v1950_v27 = vpop.f32.mrb[0].mxu0 }
 0x16e   : > { %1012 = vrot.lane.b32.xlu1 %v1950_v27, %s1882_s17  ;;  %v1954_v28 = vpop.f32.mrb[1].mxu0  ;;  %v525_v33 = vmul.f32 %v1950_v27, %v1950_v27  ;;  %v517_v57 = vsel %vm419_vm3, %v1950_v27, 0.0 }
 0x16f   : > { %v1956_v29 = vpop.f32.mrb[2].mxu0  ;;  %v523_v31 = vmul.f32 %v1954_v28, %v1954_v28  ;;  %v511_v51 = vsel %vm419_vm3, %v1954_v28, 0.0 }
 0x170   : > { %1014 = vrot.lane.b32.xlu0 %v1956_v29, %s1882_s17  ;;  %v1960_v30 = vpop.f32.mrb[3].mxu0  ;;  %v526_v34 = vmul.f32 %v1956_v29, %v1956_v29  ;;  %v520_v58 = vsel %vm419_vm3, %v1956_v29, 0.0  ;;  %v533_v59 = vsel %vm419_vm3, %v525_v33, 0.0 }
 0x171   : > { %v524_v32 = vmul.f32 %v1960_v30, %v1960_v30  ;;  %v514_v52 = vsel %vm419_vm3, %v1960_v30, 0.0  ;;  %v527_v53 = vsel %vm419_vm3, %v523_v31, 0.0 }
 0x172   : > { %1008 = vrot.lane.b32.xlu1 %v1954_v28, %s1882_s17  ;;  %v536_v60 = vsel %vm419_vm3, %v526_v34, 0.0 }
 0x173   : > { %v530_v54 = vsel %vm419_vm3, %v524_v32, 0.0 }
 0x174   : > { %1010 = vrot.lane.b32.xlu0 %v1960_v30, %s1882_s17 }
 0x176   : > { %1036 = vrot.lane.b32.xlu1 %v523_v31, %s1882_s17 }
 0x178   : > { %1038 = vrot.lane.b32.xlu0 %v524_v32, %s1882_s17 }
 0x17a   : > { %1040 = vrot.lane.b32.xlu1 %v525_v33, %s1882_s17  ;;  %v2034_v33 = vpop.f32.mrb[4].mxu0 }
 0x17c   : > { %1042 = vrot.lane.b32.xlu0 %v526_v34, %s1882_s17  ;;  %v2036_v34 = vpop.f32.mrb[5].mxu0 }
 0x1e0   : > { %v1013_v35 = vpop.permute.xlu1 %1012 }
 0x1e1   : > { %v1026_v36 = vsel %vm419_vm3, %v1013_v35, 0.0  ;;  %v2038_v35 = vpop.f32.mrb[6].mxu0 }
 0x1e2   : > { %v1015_v37 = vpop.permute.xlu0 %1014  ;;  %1027 = vadd.xlane.f32.xlu0 %v1026_v36  ;;  %v2040_v36 = vpop.f32.mrb[7].mxu0 }
 0x1e3   : > { %v1029_v43 = vsel %vm419_vm3, %v1015_v37, 0.0 }
 0x1e4   : > { %v1009_v38 = vpop.permute.xlu1 %1008 }
 0x1e5   : > { %v1020_v39 = vsel %vm419_vm3, %v1009_v38, 0.0 }
 0x1e6   : > { %1021 = vadd.xlane.f32.xlu1 %v1020_v39  ;;  %v1011_v40 = vpop.permute.xlu0 %1010 }
 0x1e7   : > { %v1023_v41 = vsel %vm419_vm3, %v1011_v40, 0.0 }
 0x1e8   : > { %v1037_v42 = vpop.permute.xlu1 %1036  ;;  %1024 = vadd.xlane.f32.xlu0 %v1023_v41 }
 0x1e9   : > { %v1048_v45 = vsel %vm419_vm3, %v1037_v42, 0.0 }
 0x1ea   : > { %1030 = vadd.xlane.f32.xlu1 %v1029_v43  ;;  %v1039_v44 = vpop.permute.xlu0 %1038 }
 0x1eb   : > { %v1051_v47 = vsel %vm419_vm3, %v1039_v44, 0.0 }
 0x1ec   : > { %v1041_v46 = vpop.permute.xlu1 %1040  ;;  %1049 = vadd.xlane.f32.xlu0 %v1048_v45 }
 0x1ed   : > { %v1054_v49 = vsel %vm419_vm3, %v1041_v46, 0.0 }
 0x1ee   : > { %1052 = vadd.xlane.f32.xlu1 %v1051_v47  ;;  %v1043_v48 = vpop.permute.xlu0 %1042 }
 0x1ef   : > { %v1057_v50 = vsel %vm419_vm3, %v1043_v48, 0.0 }
 0x1f0   : > { %1055 = vadd.xlane.f32.xlu0 %v1054_v49  ;;  %v502_v49 = vld [vmem:[%s2364_s2 + $0x8] sm:$0xff] }
 0x1f2   : > { %1058 = vadd.xlane.f32.xlu1 %v1057_v50  ;;  %v501_v50 = vld [vmem:[%s2364_s2] sm:$0xff] }
 0x1f4   : > { %512 = vadd.xlane.f32.xlu0 %v511_v51  ;;  %v504_v51 = vld [vmem:[%s2364_s2 + $0x18] sm:$0xff] }
 0x1f6   : > { %515 = vadd.xlane.f32.xlu1 %v514_v52  ;;  %v503_v52 = vld [vmem:[%s2364_s2 + $0x10] sm:$0xff] }
 0x1f8   : > { %528 = vadd.xlane.f32.xlu0 %v527_v53 }
 0x1fa   : > { %531 = vadd.xlane.f32.xlu1 %v530_v54 }
 0x1fc   : > { %518 = vadd.xlane.f32.xlu0 %v517_v57 }
 0x1fe   : > { %521 = vadd.xlane.f32.xlu1 %v520_v58 }
 0x200   : > { %534 = vadd.xlane.f32.xlu0 %v533_v59 }
 0x202   : > { %537 = vadd.xlane.f32.xlu1 %v536_v60 }
 0x26f   : > { %v1028_v62 = vpop.xlane.xlu0 %1027 }
 0x273   : > { %v1022_v63 = vpop.xlane.xlu1 %1021 }
 0x275   : > { %v1025_v0 = vpop.xlane.xlu0 %1024 }
 0x277   : > { %v1031_v1 = vpop.xlane.xlu1 %1030 }
 0x279   : > { %v1050_v2 = vpop.xlane.xlu0 %1049 }
 0x27a   : > { %v1060_v4 = vsel %vm539_vm10, %v1022_v63, %v1050_v2 }
 0x27b   : > { %v1053_v3 = vpop.xlane.xlu1 %1052 }
 0x27c   : > { %v1061_v5 = vsel %vm539_vm10, %v1025_v0, %v1053_v3 }
 0x27d   : > { %v1769_v6 = vpack.c.bf16 %v1061_v5, %v1060_v4  ;;  %v1056_v7 = vpop.xlane.xlu0 %1055 }
 0x27e   : > { %v1062_v9 = vsel %vm539_vm10, %v1028_v62, %v1056_v7 }
 0x27f   : > { %v1059_v8 = vpop.xlane.xlu1 %1058  ;;  %1770 = vmatprep.subr.bf16.mxu0 %v1769_v6 }
 0x280   : > { %v1063_v10 = vsel %vm539_vm10, %v1031_v1, %v1059_v8  ;;  %1772 = vmatpush3.bf16.msra.mxu0 %v1769_v6  ;;  %v1884_v1 = vmov 1  }
 0x281   : > { %v1773_v11 = vpack.c.bf16 %v1063_v10, %v1062_v9  ;;  %v513_v12 = vpop.xlane.xlu0 %512  ;;  %1802 = vset.pattern.permute.xlu0 %v1884_v1  ;;  %1801 = vset.pattern.permute.xlu1 %v1884_v1 }
 0x283   : > { %1774 = vmatprep.subr.bf16.mxu0 %v1773_v11  ;;  %v516_v13 = vpop.xlane.xlu1 %515 }
 0x284   : > { %1776 = vmatpush3.bf16.msra.mxu0 %v1773_v11 }
 0x285   : > { %v529_v15 = vpop.xlane.xlu0 %528 }
 0x286   : > { %v540_v18 = vsel %vm539_vm10, %v513_v12, %v529_v15 }
 0x287   : > { %1742 = vmatmul.mubr.msk.f32.vlgmr.msra.gmra.mrb[8].mxu0 %vm544_vm9, %v498_v14  ;;  %v532_v17 = vpop.xlane.xlu1 %531 }
 0x288   : > { %v541_v19 = vsel %vm539_vm10, %v516_v13, %v532_v17  ;;  %1744 = vmatprep.mubr.msk.f32.mxu0 %vm544_vm9, %v499_v16 }
 0x289   : > { %v519_v21 = vpop.xlane.xlu0 %518  ;;  %v1757_v22 = vpack.c.bf16 %v541_v19, %v540_v18 }
 0x28b   : > { %1758 = vmatprep.subr.bf16.mxu1 %v1757_v22  ;;  %1745 = vmatmul.mubr.msk.f32.gmra.mrb[10].mxu0 %vm544_vm9, %v500_v20  ;;  %v522_v23 = vpop.xlane.xlu1 %521 }
 0x28c   : > { %1760 = vmatpush3.bf16.msra.mxu1 %v1757_v22 }
 0x28d   : > { %v535_v24 = vpop.xlane.xlu0 %534 }
 0x28e   : > { %v542_v26 = vsel %vm539_vm10, %v519_v21, %v535_v24 }
 0x28f   : > { %v538_v25 = vpop.xlane.xlu1 %537 }
 0x290   : > { %v543_v31 = vsel %vm539_vm10, %v522_v23, %v538_v25 }
 0x291   : > { %v1761_v32 = vpack.c.bf16 %v543_v31, %v542_v26 }
 0x293   : > { %1762 = vmatprep.subr.bf16.mxu1 %v1761_v32 }
 0x294   : > { %1764 = vmatpush3.bf16.msra.mxu1 %v1761_v32 }
 0x297   : > { %1718 = vmatmul.mubr.msk.f32.vlgmr.msra.gmra.mrb[0].mxu1 %vm544_vm9, %v498_v14 }
 0x298   : > { %1720 = vmatprep.mubr.msk.f32.mxu1 %vm544_vm9, %v499_v16 }
 0x29b   : > { %1721 = vmatmul.mubr.msk.f32.gmra.mrb[2].mxu1 %vm544_vm9, %v500_v20 }
 0x35a   : > { %v1743_v37 = vpop.f32.mrb[8].mxu0 }
 0x35b   : > { %v2042_v38 = vmul.f32 0.015625, %v1743_v37  ;;  %v1130_v39 = vpop.f32.mrb[9].mxu0 }
 0x35c   : > { %v2044_v40 = vmul.f32 0.015625, %v1130_v39 }
 0x35d   : > { %v1154_v41 = vmul.f32 %v2042_v38, %v2042_v38 }
 0x35e   : > { %v1746_v42 = vpop.f32.mrb[10].mxu0  ;;  %v1153_v43 = vmul.f32 %v2044_v40, %v2044_v40 }
 0x35f   : > { %v2050_v44 = vmul.f32 0.015625, %v1746_v42  ;;  %1163 = vrot.lane.b32.xlu1 %v1154_v41, %s1883_s9  ;;  %v1140_v45 = vpop.f32.mrb[11].mxu0 }
 0x360   : > { %v2053_v46 = vmul.f32 0.015625, %v1140_v45  ;;  %1161 = vrot.lane.b32.xlu0 %v1153_v43, %s1883_s9 }
 0x361   : > { %v1156_v47 = vmul.f32 %v2050_v44, %v2050_v44 }
 0x362   : > { %v1155_v48 = vmul.f32 %v2053_v46, %v2053_v46 }
 0x364   : > { %1167 = vrot.lane.b32.xlu0 %v1156_v47, %s1883_s9  ;;  %1165 = vrot.lane.b32.xlu1 %v1155_v48, %s1883_s9 }
 0x368   : > { %684 = vrot.lane.b32.xlu0 %v502_v49, %s1883_s9  ;;  %682 = vrot.lane.b32.xlu1 %v501_v50, %s1883_s9 }
 0x36a   : > { %v1719_v53 = vpop.f32.mrb[0].mxu1 }
 0x36b   : > { %v2076_v54 = vmul.f32 0.015625, %v1719_v53  ;;  %v623_v55 = vpop.f32.mrb[1].mxu1 }
 0x36c   : > { %v2078_v56 = vmul.f32 0.015625, %v623_v55  ;;  %688 = vrot.lane.b32.xlu0 %v504_v51, %s1883_s9  ;;  %686 = vrot.lane.b32.xlu1 %v503_v52, %s1883_s9 }
 0x36d   : > { %v647_v57 = vmul.f32 %v2076_v54, %v2076_v54 }
 0x36e   : > { %v1722_v58 = vpop.f32.mrb[2].mxu1  ;;  %v646_v59 = vmul.f32 %v2078_v56, %v2078_v56 }
 0x36f   : > { %v2086_v60 = vmul.f32 0.015625, %v1722_v58  ;;  %v633_v61 = vpop.f32.mrb[3].mxu1 }
 0x370   : > { %v2088_v62 = vmul.f32 0.015625, %v633_v61  ;;  %656 = vrot.lane.b32.xlu0 %v647_v57, %s1883_s9  ;;  %654 = vrot.lane.b32.xlu1 %v646_v59, %s1883_s9  ;;  %v1885_v61 = vmov 0  }
 0x371   : > { %v649_v63 = vmul.f32 %v2086_v60, %v2086_v60 }
 0x372   : > { %v648_v0 = vmul.f32 %v2088_v62, %v2088_v62 }
 0x374   : > { %660 = vrot.lane.b32.xlu0 %v649_v63, %s1883_s9  ;;  %658 = vrot.lane.b32.xlu1 %v648_v0, %s1883_s9  ;;  %v506_v63 = vld [vmem:[%s2365_s3 + $0x8] sm:$0xff] }
 0x3d1   : > { %v1164_v2 = vpop.permute.xlu1 %1163 }
 0x3d2   : > { %v1174_v3 = vsub.f32 %v2042_v38, %v1164_v2  ;;  %v1162_v4 = vpop.permute.xlu0 %1161 }
 0x3d3   : > { %v1173_v5 = vsub.f32 %v2044_v40, %v1162_v4 }
 0x3d4   : > { %v1178_v6 = vadd.f32 1e-05, %v1174_v3 }
 0x3d5   : > { %v1177_v7 = vadd.f32 1e-05, %v1173_v5 }
 0x3d6   : > { %1819 = vrsqrt.f32 %v1178_v6  ;;  %v1168_v8 = vpop.permute.xlu0 %1167  ;;  %v1166_v9 = vpop.permute.xlu1 %1165  ;;  %v505_v6 = vld [vmem:[%s2365_s3] sm:$0xff] }
 0x3d7   : > { %1821 = vrsqrt.f32 %v1177_v7  ;;  %v1176_v10 = vsub.f32 %v2050_v44, %v1168_v8  ;;  %v1175_v11 = vsub.f32 %v2053_v46, %v1166_v9  ;;  %v507_v7 = vld [vmem:[%s2365_s3 + $0x10] sm:$0xff] }
 0x3d9   : > { %v1180_v12 = vadd.f32 1e-05, %v1176_v10  ;;  %v1179_v13 = vadd.f32 1e-05, %v1175_v11 }
 0x3da   : > { %v685_v14 = vpop.permute.xlu0 %684  ;;  %v683_v15 = vpop.permute.xlu1 %682 }
 0x3db   : > { %1823 = vrsqrt.f32 %v1180_v12 }
 0x3dc   : > { %1825 = vrsqrt.f32 %v1179_v13 }
 0x3de   : > { %v689_v16 = vpop.permute.xlu0 %688  ;;  %v687_v17 = vpop.permute.xlu1 %686 }
 0x3e0   : > { %v1820_v18 = vpop.eup %1819 }
 0x3e1   : > { %v1822_v19 = vpop.eup %1821  ;;  %v1186_v20 = vmul.f32 %v1820_v18, %v685_v14 }
 0x3e2   : > { %v1185_v21 = vmul.f32 %v1822_v19, %v683_v15  ;;  %v657_v22 = vpop.permute.xlu0 %656  ;;  %v655_v23 = vpop.permute.xlu1 %654 }
 0x3e3   : > { %v667_v24 = vsub.f32 %v2076_v54, %v657_v22  ;;  %v666_v25 = vsub.f32 %v2078_v56, %v655_v23  ;;  %1195 = vrot.lane.b32.xlu0 %v1186_v20, %s1879_s10 }
 0x3e4   : > { %1193 = vrot.lane.b32.xlu1 %v1185_v21, %s1879_s10 }
 0x3e5   : > { %v1824_v26 = vpop.eup %1823  ;;  %v671_v31 = vadd.f32 1e-05, %v667_v24  ;;  %v670_v32 = vadd.f32 1e-05, %v666_v25 }
 0x3e6   : > { %v1826_v37 = vpop.eup %1825  ;;  %v1188_v39 = vmul.f32 %v1824_v26, %v689_v16  ;;  %v661_v41 = vpop.permute.xlu0 %660 }
 0x3e7   : > { %v659_v42 = vpop.permute.xlu1 %658  ;;  %v1187_v43 = vmul.f32 %v1826_v37, %v687_v17  ;;  %1827 = vrsqrt.f32 %v671_v31  ;;  %v669_v45 = vsub.f32 %v2086_v60, %v661_v41 }
 0x3e8   : > { %v668_v47 = vsub.f32 %v2088_v62, %v659_v42  ;;  %1829 = vrsqrt.f32 %v670_v32  ;;  %1199 = vrot.lane.b32.xlu0 %v1188_v39, %s1879_s10 }
 0x3e9   : > { %v673_v48 = vadd.f32 1e-05, %v669_v45  ;;  %1197 = vrot.lane.b32.xlu1 %v1187_v43, %s1879_s10 }
 0x3ea   : > { %v672_v49 = vadd.f32 1e-05, %v668_v47 }
 0x3eb   : > { %1831 = vrsqrt.f32 %v673_v48 }
 0x3ec   : > { %1833 = vrsqrt.f32 %v672_v49 }
 0x3f1   : > { %v1828_v50 = vpop.eup %1827 }
 0x3f2   : > { %v1830_v51 = vpop.eup %1829  ;;  %v695_v52 = vmul.f32 %v1828_v50, %v685_v14 }
 0x3f3   : > { %v694_v53 = vmul.f32 %v1830_v51, %v683_v15 }
 0x3f4   : > { %704 = vrot.lane.b32.xlu0 %v695_v52, %s1879_s10 }
 0x3f5   : > { %v1832_v55 = vpop.eup %1831  ;;  %702 = vrot.lane.b32.xlu1 %v694_v53, %s1879_s10 }
 0x3f6   : > { %v1834_v57 = vpop.eup %1833  ;;  %v697_v58 = vmul.f32 %v1832_v55, %v689_v16 }
 0x3f7   : > { %v696_v59 = vmul.f32 %v1834_v57, %v687_v17 }
 0x3f8   : > { %708 = vrot.lane.b32.xlu0 %v697_v58, %s1879_s10 }
 0x3f9   : > { %706 = vrot.lane.b32.xlu1 %v696_v59, %s1879_s10 }
 0x3fc   : > { %1218 = vperm.xlu0 %1802, %v1186_v20  }
 0x3fd   : > { %1214 = vperm.xlu1 %1801, %v1185_v21  }
 0x400   : > { %1222 = vperm.xlu0 %1802, %v1187_v43  }
 0x401   : > { %1803 = vset.pattern.permute.xlu1 %v1885_v61 }
 0x404   : > { %1805 = vset.pattern.permute.xlu0 %v1885_v61 }
 0x455   : > { %v1196_v0 = vpop.permute.xlu0 %1195 }
 0x456   : > { %v1206_v2 = vmul.f32 %v1196_v0, %v2042_v38  ;;  %v1194_v3 = vpop.permute.xlu1 %1193 }
 0x457   : > { %v1205_v5 = vmul.f32 %v1194_v3, %v2044_v40  ;;  %v508_v40 = vld [vmem:[%s2365_s3 + $0x18] sm:$0xff] }
 0x458   : > { %v1210_v4 = vsub.f32 %v506_v63, %v1206_v2 }
 0x459   : > { %v1209_v9 = vsub.f32 %v505_v6, %v1205_v5 }
 0x45a   : > { %1240 = vperm.xlu1 %1803, %v1210_v4   ;;  %v1200_v38 = vpop.permute.xlu0 %1199 }
 0x45b   : > { %v1198_v8 = vpop.permute.xlu1 %1197  ;;  %v1208_v12 = vmul.f32 %v1200_v38, %v2050_v44 }
 0x45c   : > { %v1207_v10 = vmul.f32 %v1198_v8, %v2053_v46 }
 0x45d   : > { %v1212_v13 = vsub.f32 %v508_v40, %v1208_v12 }
 0x45e   : > { %v1211_v11 = vsub.f32 %v507_v7, %v1207_v10  ;;  %1235 = vperm.xlu1 %1803, %v1209_v9  }
 0x460   : > { %1245 = vperm.xlu0 %1805, %v1211_v11  }
 0x462   : > { %1804 = vset.pattern.permute.xlu1 %v1884_v1 }
 0x463   : > { %1226 = vperm.xlu1 %1804, %v1188_v39  }
 0x464   : > { %1808 = vset.pattern.permute.xlu0 %v1884_v1 }
 0x465   : > { %727 = vperm.xlu0 %1808, %v695_v52  }
 0x466   : > { %v705_v16 = vpop.permute.xlu0 %704 }
 0x467   : > { %v703_v14 = vpop.permute.xlu1 %702  ;;  %1806 = vset.pattern.permute.xlu1 %v1885_v61  ;;  %v715_v18 = vmul.f32 %v705_v16, %v2076_v54  ;;  %v510_v54 = vld [vmem:[%s2367_s5 + $0x8] sm:$0xff] }
 0x468   : > { %1250 = vperm.xlu1 %1806, %v1212_v13   ;;  %v714_v15 = vmul.f32 %v703_v14, %v2078_v56 }
 0x469   : > { %731 = vperm.xlu0 %1808, %v696_v59   ;;  %v719_v20 = vsub.f32 %v506_v63, %v715_v18 }
 0x46a   : > { %v718_v19 = vsub.f32 %v505_v6, %v714_v15  ;;  %v709_v21 = vpop.permute.xlu0 %708 }
 0x46b   : > { %v707_v46 = vpop.permute.xlu1 %706  ;;  %v717_v22 = vmul.f32 %v709_v21, %v2086_v60 }
 0x46c   : > { %v716_v44 = vmul.f32 %v707_v46, %v2088_v62  ;;  %1807 = vset.pattern.permute.xlu1 %v1884_v1  ;;  %v509_v62 = vld [vmem:[%s2367_s5] sm:$0xff] }
 0x46d   : > { %723 = vperm.xlu1 %1807, %v694_v53   ;;  %1811 = vset.pattern.permute.xlu0 %v1885_v61  ;;  %v721_v56 = vsub.f32 %v508_v40, %v717_v22  ;;  %v2146_v23 = vpack.c.bf16 %v510_v54, %v509_v62 }
 0x46e   : > { %v720_v17 = vsub.f32 %v507_v7, %v716_v44 }
 0x46f   : > { %1766 = vmatprep.subr.bf16.mxu1 %v2146_v23 }
 0x470   : > { %754 = vperm.xlu0 %1811, %v720_v17   ;;  %1768 = vmatpush3.bf16.msra.mxu1 %v2146_v23 }
 0x471   : > { %1809 = vset.pattern.permute.xlu1 %v1885_v61  ;;  %1778 = vmatprep.subr.bf16.mxu1 %v2146_v23 }
 0x472   : > { %744 = vperm.xlu1 %1809, %v718_v19  }
 0x476   : > { %749 = vperm.xlu1 %1809, %v719_v20  }
 0x47a   : > { %1810 = vset.pattern.permute.xlu1 %v1884_v1 }
 0x47b   : > { %735 = vperm.xlu1 %1810, %v697_v58   ;;  %v1219_v60 = vpop.permute.xlu0 %1218 }
 0x47c   : > { %v1215_v1 = vpop.permute.xlu1 %1214  ;;  %v1230_v24 = vmul.f32 %v1219_v60, %v1960_v30 }
 0x47d   : > { %v1229_v32 = vmul.f32 %v1215_v1, %v1954_v28 }
 0x47f   : > { %1812 = vset.pattern.permute.xlu1 %v1885_v61  ;;  %v1223_v31 = vpop.permute.xlu0 %1222 }
 0x480   : > { %759 = vperm.xlu1 %1812, %v721_v56   ;;  %v1231_v43 = vmul.f32 %v1950_v27, %v1223_v31 }
 0x4d9   : > { %v1241_v25 = vpop.permute.xlu1 %1240 }
 0x4da   : > { %v2152_v26 = vadd.f32 %v1241_v25, %v1230_v24 }
 0x4dc   : > { %v2156_v37 = vmul.f32 0.70710677, %v2152_v26 }
 0x4dd   : > { %v1236_v39 = vpop.permute.xlu1 %1235 }
 0x4de   : > { %v1266_v41 = vand.u32 2147483647, %v2156_v37  ;;  %v2159_v42 = vadd.f32 %v1236_v39, %v1229_v32  ;;  %vm1342_vm11 = vcmp.ge.f32.partialorder %v2156_v37, 0.0 }
 0x4df   : > { %v1246_v45 = vpop.permute.xlu0 %1245 }
 0x4e0   : > { %v1270_v47 = vmul.f32 0.3275911, %v1266_v41  ;;  %v2163_v48 = vmul.f32 0.70710677, %v2159_v42  ;;  %v2165_v49 = vadd.f32 %v1246_v45, %v1231_v43  ;;  %v1318_v4 = vsub.f32 0.0, %v1266_v41 }
 0x4e2   : > { %v1274_v50 = vadd.f32 1.0, %v1270_v47  ;;  %v1265_v51 = vand.u32 2147483647, %v2163_v48  ;;  %v1227_v52 = vpop.permute.xlu1 %1226  ;;  %v2169_v53 = vmul.f32 0.70710677, %v2165_v49  ;;  %v1322_v11 = vmul.f32 %v1318_v4, %v1266_v41 }
 0x4e3   : > { %v1232_v61 = vmul.f32 %v1956_v29, %v1227_v52  ;;  %vm1341_vm12 = vcmp.ge.f32.partialorder %v2163_v48, 0.0 }
 0x4e4   : > { %1835 = vrcp.f32 %v1274_v50  ;;  %v1269_v55 = vmul.f32 0.3275911, %v1265_v51  ;;  %v1267_v57 = vand.u32 2147483647, %v2169_v53  ;;  %v728_v58 = vpop.permute.xlu0 %727  ;;  %v1317_v9 = vsub.f32 0.0, %v1265_v51 }
 0x4e5   : > { %v1327_v20 = vmul.f32 1.442695, %v1322_v11  ;;  %v739_v25 = vmul.f32 %v728_v58, %v1960_v30  ;;  %vm1343_vm13 = vcmp.ge.f32.partialorder %v2169_v53, 0.0 }
 0x4e6   : > { %v1273_v59 = vadd.f32 1.0, %v1269_v55  ;;  %v1271_v63 = vmul.f32 0.3275911, %v1267_v57  ;;  %v1319_v14 = vsub.f32 0.0, %v1267_v57  ;;  %v1321_v16 = vmul.f32 %v1317_v9, %v1265_v51 }
 0x4e7   : > { %v1251_v0 = vpop.permute.xlu1 %1250  ;;  %v1258_v9 = vmul.f32 0.5, %v2152_v26 }
 0x4e8   : > { %1837 = vrcp.f32 %v1273_v59  ;;  %v2173_v2 = vadd.f32 %v1251_v0, %v1232_v61  ;;  %v1275_v3 = vadd.f32 1.0, %v1271_v63  ;;  %v732_v6 = vpop.permute.xlu0 %731  ;;  %v1323_v62 = vmul.f32 %v1319_v14, %v1267_v57 }
 0x4e9   : > { %v740_v38 = vmul.f32 %v1950_v27, %v732_v6  ;;  %v1325_v24 = vmul.f32 1.442695, %v1321_v16 }
 0x4ea   : > { %v2176_v5 = vmul.f32 0.70710677, %v2173_v2  ;;  %1839 = vrcp.f32 %v1275_v3  ;;  %v1329_v51 = vmul.f32 1.442695, %v1323_v62 }
 0x4ec   : > { %v1268_v7 = vand.u32 2147483647, %v2176_v5  ;;  %v724_v8 = vpop.permute.xlu1 %723  ;;  %vm1344_vm14 = vcmp.ge.f32.partialorder %v2176_v5, 0.0 }
 0x4ed   : > { %v738_v17 = vmul.f32 %v724_v8, %v1954_v28 }
 0x4ee   : > { %v2179_v10 = vpop.eup %1835  ;;  %v1272_v12 = vmul.f32 0.3275911, %v1268_v7  ;;  %v1320_v39 = vsub.f32 0.0, %v1268_v7 }
 0x4ef   : > { %v1282_v40 = vmul.f32 1.0614054, %v2179_v10  ;;  %v755_v13 = vpop.permute.xlu0 %754 }
 0x4f0   : > { %v1276_v46 = vadd.f32 1.0, %v1272_v12  ;;  %v2183_v15 = vadd.f32 %v755_v13, %v740_v38  ;;  %v1324_v61 = vmul.f32 %v1320_v39, %v1268_v7 }
 0x4f1   : > { %v1286_v44 = vadd.f32 -1.4531521, %v1282_v40  ;;  %v745_v18 = vpop.permute.xlu1 %744 }
 0x4f2   : > { %v2186_v19 = vpop.eup %1837  ;;  %1841 = vrcp.f32 %v1276_v46  ;;  %v2189_v21 = vmul.f32 0.70710677, %v2183_v15  ;;  %v2193_v56 = vadd.f32 %v745_v18, %v738_v17  ;;  %v1331_v14 = vmul.f32 1.442695, %v1324_v61 }
 0x4f3   : > { %v1290_v27 = vmul.f32 %v2179_v10, %v1286_v44  ;;  %v1281_v22 = vmul.f32 1.0614054, %v2186_v19  ;;  %1843 = vpow2.f32 %v1327_v20  ;;  %v1259_v61 = vmul.f32 0.5, %v2165_v49 }
 0x4f4   : > { %v776_v54 = vand.u32 2147483647, %v2189_v21  ;;  %v2196_v60 = vpop.eup %1839  ;;  %v2203_v47 = vmul.f32 0.70710677, %v2193_v56  ;;  %1845 = vpow2.f32 %v1325_v24  ;;  %v1257_v24 = vmul.f32 0.5, %v2159_v42 }
 0x4f5   : > { %v1294_v28 = vadd.f32 1.4214138, %v1290_v27  ;;  %v1285_v1 = vadd.f32 -1.4531521, %v1281_v22  ;;  %v750_v31 = vpop.permute.xlu1 %749  ;;  %v1283_v32 = vmul.f32 1.0614054, %v2196_v60 }
 0x4f6   : > { %v780_v41 = vmul.f32 0.3275911, %v776_v54  ;;  %v2205_v55 = vadd.f32 %v750_v31, %v739_v25  ;;  %v2208_v58 = vand.u32 2147483647, %v2203_v47  ;;  %v828_v4 = vsub.f32 0.0, %v776_v54 }
 0x4f7   : > { %v1298_v43 = vmul.f32 %v2179_v10, %v1294_v28  ;;  %v1289_v45 = vmul.f32 %v2186_v19, %v1285_v1  ;;  %v1287_v50 = vadd.f32 -1.4531521, %v1283_v32  ;;  %vm852_vm15 = vcmp.ge.f32.partialorder %v2189_v21, 0.0 }
 0x4f8   : > { %v784_v52 = vadd.f32 1.0, %v780_v41  ;;  %v778_v6 = vmul.f32 0.3275911, %v2208_v58  ;;  %v2218_v38 = vmul.f32 0.70710677, %v2205_v55  ;;  %v832_v18 = vmul.f32 %v828_v4, %v776_v54 }
 0x4f9   : > { %v1302_v57 = vadd.f32 -0.28449672, %v1298_v43  ;;  %v1293_v30 = vadd.f32 1.4214138, %v1289_v45  ;;  %v1291_v59 = vmul.f32 %v2196_v60, %v1287_v50  ;;  %vm850_vm0 = vcmp.ge.f32.partialorder %v2203_v47, 0.0 }
 0x4fa   : > { %1847 = vrcp.f32 %v784_v52  ;;  %v736_v63 = vpop.permute.xlu1 %735  ;;  %v782_v46 = vadd.f32 1.0, %v778_v6  ;;  %v2224_v44 = vand.u32 2147483647, %v2218_v38  ;;  %v838_v42 = vmul.f32 1.442695, %v832_v18 }
 0x4fb   : > { %v1306_v0 = vmul.f32 %v2179_v10, %v1302_v57  ;;  %v1297_v3 = vmul.f32 %v2186_v19, %v1293_v30  ;;  %v1295_v11 = vadd.f32 1.4214138, %v1291_v59  ;;  %1849 = vpow2.f32 %v1329_v51 }
 0x4fc   : > { %v2214_v8 = vpop.eup %1841  ;;  %1851 = vrcp.f32 %v782_v46  ;;  %v779_v62 = vmul.f32 0.3275911, %v2224_v44  ;;  %v741_v28 = vmul.f32 %v1956_v29, %v736_v63  ;;  %v826_v51 = vsub.f32 0.0, %v2208_v58 }
 0x4fd   : > { %v1310_v12 = vadd.f32 0.2548296, %v1306_v0  ;;  %v1301_v40 = vadd.f32 -0.28449672, %v1297_v3  ;;  %v1284_v7 = vmul.f32 1.0614054, %v2214_v8  ;;  %v1299_v13 = vmul.f32 %v2196_v60, %v1295_v11  ;;  %v1844_v27 = vpop.eup %1843 }
 0x4fe   : > { %v783_v32 = vadd.f32 1.0, %v779_v62  ;;  %v1846_v39 = vpop.eup %1845  ;;  %1853 = vpow2.f32 %v1331_v14  ;;  %vm851_vm1 = vcmp.ge.f32.partialorder %v2218_v38, 0.0 }
 0x4ff   : > { %v1314_v26 = vmul.f32 %v2179_v10, %v1310_v12  ;;  %v1305_v16 = vmul.f32 %v2186_v19, %v1301_v40  ;;  %v1288_v17 = vadd.f32 -1.4531521, %v1284_v7  ;;  %v760_v20 = vpop.permute.xlu1 %759  ;;  %v1303_v22 = vadd.f32 -0.28449672, %v1299_v13 }
 0x500   : > { %v2234_v54 = vadd.f32 %v760_v20, %v741_v28  ;;  %1855 = vrcp.f32 %v783_v32  ;;  %v830_v7 = vmul.f32 %v826_v51, %v2208_v58 }
 0x501   : > { %v1334_v1 = vmul.f32 %v1844_v27, %v1314_v26  ;;  %v1309_v25 = vadd.f32 0.2548296, %v1305_v16  ;;  %v1292_v31 = vmul.f32 %v2214_v8, %v1288_v17  ;;  %v1307_v10 = vmul.f32 %v2196_v60, %v1303_v22 }
 0x502   : > { %1857 = vpow2.f32 %v838_v42  ;;  %v827_v16 = vsub.f32 0.0, %v2224_v44  ;;  %v834_v28 = vmul.f32 1.442695, %v830_v7 }
 0x503   : > { %v1338_v41 = vsub.f32 1.0, %v1334_v1  ;;  %v1313_v43 = vmul.f32 %v2186_v19, %v1309_v25  ;;  %v1296_v45 = vadd.f32 1.4214138, %v1292_v31  ;;  %v1311_v50 = vadd.f32 0.2548296, %v1307_v10 }
 0x504   : > { %v2237_v29 = vpop.eup %1847  ;;  %v2246_v19 = vmul.f32 0.70710677, %v2234_v54 }
 0x505   : > { %v1346_v52 = vsub.f32 0.0, %v1338_v41  ;;  %v1333_v57 = vmul.f32 %v1846_v39, %v1313_v43  ;;  %v1300_v30 = vmul.f32 %v2214_v8, %v1296_v45  ;;  %v792_v59 = vmul.f32 1.0614054, %v2237_v29  ;;  %v1850_v0 = vpop.eup %1849 }
 0x506   : > { %v1315_v63 = vmul.f32 %v2196_v60, %v1311_v50  ;;  %v2252_v49 = vand.u32 2147483647, %v2246_v19  ;;  %v2256_v46 = vpop.eup %1851  ;;  %v831_v43 = vmul.f32 %v827_v16, %v2224_v44  ;;  %vm853_vm2 = vcmp.ge.f32.partialorder %v2246_v19, 0.0 }
 0x507   : > { %v1350_v3 = vsel %vm1342_vm11, %v1338_v41, %v1346_v52  ;;  %v1337_v4 = vsub.f32 1.0, %v1333_v57  ;;  %v1304_v6 = vadd.f32 -0.28449672, %v1300_v30  ;;  %v796_v11 = vadd.f32 -1.4531521, %v792_v59 }
 0x508   : > { %v1354_v12 = vadd.f32 1.0, %v1350_v3  ;;  %v1335_v40 = vmul.f32 %v1850_v0, %v1315_v63  ;;  %v781_v17 = vmul.f32 0.3275911, %v2252_v49  ;;  %v790_v27 = vmul.f32 1.0614054, %v2256_v46  ;;  %v1854_v25 = vpop.eup %1853 }
 0x509   : > { %v1345_v60 = vsub.f32 0.0, %v1337_v4  ;;  %v1308_v13 = vmul.f32 %v2214_v8, %v1304_v6  ;;  %v800_v14 = vmul.f32 %v2237_v29, %v796_v11  ;;  %v836_v44 = vmul.f32 1.442695, %v831_v43 }
 0x50a   : > { %v1358_v37 = vmul.f32 %v1354_v12, %v1258_v9  ;;  %v1339_v26 = vsub.f32 1.0, %v1335_v40  ;;  %v785_v1 = vadd.f32 1.0, %v781_v17  ;;  %v794_v10 = vadd.f32 -1.4531521, %v790_v27  ;;  %v2266_v39 = vpop.eup %1855 }
 0x50b   : > { %v1349_v58 = vsel %vm1341_vm12, %v1337_v4, %v1345_v60  ;;  %v1312_v18 = vadd.f32 0.2548296, %v1308_v13  ;;  %v804_v20 = vadd.f32 1.4214138, %v800_v14  ;;  %v829_v11 = vsub.f32 0.0, %v2252_v49 }
 0x50c   : > { %v1353_v22 = vadd.f32 1.0, %v1349_v58  ;;  %v1347_v62 = vsub.f32 0.0, %v1339_v26  ;;  %v1362_v32 = vadd.f32 %v1358_v37, %v2040_v36  ;;  %1859 = vrcp.f32 %v785_v1  ;;  %v1858_v63 = vpop.eup %1857 }
 0x50d   : > { %v1316_v31 = vmul.f32 %v2214_v8, %v1312_v18  ;;  %v808_v9 = vmul.f32 %v2237_v29, %v804_v20  ;;  %v798_v51 = vmul.f32 %v2256_v46, %v794_v10  ;;  %v791_v8 = vmul.f32 1.0614054, %v2266_v39 }
 0x50e   : > { %v1357_v48 = vmul.f32 %v1353_v22, %v1257_v24  ;;  %v1351_v41 = vsel %vm1343_vm13, %v1339_v26, %v1347_v62  ;;  %1371 = vrot.lane.b32.xlu0 %v1362_v32, %s1882_s17  ;;  %1861 = vpow2.f32 %v834_v28  ;;  %v1260_v60 = vmul.f32 0.5, %v2173_v2 }
 0x50f   : > { %v1355_v45 = vadd.f32 1.0, %v1351_v41  ;;  %v1336_v50 = vmul.f32 %v1854_v25, %v1316_v31  ;;  %v812_v42 = vadd.f32 -0.28449672, %v808_v9  ;;  %v802_v53 = vadd.f32 1.4214138, %v798_v51 }
 0x510   : > { %v1361_v52 = vadd.f32 %v1357_v48, %v2036_v34  ;;  %v795_v59 = vadd.f32 -1.4531521, %v791_v8  ;;  %1863 = vpow2.f32 %v836_v44  ;;  %v833_v58 = vmul.f32 %v829_v11, %v2252_v49 }
 0x511   : > { %v1359_v57 = vmul.f32 %v1355_v45, %v1259_v61  ;;  %v1340_v30 = vsub.f32 1.0, %v1336_v50  ;;  %v816_v24 = vmul.f32 %v2237_v29, %v812_v42  ;;  %v806_v4 = vmul.f32 %v2256_v46, %v802_v53 }
 0x512   : > { %1369 = vrot.lane.b32.xlu1 %v1361_v52, %s1882_s17  ;;  %v799_v61 = vmul.f32 %v2266_v39, %v795_v59  ;;  %v840_v31 = vmul.f32 1.442695, %v833_v58  ;;  %v768_v32 = vmul.f32 0.5, %v2183_v15 }
 0x513   : > { %v1348_v0 = vsub.f32 0.0, %v1340_v30  ;;  %v820_v3 = vadd.f32 0.2548296, %v816_v24  ;;  %v1363_v6 = vadd.f32 %v2034_v33, %v1359_v57  ;;  %v810_v7 = vadd.f32 -0.28449672, %v806_v4 }
 0x514   : > { %v803_v14 = vadd.f32 1.4214138, %v799_v61  ;;  %1865 = vpow2.f32 %v840_v31 }
 0x515   : > { %v1352_v12 = vsel %vm1344_vm14, %v1340_v30, %v1348_v0  ;;  %v824_v40 = vmul.f32 %v2237_v29, %v820_v3  ;;  %v814_v26 = vmul.f32 %v2256_v46, %v810_v7  ;;  %v767_v0 = vmul.f32 0.5, %v2205_v55 }
 0x516   : > { %v1356_v13 = vadd.f32 1.0, %v1352_v12  ;;  %1373 = vrot.lane.b32.xlu1 %v1363_v6, %s1882_s17  ;;  %v1860_v16 = vpop.eup %1859  ;;  %v807_v17 = vmul.f32 %v2266_v39, %v803_v14 }
 0x517   : > { %v844_v37 = vmul.f32 %v1858_v63, %v824_v40  ;;  %v818_v29 = vadd.f32 0.2548296, %v814_v26  ;;  %v793_v20 = vmul.f32 1.0614054, %v1860_v16  ;;  %v769_v40 = vmul.f32 0.5, %v2234_v54 }
 0x518   : > { %v1360_v5 = vmul.f32 %v1356_v13, %v1260_v60  ;;  %v811_v27 = vadd.f32 -0.28449672, %v807_v17  ;;  %v1862_v1 = vpop.eup %1861 }
 0x519   : > { %v848_v18 = vsub.f32 1.0, %v844_v37  ;;  %v822_v62 = vmul.f32 %v2256_v46, %v818_v29  ;;  %v797_v28 = vadd.f32 -1.4531521, %v793_v20 }
 0x51a   : > { %v1364_v2 = vadd.f32 %v2038_v35, %v1360_v5  ;;  %v815_v25 = vmul.f32 %v2266_v39, %v811_v27  ;;  %v1864_v21 = vpop.eup %1863 }
 0x51b   : > { %v856_v22 = vsub.f32 0.0, %v848_v18  ;;  %v842_v9 = vmul.f32 %v1862_v1, %v822_v62  ;;  %v801_v10 = vmul.f32 %v1860_v16, %v797_v28 }
 0x51c   : > { %1375 = vrot.lane.b32.xlu0 %v1364_v2, %s1882_s17  ;;  %v819_v41 = vadd.f32 0.2548296, %v815_v25  ;;  %s2301_s17 = scalar_lea.vmem %s2368_s6, %s1664_s11 }
 0x51d   : > { %v860_v49 = vsel %vm852_vm15, %v848_v18, %v856_v22  ;;  %v846_v43 = vsub.f32 1.0, %v842_v9  ;;  %v805_v46 = vadd.f32 1.4214138, %v801_v10 }
 0x51e   : > { %v864_v48 = vadd.f32 1.0, %v860_v49  ;;  %v823_v50 = vmul.f32 %v2266_v39, %v819_v41  ;;  %v766_v39 = vmul.f32 0.5, %v2193_v56  ;;  %v1866_v6 = vpop.eup %1865 }
 0x51f   : > { %v854_v42 = vsub.f32 0.0, %v846_v43  ;;  %v809_v51 = vmul.f32 %v1860_v16, %v805_v46 }
 0x520   : > { %v868_v45 = vmul.f32 %v864_v48, %v768_v32  ;;  %v843_v8 = vmul.f32 %v1864_v21, %v823_v50 }
 0x521   : > { %v858_v52 = vsel %vm850_vm0, %v846_v43, %v854_v42  ;;  %v813_v57 = vadd.f32 -0.28449672, %v809_v51 }
 0x522   : > { %v872_v15 = vadd.f32 %v2034_v33, %v868_v45  ;;  %v862_v30 = vadd.f32 1.0, %v858_v52  ;;  %v847_v24 = vsub.f32 1.0, %v843_v8 }
 0x523   : > { %v817_v53 = vmul.f32 %v1860_v16, %v813_v57 }
 0x524   : > { %876 = vst.msk [vmem:[%s2301_s17 + $0x10] sm:$0xff] %vm419_vm3, %v872_v15  ;;  %v866_v59 = vmul.f32 %v862_v30, %v766_v39  ;;  %v855_v44 = vsub.f32 0.0, %v847_v24 }
 0x525   : > { %v821_v63 = vadd.f32 0.2548296, %v817_v53 }
 0x526   : > { %v870_v33 = vadd.f32 %v866_v59, %v2036_v34  ;;  %v859_v47 = vsel %vm851_vm1, %v847_v24, %v855_v44 }
 0x527   : > { %v863_v3 = vadd.f32 1.0, %v859_v47  ;;  %v825_v4 = vmul.f32 %v1860_v16, %v821_v63 }
 0x528   : > { %874 = vst.msk [vmem:[%s2301_s17] sm:$0xff] %vm419_vm3, %v870_v33 }
 0x529   : > { %v867_v56 = vmul.f32 %v863_v3, %v767_v0  ;;  %v845_v61 = vmul.f32 %v1866_v6, %v825_v4 }
 0x52b   : > { %v871_v11 = vadd.f32 %v867_v56, %v2040_v36  ;;  %v849_v38 = vsub.f32 1.0, %v845_v61  ;;  %v880_v14 = vld [vmem:[%s2301_s17 + $0x10] sm:$0xff] }
 0x52d   : > { %875 = vst.msk [vmem:[%s2301_s17 + $0x8] sm:$0xff] %vm419_vm3, %v871_v11  ;;  %v857_v34 = vsub.f32 0.0, %v849_v38 }
 0x52f   : > { %v861_v55 = vsel %vm853_vm2, %v849_v38, %v857_v34  ;;  %v878_v12 = vld [vmem:[%s2301_s17] sm:$0xff] }
 0x530   : > { %v865_v7 = vadd.f32 1.0, %v861_v55  ;;  %1727 = vmatprep.mubr.msk.f32.mxu1 %vm419_vm3, %v878_v12 }
 0x532   : > { %v869_v60 = vmul.f32 %v865_v7, %v769_v40 }
 0x534   : > { %v873_v36 = vadd.f32 %v2038_v35, %v869_v60  ;;  %v879_v13 = vld [vmem:[%s2301_s17 + $0x8] sm:$0xff] }
 0x535   : > { %1728 = vmatmul.mubr.msk.f32.vlgmr.msra.gmra.mrb[4].mxu1 %vm419_vm3, %v879_v13 }
 0x536   : > { %877 = vst.msk [vmem:[%s2301_s17 + $0x18] sm:$0xff] %vm419_vm3, %v873_v36  ;;  %1730 = vmatprep.mubr.msk.f32.mxu1 %vm419_vm3, %v880_v14  ;;  %1780 = vmatpush3.bf16.msra.mxu1 %v2146_v23 }
 0x53d   : > { %v881_v54 = vld [vmem:[%s2301_s17 + $0x18] sm:$0xff] }
 0x53e   : > { %1731 = vmatmul.mubr.msk.f32.gmra.mrb[6].mxu1 %vm419_vm3, %v881_v54 }
 0x580   : > { %v1372_v19 = vpop.permute.xlu0 %1371 }
 0x581   : > { %1647 = vst.msk [vmem:[%s2301_s17 + $0x28] sm:$0xff] %vm419_vm3, %v1372_v19 }
 0x584   : > { %v1370_v35 = vpop.permute.xlu1 %1369 }
 0x585   : > { %1646 = vst.msk [vmem:[%s2301_s17 + $0x20] sm:$0xff] %vm419_vm3, %v1370_v35 }
 0x588   : > { %v1374_v37 = vpop.permute.xlu1 %1373  ;;  %v1651_v16 = vld [vmem:[%s2301_s17 + $0x28] sm:$0xff] }
 0x589   : > { %1648 = vst.msk [vmem:[%s2301_s17 + $0x30] sm:$0xff] %vm419_vm3, %v1374_v37 }
 0x58c   : > { %v1650_v26 = vld [vmem:[%s2301_s17 + $0x20] sm:$0xff] }
 0x58d   : > { %1751 = vmatprep.mubr.msk.f32.mxu1 %vm419_vm3, %v1650_v26 }
 0x58e   : > { %v1376_v5 = vpop.permute.xlu0 %1375  ;;  %1752 = vmatmul.mubr.msk.f32.vlgmr.msra.gmra.mrb[8].mxu1 %vm419_vm3, %v1651_v16 }
 0x58f   : > { %1649 = vst.msk [vmem:[%s2301_s17 + $0x38] sm:$0xff] %vm419_vm3, %v1376_v5 }
 0x590   : > { %v1652_v23 = vld [vmem:[%s2301_s17 + $0x30] sm:$0xff] }
 0x591   : > { %1754 = vmatprep.mubr.msk.f32.mxu1 %vm419_vm3, %v1652_v23 }
 0x596   : > { %v1653_v17 = vld [vmem:[%s2301_s17 + $0x38] sm:$0xff] }
 0x597   : > { %1755 = vmatmul.mubr.msk.f32.gmra.mrb[10].mxu1 %vm419_vm3, %v1653_v17  ;;  %vm999_vm3 = vcmask 64512  }
 0x608   : > { %v1729_v58 = vpop.f32.mrb[4].mxu1 }
 0x609   : > { %985 = vrot.lane.b32.xlu0 %v1729_v58, %s1886_s14  ;;  %v960_v18 = vpop.f32.mrb[5].mxu1 }
 0x60a   : > { %983 = vrot.lane.b32.xlu1 %v960_v18, %s1886_s14 }
 0x611   : > { %v1732_v29 = vpop.f32.mrb[6].mxu1 }
 0x612   : > { %989 = vrot.lane.b32.xlu0 %v1732_v29, %s1886_s14  ;;  %v970_v20 = vpop.f32.mrb[7].mxu1 }
 0x613   : > { %987 = vrot.lane.b32.xlu1 %v970_v20, %s1886_s14 }
 0x661   : > { %v1753_v27 = vpop.f32.mrb[8].mxu1 }
 0x662   : > { %1493 = vrot.lane.b32.xlu0 %v1753_v27, %s1886_s14  ;;  %v1468_v2 = vpop.f32.mrb[9].mxu1 }
 0x663   : > { %1491 = vrot.lane.b32.xlu1 %v1468_v2, %s1886_s14 }
 0x66a   : > { %v1756_v22 = vpop.f32.mrb[10].mxu1 }
 0x66b   : > { %1497 = vrot.lane.b32.xlu0 %v1756_v22, %s1886_s14  ;;  %v1478_v62 = vpop.f32.mrb[11].mxu1 }
 0x66c   : > { %1495 = vrot.lane.b32.xlu1 %v1478_v62, %s1886_s14 }
 0x67b   : > { %v986_v28 = vpop.permute.xlu0 %985 }
 0x67c   : > { %v996_v1 = vmax.f32 %v1729_v58, %v986_v28  ;;  %v984_v25 = vpop.permute.xlu1 %983 }
 0x67d   : > { %v995_v31 = vmax.f32 %v960_v18, %v984_v25 }
 0x67e   : > { %1001 = vst.msk [vmem:[%s298_s18 + $0x8] sm:$0xff] %vm999_vm3, %v996_v1 }
 0x67f   : > { %1000 = vst.msk [vmem:[%s298_s18] sm:$0xff] %vm999_vm3, %v995_v31 }
 0x684   : > { %v990_v49 = vpop.permute.xlu0 %989 }
 0x685   : > { %v998_v9 = vmax.f32 %v1732_v29, %v990_v49  ;;  %v988_v10 = vpop.permute.xlu1 %987 }
 0x686   : > { %v997_v32 = vmax.f32 %v970_v20, %v988_v10 }
 0x687   : > { %1003 = vst.msk [vmem:[%s298_s18 + $0x18] sm:$0xff] %vm999_vm3, %v998_v9 }
 0x688   : > { %1002 = vst.msk [vmem:[%s298_s18 + $0x10] sm:$0xff] %vm999_vm3, %v997_v32 }
 0x6d4   : > { %v1494_v48 = vpop.permute.xlu0 %1493 }
 0x6d5   : > { %v1504_v41 = vmax.f32 %v1753_v27, %v1494_v48  ;;  %v1492_v43 = vpop.permute.xlu1 %1491 }
 0x6d6   : > { %v1503_v46 = vmax.f32 %v1468_v2, %v1492_v43 }
 0x6d7   : > { %1659 = vst.msk [vmem:[%s298_s18 + $0x28] sm:$0xff] %vm999_vm3, %v1504_v41 }
 0x6d8   : > { %1658 = vst.msk [vmem:[%s298_s18 + $0x20] sm:$0xff] %vm999_vm3, %v1503_v46 }
 0x6dd   : > { %v1498_v45 = vpop.permute.xlu0 %1497 }
 0x6de   : > { %v1506_v50 = vmax.f32 %v1756_v22, %v1498_v45  ;;  %v1496_v21 = vpop.permute.xlu1 %1495 }
 0x6df   : > { %v1505_v42 = vmax.f32 %v1478_v62, %v1496_v21 }
 0x6e0   : > { %1661 = vst.msk [vmem:[%s298_s18 + $0x38] sm:$0xff] %vm999_vm3, %v1506_v50 }
 0x6e1   : > { %1660 = vst.msk [vmem:[%s298_s18 + $0x30] sm:$0xff] %vm999_vm3, %v1505_v42 }
 0x6e2 PF: > { %s18_s24 = sadd.s32 1, %s1873_s24  }
 0x6e3   : > { %p15_p4 = scmp.ge.s32.totalorder %s18_s24, 4  }
 0x6e5   :  { %17 = sbr.rel (!%p15_p4) target bundleno = 1 (0x1), region = 89 }

// kernel: tpu_custom_call.1
= control target key start
LH: loop header
LB: loop body
LE: loop exit
PB: predicated region body
PF: predicated region fallthrough
CT: control target
= control target key end

     0   :  { %s1927_s24 = smov 0   ;;  %s2362_s0 = inlined_call_operand.vmem [shape: bf16[4,4,18], index: 0, kind: input, shape index: {}]   ;;  %s2363_s1 = inlined_call_operand.vmem [shape: bf16[64,16], index: 1, kind: input, shape index: {}]   ;;  %s2364_s2 = inlined_call_operand.vmem [shape: f32[32,1], index: 2, kind: input, shape index: {}]   ;;  %s2365_s3 = inlined_call_operand.vmem [shape: f32[32,1], index: 3, kind: input, shape index: {}]   ;;  %s2366_s4 = inlined_call_operand.vmem [shape: f32[32,32], index: 4, kind: input, shape index: {}]   ;;  %s2367_s5 = inlined_call_operand.vmem [shape: f32[16,16], index: 5, kind: input, shape index: {}]   ;;  %s2368_s6 = inlined_call_operand.vmem [shape: f32[4,32,16], index: 6, kind: output, shape index: {0}]   ;;  %s2369_s7 = inlined_call_operand.vmem [shape: f32[4,32,8], index: 7, kind: output, shape index: {1}]  }
   0x1 LB: > { %s1606_s25 = sadd.s32 4294967295, %s1873_s24   ;;  %p1610_p0 = scmp.ge.s32.totalorder %s1873_s24, 1  ;;  %s1873_s24 = sphi %s1927_s24, %s18_s24  }
   0x2   : > { %p241_p1 = scmp.lt.s32.totalorder %s1873_s24, 3 }
   0x4   : > { %p242_p2 = pnand %p1610_p0, %p241_p1 }
   0x5   : > { %s1611_s26 = sshll.u32 (!%p242_p2), %s1606_s25, 1  ;;  %v301_v0 = vlaneseq (!%p242_p2)  ;;  %v1875_v1 = vmov (!%p242_p2), 1983009808   ;;  %v1876_v5 = vmov (!%p242_p2), 0.0   ;;  %vm310_vm1 = vcmask (!%p242_p2), 261126   ;;  %s1877_s8 = smov (!%p242_p2), 16  }
   0x6   : > { %245 = sbr.rel (%p242_p2) target bundleno = 1762 (0x6e2), region = 44  ;;  %p281_p3 = scmp.lt.s32.totalorder (!%p242_p2), %s1611_s26, 3  ;;  %v319_v2 = vunpack.c.l.s4 (!%p242_p2), %v1875_v1  ;;  %vm313_vm2 = vcmask (!%p242_p2), 123904   ;;  %v1815_v19 = vld [vmem:[%s2363_s1] sm:$0xff] (!%p242_p2)   ;;  %vm419_vm3 = vcmask (!%p242_p2), 130048   ;;  %vm358_vm4 = vcmask (!%p242_p2), 255104  }
   0x7   : > { %v302_v3 = vshrl.u32 (!%p242_p2), %v301_v0, 7  ;;  %s1878_s9 = smov (!%p242_p2), 126   ;;  %s1879_s10 = smov (!%p242_p2), 127   ;;  %1701 = vmatprep.mubr.msk.bf16.mxu0 (!%p242_p2), %vm419_vm3, %v1815_v19  ;;  %vm343_vm5 = vcmask (!%p242_p2), 128004   ;;  %vm328_vm6 = vcmask (!%p242_p2), 125954   ;;  %vm373_vm7 = vcmask (!%p242_p2), 257154  }
   0x8   : > { %v320_v4 = vunpack.c.0.s8 (!%p242_p2), %v319_v2  ;;  %s1880_s11 = smov (!%p242_p2), 15   ;;  %s1881_s14 = smov (!%p242_p2), 14   ;;  %vm388_vm8 = vcmask (!%p242_p2), 259204   ;;  %v1816_v26 = vld [vmem:[%s2363_s1 + $0x8] sm:$0xff] (!%p242_p2)   ;;  %v1817_v55 = vld [vmem:[%s2363_s1 + $0x10] sm:$0xff] (!%p242_p2)   ;;  %v1818_v56 = vld [vmem:[%s2363_s1 + $0x18] sm:$0xff] (!%p242_p2)  }
   0x9   : > { %vm303_vm0 = vcmp.eq.s32.totalorder (!%p242_p2), %v302_v3, 0  ;;  %s1882_s17 = smov (!%p242_p2), 112   ;;  %v497_v61 = vld [vmem:[%s2366_s4] sm:$0xff] (!%p242_p2)  ;;  %vm544_vm9 = vcmask (!%p242_p2), 261120   ;;  %vm539_vm10 = vcmask (!%p242_p2), 7168  }
   0xa   : > { %v1619_v6 = vsel (!%p242_p2), %vm303_vm0, 1.0, %v1876_v5  ;;  %v323_v9 = vsub.s32 (!%p242_p2), %v320_v4, %v302_v3  ;;  %1717 = vmatprep.mubr.msk.f32.mxu1 (!%p242_p2), %vm544_vm9, %v497_v61 }
   0xb   : > { %v306_v7 = vpack.c.bf16 (!%p242_p2), %v1619_v6, %v1619_v6 }
   0xd   : > { %s2371_s26 = smov (!%p281_p3, %s1611_s26), 3  ;;  %v308_v12 = vrot.slane %v306_v7, 2 }
   0xe   : > { %s1612_s27 = sshll.u32 %s2371_s26, 1 }
   0xf   : > { %s284_s30 = scalar_lea.vmem %s2362_s0, %s1612_s27  ;;  %311 = vst.msk [vmem:[#allocation2] sm:$0xc0] %vm310_vm1, %v308_v12 }
  0x10   : > { %v1620_v8 = vld.sshfl [vmem:[%s284_s30] sm:$0x3 pattern:$0x76325410] }
  0x11   : > { %v339_v10 = vcombine.low %v1620_v8, %v1620_v8  ;;  %v1622_v11 = vld.sshfl [vmem:[%s284_s30 + $0x2] sm:$0x3 pattern:$0x76325410]  ;;  %v312_v15 = vld [vmem:[%s284_s30] sm:$0x3] }
  0x12   : > { %355 = vrot.lane.b32.xlu1 %v1622_v11, %s1877_s8  ;;  %v1813_v13 = vld [vmem:[%s284_s30] ss:$0 sps:$4 sm:$0x33]   ;;  %v1814_v14 = vld [vmem:[%s284_s30 + $0x2] ss:$0 sps:$4 sm:$0x33]   ;;  %v384_v18 = vcombine.low %v1622_v11, %v1622_v11 }
  0x13   : > { %340 = vrot.lane.b32.xlu0 %v339_v10, %s1878_s9  ;;  %v324_v16 = vrot.slane %v1813_v13, %v323_v9  ;;  %314 = vst.msk [vmem:[#allocation2] sm:$0x3] %vm313_vm2, %v312_v15  ;;  %v369_v17 = vrot.slane %v1814_v14, %v323_v9  ;;  %v498_v14 = vld [vmem:[%s2366_s4 + $0x8] sm:$0xff]  ;;  %s1883_s9 = smov 1  }
  0x16   : > { %370 = vrot.lane.b32.xlu1 %v369_v17, %s1880_s11  ;;  %s1664_s11 = sshll.u32 %s2371_s26, 5 }
  0x17   : > { %325 = vrot.lane.b32.xlu0 %v324_v16, %s1879_s10  ;;  %v499_v16 = vld [vmem:[%s2366_s4 + $0x10] sm:$0xff]  ;;  %s298_s18 = scalar_lea.vmem %s2369_s7, %s1664_s11 }
  0x1b   : > { %385 = vrot.lane.b32.xlu0 %v384_v18, %s1881_s14  ;;  %s1886_s14 = smov 120  }
  0x84   : > { %v356_v20 = vpop.permute.xlu1 %355 }
  0x85   : > { %v341_v21 = vpop.permute.xlu0 %340  ;;  %359 = vst.msk [vmem:[#allocation2] sm:$0x3] %vm358_vm4, %v356_v20  ;;  %v500_v20 = vld [vmem:[%s2366_s4 + $0x18] sm:$0xff] }
  0x86   : > { %344 = vst.msk [vmem:[#allocation2] sm:$0x30] %vm343_vm5, %v341_v21 }
  0x88   : > { %v371_v23 = vpop.permute.xlu1 %370 }
  0x89   : > { %v326_v22 = vpop.permute.xlu0 %325 }
  0x8a   : > { %329 = vst.msk [vmem:[#allocation2] sm:$0xc] %vm328_vm6, %v326_v22 }
  0x8b   : > { %374 = vst.msk [vmem:[#allocation2] sm:$0xc] %vm373_vm7, %v371_v23 }
  0x8d   : > { %v386_v24 = vpop.permute.xlu0 %385 }
  0x8e   : > { %389 = vst.msk [vmem:[#allocation2] sm:$0x30] %vm388_vm8, %v386_v24 }
  0x95   : > { %v398_v25 = vld [vmem:[#allocation2] sm:$0xff] }
  0x96   : > { %1699 = vmatprep.subr.bf16.mxu0 %v398_v25 }
  0x97   : > { %1700 = vmatpush3.bf16.msra.mxu0 %v398_v25 }
  0x9a   : > { %1702 = vmatmul.mubr.msk.bf16.vlgmr.msra.gmra.mrb[0].mxu0 %vm419_vm3, %v1816_v26 }
  0x9b   : > { %1705 = vmatprep.mubr.msk.bf16.mxu0 %vm419_vm3, %v1817_v55 }
  0xa2   : > { %1706 = vmatmul.mubr.msk.bf16.gmra.mrb[4].mxu0 %vm419_vm3, %v1818_v56 }
  0xa3   : > { %1741 = vmatprep.mubr.msk.f32.mxu0 %vm544_vm9, %v497_v61 }
 0x16d   : > { %v1950_v27 = vpop.f32.mrb[0].mxu0 }
 0x16e   : > { %1012 = vrot.lane.b32.xlu1 %v1950_v27, %s1882_s17  ;;  %v1954_v28 = vpop.f32.mrb[1].mxu0  ;;  %v525_v33 = vmul.f32 %v1950_v27, %v1950_v27  ;;  %v517_v57 = vsel %vm419_vm3, %v1950_v27, 0.0 }
 0x16f   : > { %v1956_v29 = vpop.f32.mrb[2].mxu0  ;;  %v523_v31 = vmul.f32 %v1954_v28, %v1954_v28  ;;  %v511_v51 = vsel %vm419_vm3, %v1954_v28, 0.0 }
 0x170   : > { %1014 = vrot.lane.b32.xlu0 %v1956_v29, %s1882_s17  ;;  %v1960_v30 = vpop.f32.mrb[3].mxu0  ;;  %v526_v34 = vmul.f32 %v1956_v29, %v1956_v29  ;;  %v520_v58 = vsel %vm419_vm3, %v1956_v29, 0.0  ;;  %v533_v59 = vsel %vm419_vm3, %v525_v33, 0.0 }
 0x171   : > { %v524_v32 = vmul.f32 %v1960_v30, %v1960_v30  ;;  %v514_v52 = vsel %vm419_vm3, %v1960_v30, 0.0  ;;  %v527_v53 = vsel %vm419_vm3, %v523_v31, 0.0 }
 0x172   : > { %1008 = vrot.lane.b32.xlu1 %v1954_v28, %s1882_s17  ;;  %v536_v60 = vsel %vm419_vm3, %v526_v34, 0.0 }
 0x173   : > { %v530_v54 = vsel %vm419_vm3, %v524_v32, 0.0 }
 0x174   : > { %1010 = vrot.lane.b32.xlu0 %v1960_v30, %s1882_s17 }
 0x176   : > { %1036 = vrot.lane.b32.xlu1 %v523_v31, %s1882_s17 }
 0x178   : > { %1038 = vrot.lane.b32.xlu0 %v524_v32, %s1882_s17 }
 0x17a   : > { %1040 = vrot.lane.b32.xlu1 %v525_v33, %s1882_s17  ;;  %v2034_v33 = vpop.f32.mrb[4].mxu0 }
 0x17c   : > { %1042 = vrot.lane.b32.xlu0 %v526_v34, %s1882_s17  ;;  %v2036_v34 = vpop.f32.mrb[5].mxu0 }
 0x1e0   : > { %v1013_v35 = vpop.permute.xlu1 %1012 }
 0x1e1   : > { %v1026_v36 = vsel %vm419_vm3, %v1013_v35, 0.0  ;;  %v2038_v35 = vpop.f32.mrb[6].mxu0 }
 0x1e2   : > { %v1015_v37 = vpop.permute.xlu0 %1014  ;;  %1027 = vadd.xlane.f32.xlu0 %v1026_v36  ;;  %v2040_v36 = vpop.f32.mrb[7].mxu0 }
 0x1e3   : > { %v1029_v43 = vsel %vm419_vm3, %v1015_v37, 0.0 }
 0x1e4   : > { %v1009_v38 = vpop.permute.xlu1 %1008 }
 0x1e5   : > { %v1020_v39 = vsel %vm419_vm3, %v1009_v38, 0.0 }
 0x1e6   : > { %1021 = vadd.xlane.f32.xlu1 %v1020_v39  ;;  %v1011_v40 = vpop.permute.xlu0 %1010 }
 0x1e7   : > { %v1023_v41 = vsel %vm419_vm3, %v1011_v40, 0.0 }
 0x1e8   : > { %v1037_v42 = vpop.permute.xlu1 %1036  ;;  %1024 = vadd.xlane.f32.xlu0 %v1023_v41 }
 0x1e9   : > { %v1048_v45 = vsel %vm419_vm3, %v1037_v42, 0.0 }
 0x1ea   : > { %1030 = vadd.xlane.f32.xlu1 %v1029_v43  ;;  %v1039_v44 = vpop.permute.xlu0 %1038 }
 0x1eb   : > { %v1051_v47 = vsel %vm419_vm3, %v1039_v44, 0.0 }
 0x1ec   : > { %v1041_v46 = vpop.permute.xlu1 %1040  ;;  %1049 = vadd.xlane.f32.xlu0 %v1048_v45 }
 0x1ed   : > { %v1054_v49 = vsel %vm419_vm3, %v1041_v46, 0.0 }
 0x1ee   : > { %1052 = vadd.xlane.f32.xlu1 %v1051_v47  ;;  %v1043_v48 = vpop.permute.xlu0 %1042 }
 0x1ef   : > { %v1057_v50 = vsel %vm419_vm3, %v1043_v48, 0.0 }
 0x1f0   : > { %1055 = vadd.xlane.f32.xlu0 %v1054_v49  ;;  %v502_v49 = vld [vmem:[%s2364_s2 + $0x8] sm:$0xff] }
 0x1f2   : > { %1058 = vadd.xlane.f32.xlu1 %v1057_v50  ;;  %v501_v50 = vld [vmem:[%s2364_s2] sm:$0xff] }
 0x1f4   : > { %512 = vadd.xlane.f32.xlu0 %v511_v51  ;;  %v504_v51 = vld [vmem:[%s2364_s2 + $0x18] sm:$0xff] }
 0x1f6   : > { %515 = vadd.xlane.f32.xlu1 %v514_v52  ;;  %v503_v52 = vld [vmem:[%s2364_s2 + $0x10] sm:$0xff] }
 0x1f8   : > { %528 = vadd.xlane.f32.xlu0 %v527_v53 }
 0x1fa   : > { %531 = vadd.xlane.f32.xlu1 %v530_v54 }
 0x1fc   : > { %518 = vadd.xlane.f32.xlu0 %v517_v57 }
 0x1fe   : > { %521 = vadd.xlane.f32.xlu1 %v520_v58 }
 0x200   : > { %534 = vadd.xlane.f32.xlu0 %v533_v59 }
 0x202   : > { %537 = vadd.xlane.f32.xlu1 %v536_v60 }
 0x26f   : > { %v1028_v62 = vpop.xlane.xlu0 %1027 }
 0x273   : > { %v1022_v63 = vpop.xlane.xlu1 %1021 }
 0x275   : > { %v1025_v0 = vpop.xlane.xlu0 %1024 }
 0x277   : > { %v1031_v1 = vpop.xlane.xlu1 %1030 }
 0x279   : > { %v1050_v2 = vpop.xlane.xlu0 %1049 }
 0x27a   : > { %v1060_v4 = vsel %vm539_vm10, %v1022_v63, %v1050_v2 }
 0x27b   : > { %v1053_v3 = vpop.xlane.xlu1 %1052 }
 0x27c   : > { %v1061_v5 = vsel %vm539_vm10, %v1025_v0, %v1053_v3 }
 0x27d   : > { %v1769_v6 = vpack.c.bf16 %v1061_v5, %v1060_v4  ;;  %v1056_v7 = vpop.xlane.xlu0 %1055 }
 0x27e   : > { %v1062_v9 = vsel %vm539_vm10, %v1028_v62, %v1056_v7 }
 0x27f   : > { %v1059_v8 = vpop.xlane.xlu1 %1058  ;;  %1770 = vmatprep.subr.bf16.mxu0 %v1769_v6 }
 0x280   : > { %v1063_v10 = vsel %vm539_vm10, %v1031_v1, %v1059_v8  ;;  %1772 = vmatpush3.bf16.msra.mxu0 %v1769_v6  ;;  %v1884_v1 = vmov 1  }
 0x281   : > { %v1773_v11 = vpack.c.bf16 %v1063_v10, %v1062_v9  ;;  %v513_v12 = vpop.xlane.xlu0 %512  ;;  %1802 = vset.pattern.permute.xlu0 %v1884_v1  ;;  %1801 = vset.pattern.permute.xlu1 %v1884_v1 }
 0x283   : > { %1774 = vmatprep.subr.bf16.mxu0 %v1773_v11  ;;  %v516_v13 = vpop.xlane.xlu1 %515 }
 0x284   : > { %1776 = vmatpush3.bf16.msra.mxu0 %v1773_v11 }
 0x285   : > { %v529_v15 = vpop.xlane.xlu0 %528 }
 0x286   : > { %v540_v18 = vsel %vm539_vm10, %v513_v12, %v529_v15 }
 0x287   : > { %1742 = vmatmul.mubr.msk.f32.vlgmr.msra.gmra.mrb[8].mxu0 %vm544_vm9, %v498_v14  ;;  %v532_v17 = vpop.xlane.xlu1 %531 }
 0x288   : > { %v541_v19 = vsel %vm539_vm10, %v516_v13, %v532_v17  ;;  %1744 = vmatprep.mubr.msk.f32.mxu0 %vm544_vm9, %v499_v16 }
 0x289   : > { %v519_v21 = vpop.xlane.xlu0 %518  ;;  %v1757_v22 = vpack.c.bf16 %v541_v19, %v540_v18 }
 0x28b   : > { %1758 = vmatprep.subr.bf16.mxu1 %v1757_v22  ;;  %1745 = vmatmul.mubr.msk.f32.gmra.mrb[10].mxu0 %vm544_vm9, %v500_v20  ;;  %v522_v23 = vpop.xlane.xlu1 %521 }
 0x28c   : > { %1760 = vmatpush3.bf16.msra.mxu1 %v1757_v22 }
 0x28d   : > { %v535_v24 = vpop.xlane.xlu0 %534 }
 0x28e   : > { %v542_v26 = vsel %vm539_vm10, %v519_v21, %v535_v24 }
 0x28f   : > { %v538_v25 = vpop.xlane.xlu1 %537 }
 0x290   : > { %v543_v31 = vsel %vm539_vm10, %v522_v23, %v538_v25 }
 0x291   : > { %v1761_v32 = vpack.c.bf16 %v543_v31, %v542_v26 }
 0x293   : > { %1762 = vmatprep.subr.bf16.mxu1 %v1761_v32 }
 0x294   : > { %1764 = vmatpush3.bf16.msra.mxu1 %v1761_v32 }
 0x297   : > { %1718 = vmatmul.mubr.msk.f32.vlgmr.msra.gmra.mrb[0].mxu1 %vm544_vm9, %v498_v14 }
 0x298   : > { %1720 = vmatprep.mubr.msk.f32.mxu1 %vm544_vm9, %v499_v16 }
 0x29b   : > { %1721 = vmatmul.mubr.msk.f32.gmra.mrb[2].mxu1 %vm544_vm9, %v500_v20 }
 0x35a   : > { %v1743_v37 = vpop.f32.mrb[8].mxu0 }
 0x35b   : > { %v2042_v38 = vmul.f32 0.015625, %v1743_v37  ;;  %v1130_v39 = vpop.f32.mrb[9].mxu0 }
 0x35c   : > { %v2044_v40 = vmul.f32 0.015625, %v1130_v39 }
 0x35d   : > { %v1154_v41 = vmul.f32 %v2042_v38, %v2042_v38 }
 0x35e   : > { %v1746_v42 = vpop.f32.mrb[10].mxu0  ;;  %v1153_v43 = vmul.f32 %v2044_v40, %v2044_v40 }
 0x35f   : > { %v2050_v44 = vmul.f32 0.015625, %v1746_v42  ;;  %1163 = vrot.lane.b32.xlu1 %v1154_v41, %s1883_s9  ;;  %v1140_v45 = vpop.f32.mrb[11].mxu0 }
 0x360   : > { %v2053_v46 = vmul.f32 0.015625, %v1140_v45  ;;  %1161 = vrot.lane.b32.xlu0 %v1153_v43, %s1883_s9 }
 0x361   : > { %v1156_v47 = vmul.f32 %v2050_v44, %v2050_v44 }
 0x362   : > { %v1155_v48 = vmul.f32 %v2053_v46, %v2053_v46 }
 0x364   : > { %1167 = vrot.lane.b32.xlu0 %v1156_v47, %s1883_s9  ;;  %1165 = vrot.lane.b32.xlu1 %v1155_v48, %s1883_s9 }
 0x368   : > { %684 = vrot.lane.b32.xlu0 %v502_v49, %s1883_s9  ;;  %682 = vrot.lane.b32.xlu1 %v501_v50, %s1883_s9 }
 0x36a   : > { %v1719_v53 = vpop.f32.mrb[0].mxu1 }
 0x36b   : > { %v2076_v54 = vmul.f32 0.015625, %v1719_v53  ;;  %v623_v55 = vpop.f32.mrb[1].mxu1 }
 0x36c   : > { %v2078_v56 = vmul.f32 0.015625, %v623_v55  ;;  %688 = vrot.lane.b32.xlu0 %v504_v51, %s1883_s9  ;;  %686 = vrot.lane.b32.xlu1 %v503_v52, %s1883_s9 }
 0x36d   : > { %v647_v57 = vmul.f32 %v2076_v54, %v2076_v54 }
 0x36e   : > { %v1722_v58 = vpop.f32.mrb[2].mxu1  ;;  %v646_v59 = vmul.f32 %v2078_v56, %v2078_v56 }
 0x36f   : > { %v2086_v60 = vmul.f32 0.015625, %v1722_v58  ;;  %v633_v61 = vpop.f32.mrb[3].mxu1 }
 0x370   : > { %v2088_v62 = vmul.f32 0.015625, %v633_v61  ;;  %656 = vrot.lane.b32.xlu0 %v647_v57, %s1883_s9  ;;  %654 = vrot.lane.b32.xlu1 %v646_v59, %s1883_s9  ;;  %v1885_v61 = vmov 0  }
 0x371   : > { %v649_v63 = vmul.f32 %v2086_v60, %v2086_v60 }
 0x372   : > { %v648_v0 = vmul.f32 %v2088_v62, %v2088_v62 }
 0x374   : > { %660 = vrot.lane.b32.xlu0 %v649_v63, %s1883_s9  ;;  %658 = vrot.lane.b32.xlu1 %v648_v0, %s1883_s9  ;;  %v506_v63 = vld [vmem:[%s2365_s3 + $0x8] sm:$0xff] }
 0x3d1   : > { %v1164_v2 = vpop.permute.xlu1 %1163 }
 0x3d2   : > { %v1174_v3 = vsub.f32 %v2042_v38, %v1164_v2  ;;  %v1162_v4 = vpop.permute.xlu0 %1161 }
 0x3d3   : > { %v1173_v5 = vsub.f32 %v2044_v40, %v1162_v4 }
 0x3d4   : > { %v1178_v6 = vadd.f32 1e-05, %v1174_v3 }
 0x3d5   : > { %v1177_v7 = vadd.f32 1e-05, %v1173_v5 }
 0x3d6   : > { %1819 = vrsqrt.f32 %v1178_v6  ;;  %v1168_v8 = vpop.permute.xlu0 %1167  ;;  %v1166_v9 = vpop.permute.xlu1 %1165  ;;  %v505_v6 = vld [vmem:[%s2365_s3] sm:$0xff] }
 0x3d7   : > { %1821 = vrsqrt.f32 %v1177_v7  ;;  %v1176_v10 = vsub.f32 %v2050_v44, %v1168_v8  ;;  %v1175_v11 = vsub.f32 %v2053_v46, %v1166_v9  ;;  %v507_v7 = vld [vmem:[%s2365_s3 + $0x10] sm:$0xff] }
 0x3d9   : > { %v1180_v12 = vadd.f32 1e-05, %v1176_v10  ;;  %v1179_v13 = vadd.f32 1e-05, %v1175_v11 }
 0x3da   : > { %v685_v14 = vpop.permute.xlu0 %684  ;;  %v683_v15 = vpop.permute.xlu1 %682 }
 0x3db   : > { %1823 = vrsqrt.f32 %v1180_v12 }
 0x3dc   : > { %1825 = vrsqrt.f32 %v1179_v13 }
 0x3de   : > { %v689_v16 = vpop.permute.xlu0 %688  ;;  %v687_v17 = vpop.permute.xlu1 %686 }
 0x3e0   : > { %v1820_v18 = vpop.eup %1819 }
 0x3e1   : > { %v1822_v19 = vpop.eup %1821  ;;  %v1186_v20 = vmul.f32 %v1820_v18, %v685_v14 }
 0x3e2   : > { %v1185_v21 = vmul.f32 %v1822_v19, %v683_v15  ;;  %v657_v22 = vpop.permute.xlu0 %656  ;;  %v655_v23 = vpop.permute.xlu1 %654 }
 0x3e3   : > { %v667_v24 = vsub.f32 %v2076_v54, %v657_v22  ;;  %v666_v25 = vsub.f32 %v2078_v56, %v655_v23  ;;  %1195 = vrot.lane.b32.xlu0 %v1186_v20, %s1879_s10 }
 0x3e4   : > { %1193 = vrot.lane.b32.xlu1 %v1185_v21, %s1879_s10 }
 0x3e5   : > { %v1824_v26 = vpop.eup %1823  ;;  %v671_v31 = vadd.f32 1e-05, %v667_v24  ;;  %v670_v32 = vadd.f32 1e-05, %v666_v25 }
 0x3e6   : > { %v1826_v37 = vpop.eup %1825  ;;  %v1188_v39 = vmul.f32 %v1824_v26, %v689_v16  ;;  %v661_v41 = vpop.permute.xlu0 %660 }
 0x3e7   : > { %v659_v42 = vpop.permute.xlu1 %658  ;;  %v1187_v43 = vmul.f32 %v1826_v37, %v687_v17  ;;  %1827 = vrsqrt.f32 %v671_v31  ;;  %v669_v45 = vsub.f32 %v2086_v60, %v661_v41 }
 0x3e8   : > { %v668_v47 = vsub.f32 %v2088_v62, %v659_v42  ;;  %1829 = vrsqrt.f32 %v670_v32  ;;  %1199 = vrot.lane.b32.xlu0 %v1188_v39, %s1879_s10 }
 0x3e9   : > { %v673_v48 = vadd.f32 1e-05, %v669_v45  ;;  %1197 = vrot.lane.b32.xlu1 %v1187_v43, %s1879_s10 }
 0x3ea   : > { %v672_v49 = vadd.f32 1e-05, %v668_v47 }
 0x3eb   : > { %1831 = vrsqrt.f32 %v673_v48 }
 0x3ec   : > { %1833 = vrsqrt.f32 %v672_v49 }
 0x3f1   : > { %v1828_v50 = vpop.eup %1827 }
 0x3f2   : > { %v1830_v51 = vpop.eup %1829  ;;  %v695_v52 = vmul.f32 %v1828_v50, %v685_v14 }
 0x3f3   : > { %v694_v53 = vmul.f32 %v1830_v51, %v683_v15 }
 0x3f4   : > { %704 = vrot.lane.b32.xlu0 %v695_v52, %s1879_s10 }
 0x3f5   : > { %v1832_v55 = vpop.eup %1831  ;;  %702 = vrot.lane.b32.xlu1 %v694_v53, %s1879_s10 }
 0x3f6   : > { %v1834_v57 = vpop.eup %1833  ;;  %v697_v58 = vmul.f32 %v1832_v55, %v689_v16 }
 0x3f7   : > { %v696_v59 = vmul.f32 %v1834_v57, %v687_v17 }
 0x3f8   : > { %708 = vrot.lane.b32.xlu0 %v697_v58, %s1879_s10 }
 0x3f9   : > { %706 = vrot.lane.b32.xlu1 %v696_v59, %s1879_s10 }
 0x3fc   : > { %1218 = vperm.xlu0 %1802, %v1186_v20  }
 0x3fd   : > { %1214 = vperm.xlu1 %1801, %v1185_v21  }
 0x400   : > { %1222 = vperm.xlu0 %1802, %v1187_v43  }
 0x401   : > { %1803 = vset.pattern.permute.xlu1 %v1885_v61 }
 0x404   : > { %1805 = vset.pattern.permute.xlu0 %v1885_v61 }
 0x455   : > { %v1196_v0 = vpop.permute.xlu0 %1195 }
 0x456   : > { %v1206_v2 = vmul.f32 %v1196_v0, %v2042_v38  ;;  %v1194_v3 = vpop.permute.xlu1 %1193 }
 0x457   : > { %v1205_v5 = vmul.f32 %v1194_v3, %v2044_v40  ;;  %v508_v40 = vld [vmem:[%s2365_s3 + $0x18] sm:$0xff] }
 0x458   : > { %v1210_v4 = vsub.f32 %v506_v63, %v1206_v2 }
 0x459   : > { %v1209_v9 = vsub.f32 %v505_v6, %v1205_v5 }
 0x45a   : > { %1240 = vperm.xlu1 %1803, %v1210_v4   ;;  %v1200_v38 = vpop.permute.xlu0 %1199 }
 0x45b   : > { %v1198_v8 = vpop.permute.xlu1 %1197  ;;  %v1208_v12 = vmul.f32 %v1200_v38, %v2050_v44 }
 0x45c   : > { %v1207_v10 = vmul.f32 %v1198_v8, %v2053_v46 }
 0x45d   : > { %v1212_v13 = vsub.f32 %v508_v40, %v1208_v12 }
 0x45e   : > { %v1211_v11 = vsub.f32 %v507_v7, %v1207_v10  ;;  %1235 = vperm.xlu1 %1803, %v1209_v9  }
 0x460   : > { %1245 = vperm.xlu0 %1805, %v1211_v11  }
 0x462   : > { %1804 = vset.pattern.permute.xlu1 %v1884_v1 }
 0x463   : > { %1226 = vperm.xlu1 %1804, %v1188_v39  }
 0x464   : > { %1808 = vset.pattern.permute.xlu0 %v1884_v1 }
 0x465   : > { %727 = vperm.xlu0 %1808, %v695_v52  }
 0x466   : > { %v705_v16 = vpop.permute.xlu0 %704 }
 0x467   : > { %v703_v14 = vpop.permute.xlu1 %702  ;;  %1806 = vset.pattern.permute.xlu1 %v1885_v61  ;;  %v715_v18 = vmul.f32 %v705_v16, %v2076_v54  ;;  %v510_v54 = vld [vmem:[%s2367_s5 + $0x8] sm:$0xff] }
 0x468   : > { %1250 = vperm.xlu1 %1806, %v1212_v13   ;;  %v714_v15 = vmul.f32 %v703_v14, %v2078_v56 }
 0x469   : > { %731 = vperm.xlu0 %1808, %v696_v59   ;;  %v719_v20 = vsub.f32 %v506_v63, %v715_v18 }
 0x46a   : > { %v718_v19 = vsub.f32 %v505_v6, %v714_v15  ;;  %v709_v21 = vpop.permute.xlu0 %708 }
 0x46b   : > { %v707_v46 = vpop.permute.xlu1 %706  ;;  %v717_v22 = vmul.f32 %v709_v21, %v2086_v60 }
 0x46c   : > { %v716_v44 = vmul.f32 %v707_v46, %v2088_v62  ;;  %1807 = vset.pattern.permute.xlu1 %v1884_v1  ;;  %v509_v62 = vld [vmem:[%s2367_s5] sm:$0xff] }
 0x46d   : > { %723 = vperm.xlu1 %1807, %v694_v53   ;;  %1811 = vset.pattern.permute.xlu0 %v1885_v61  ;;  %v721_v56 = vsub.f32 %v508_v40, %v717_v22  ;;  %v2146_v23 = vpack.c.bf16 %v510_v54, %v509_v62 }
 0x46e   : > { %v720_v17 = vsub.f32 %v507_v7, %v716_v44 }
 0x46f   : > { %1766 = vmatprep.subr.bf16.mxu1 %v2146_v23 }
 0x470   : > { %754 = vperm.xlu0 %1811, %v720_v17   ;;  %1768 = vmatpush3.bf16.msra.mxu1 %v2146_v23 }
 0x471   : > { %1809 = vset.pattern.permute.xlu1 %v1885_v61  ;;  %1778 = vmatprep.subr.bf16.mxu1 %v2146_v23 }
 0x472   : > { %744 = vperm.xlu1 %1809, %v718_v19  }
 0x476   : > { %749 = vperm.xlu1 %1809, %v719_v20  }
 0x47a   : > { %1810 = vset.pattern.permute.xlu1 %v1884_v1 }
 0x47b   : > { %735 = vperm.xlu1 %1810, %v697_v58   ;;  %v1219_v60 = vpop.permute.xlu0 %1218 }
 0x47c   : > { %v1215_v1 = vpop.permute.xlu1 %1214  ;;  %v1230_v24 = vmul.f32 %v1219_v60, %v1960_v30 }
 0x47d   : > { %v1229_v32 = vmul.f32 %v1215_v1, %v1954_v28 }
 0x47f   : > { %1812 = vset.pattern.permute.xlu1 %v1885_v61  ;;  %v1223_v31 = vpop.permute.xlu0 %1222 }
 0x480   : > { %759 = vperm.xlu1 %1812, %v721_v56   ;;  %v1231_v43 = vmul.f32 %v1950_v27, %v1223_v31 }
 0x4d9   : > { %v1241_v25 = vpop.permute.xlu1 %1240 }
 0x4da   : > { %v2152_v26 = vadd.f32 %v1241_v25, %v1230_v24 }
 0x4dc   : > { %v2156_v37 = vmul.f32 0.70710677, %v2152_v26 }
 0x4dd   : > { %v1236_v39 = vpop.permute.xlu1 %1235 }
 0x4de   : > { %v1266_v41 = vand.u32 2147483647, %v2156_v37  ;;  %v2159_v42 = vadd.f32 %v1236_v39, %v1229_v32  ;;  %vm1342_vm11 = vcmp.ge.f32.partialorder %v2156_v37, 0.0 }
 0x4df   : > { %v1246_v45 = vpop.permute.xlu0 %1245 }
 0x4e0   : > { %v1270_v47 = vmul.f32 0.3275911, %v1266_v41  ;;  %v2163_v48 = vmul.f32 0.70710677, %v2159_v42  ;;  %v2165_v49 = vadd.f32 %v1246_v45, %v1231_v43  ;;  %v1318_v4 = vsub.f32 0.0, %v1266_v41 }
 0x4e2   : > { %v1274_v50 = vadd.f32 1.0, %v1270_v47  ;;  %v1265_v51 = vand.u32 2147483647, %v2163_v48  ;;  %v1227_v52 = vpop.permute.xlu1 %1226  ;;  %v2169_v53 = vmul.f32 0.70710677, %v2165_v49  ;;  %v1322_v11 = vmul.f32 %v1318_v4, %v1266_v41 }
 0x4e3   : > { %v1232_v61 = vmul.f32 %v1956_v29, %v1227_v52  ;;  %vm1341_vm12 = vcmp.ge.f32.partialorder %v2163_v48, 0.0 }
 0x4e4   : > { %1835 = vrcp.f32 %v1274_v50  ;;  %v1269_v55 = vmul.f32 0.3275911, %v1265_v51  ;;  %v1267_v57 = vand.u32 2147483647, %v2169_v53  ;;  %v728_v58 = vpop.permute.xlu0 %727  ;;  %v1317_v9 = vsub.f32 0.0, %v1265_v51 }
 0x4e5   : > { %v1327_v20 = vmul.f32 1.442695, %v1322_v11  ;;  %v739_v25 = vmul.f32 %v728_v58, %v1960_v30  ;;  %vm1343_vm13 = vcmp.ge.f32.partialorder %v2169_v53, 0.0 }
 0x4e6   : > { %v1273_v59 = vadd.f32 1.0, %v1269_v55  ;;  %v1271_v63 = vmul.f32 0.3275911, %v1267_v57  ;;  %v1319_v14 = vsub.f32 0.0, %v1267_v57  ;;  %v1321_v16 = vmul.f32 %v1317_v9, %v1265_v51 }
 0x4e7   : > { %v1251_v0 = vpop.permute.xlu1 %1250  ;;  %v1258_v9 = vmul.f32 0.5, %v2152_v26 }
 0x4e8   : > { %1837 = vrcp.f32 %v1273_v59  ;;  %v2173_v2 = vadd.f32 %v1251_v0, %v1232_v61  ;;  %v1275_v3 = vadd.f32 1.0, %v1271_v63  ;;  %v732_v6 = vpop.permute.xlu0 %731  ;;  %v1323_v62 = vmul.f32 %v1319_v14, %v1267_v57 }
 0x4e9   : > { %v740_v38 = vmul.f32 %v1950_v27, %v732_v6  ;;  %v1325_v24 = vmul.f32 1.442695, %v1321_v16 }
 0x4ea   : > { %v2176_v5 = vmul.f32 0.70710677, %v2173_v2  ;;  %1839 = vrcp.f32 %v1275_v3  ;;  %v1329_v51 = vmul.f32 1.442695, %v1323_v62 }
 0x4ec   : > { %v1268_v7 = vand.u32 2147483647, %v2176_v5  ;;  %v724_v8 = vpop.permute.xlu1 %723  ;;  %vm1344_vm14 = vcmp.ge.f32.partialorder %v2176_v5, 0.0 }
 0x4ed   : > { %v738_v17 = vmul.f32 %v724_v8, %v1954_v28 }
 0x4ee   : > { %v2179_v10 = vpop.eup %1835  ;;  %v1272_v12 = vmul.f32 0.3275911, %v1268_v7  ;;  %v1320_v39 = vsub.f32 0.0, %v1268_v7 }
 0x4ef   : > { %v1282_v40 = vmul.f32 1.0614054, %v2179_v10  ;;  %v755_v13 = vpop.permute.xlu0 %754 }
 0x4f0   : > { %v1276_v46 = vadd.f32 1.0, %v1272_v12  ;;  %v2183_v15 = vadd.f32 %v755_v13, %v740_v38  ;;  %v1324_v61 = vmul.f32 %v1320_v39, %v1268_v7 }
 0x4f1   : > { %v1286_v44 = vadd.f32 -1.4531521, %v1282_v40  ;;  %v745_v18 = vpop.permute.xlu1 %744 }
 0x4f2   : > { %v2186_v19 = vpop.eup %1837  ;;  %1841 = vrcp.f32 %v1276_v46  ;;  %v2189_v21 = vmul.f32 0.70710677, %v2183_v15  ;;  %v2193_v56 = vadd.f32 %v745_v18, %v738_v17  ;;  %v1331_v14 = vmul.f32 1.442695, %v1324_v61 }
 0x4f3   : > { %v1290_v27 = vmul.f32 %v2179_v10, %v1286_v44  ;;  %v1281_v22 = vmul.f32 1.0614054, %v2186_v19  ;;  %1843 = vpow2.f32 %v1327_v20  ;;  %v1259_v61 = vmul.f32 0.5, %v2165_v49 }
 0x4f4   : > { %v776_v54 = vand.u32 2147483647, %v2189_v21  ;;  %v2196_v60 = vpop.eup %1839  ;;  %v2203_v47 = vmul.f32 0.70710677, %v2193_v56  ;;  %1845 = vpow2.f32 %v1325_v24  ;;  %v1257_v24 = vmul.f32 0.5, %v2159_v42 }
 0x4f5   : > { %v1294_v28 = vadd.f32 1.4214138, %v1290_v27  ;;  %v1285_v1 = vadd.f32 -1.4531521, %v1281_v22  ;;  %v750_v31 = vpop.permute.xlu1 %749  ;;  %v1283_v32 = vmul.f32 1.0614054, %v2196_v60 }
 0x4f6   : > { %v780_v41 = vmul.f32 0.3275911, %v776_v54  ;;  %v2205_v55 = vadd.f32 %v750_v31, %v739_v25  ;;  %v2208_v58 = vand.u32 2147483647, %v2203_v47  ;;  %v828_v4 = vsub.f32 0.0, %v776_v54 }
 0x4f7   : > { %v1298_v43 = vmul.f32 %v2179_v10, %v1294_v28  ;;  %v1289_v45 = vmul.f32 %v2186_v19, %v1285_v1  ;;  %v1287_v50 = vadd.f32 -1.4531521, %v1283_v32  ;;  %vm852_vm15 = vcmp.ge.f32.partialorder %v2189_v21, 0.0 }
 0x4f8   : > { %v784_v52 = vadd.f32 1.0, %v780_v41  ;;  %v778_v6 = vmul.f32 0.3275911, %v2208_v58  ;;  %v2218_v38 = vmul.f32 0.70710677, %v2205_v55  ;;  %v832_v18 = vmul.f32 %v828_v4, %v776_v54 }
 0x4f9   : > { %v1302_v57 = vadd.f32 -0.28449672, %v1298_v43  ;;  %v1293_v30 = vadd.f32 1.4214138, %v1289_v45  ;;  %v1291_v59 = vmul.f32 %v2196_v60, %v1287_v50  ;;  %vm850_vm0 = vcmp.ge.f32.partialorder %v2203_v47, 0.0 }
 0x4fa   : > { %1847 = vrcp.f32 %v784_v52  ;;  %v736_v63 = vpop.permute.xlu1 %735  ;;  %v782_v46 = vadd.f32 1.0, %v778_v6  ;;  %v2224_v44 = vand.u32 2147483647, %v2218_v38  ;;  %v838_v42 = vmul.f32 1.442695, %v832_v18 }
 0x4fb   : > { %v1306_v0 = vmul.f32 %v2179_v10, %v1302_v57  ;;  %v1297_v3 = vmul.f32 %v2186_v19, %v1293_v30  ;;  %v1295_v11 = vadd.f32 1.4214138, %v1291_v59  ;;  %1849 = vpow2.f32 %v1329_v51 }
 0x4fc   : > { %v2214_v8 = vpop.eup %1841  ;;  %1851 = vrcp.f32 %v782_v46  ;;  %v779_v62 = vmul.f32 0.3275911, %v2224_v44  ;;  %v741_v28 = vmul.f32 %v1956_v29, %v736_v63  ;;  %v826_v51 = vsub.f32 0.0, %v2208_v58 }
 0x4fd   : > { %v1310_v12 = vadd.f32 0.2548296, %v1306_v0  ;;  %v1301_v40 = vadd.f32 -0.28449672, %v1297_v3  ;;  %v1284_v7 = vmul.f32 1.0614054, %v2214_v8  ;;  %v1299_v13 = vmul.f32 %v2196_v60, %v1295_v11  ;;  %v1844_v27 = vpop.eup %1843 }
 0x4fe   : > { %v783_v32 = vadd.f32 1.0, %v779_v62  ;;  %v1846_v39 = vpop.eup %1845  ;;  %1853 = vpow2.f32 %v1331_v14  ;;  %vm851_vm1 = vcmp.ge.f32.partialorder %v2218_v38, 0.0 }
 0x4ff   : > { %v1314_v26 = vmul.f32 %v2179_v10, %v1310_v12  ;;  %v1305_v16 = vmul.f32 %v2186_v19, %v1301_v40  ;;  %v1288_v17 = vadd.f32 -1.4531521, %v1284_v7  ;;  %v760_v20 = vpop.permute.xlu1 %759  ;;  %v1303_v22 = vadd.f32 -0.28449672, %v1299_v13 }
 0x500   : > { %v2234_v54 = vadd.f32 %v760_v20, %v741_v28  ;;  %1855 = vrcp.f32 %v783_v32  ;;  %v830_v7 = vmul.f32 %v826_v51, %v2208_v58 }
 0x501   : > { %v1334_v1 = vmul.f32 %v1844_v27, %v1314_v26  ;;  %v1309_v25 = vadd.f32 0.2548296, %v1305_v16  ;;  %v1292_v31 = vmul.f32 %v2214_v8, %v1288_v17  ;;  %v1307_v10 = vmul.f32 %v2196_v60, %v1303_v22 }
 0x502   : > { %1857 = vpow2.f32 %v838_v42  ;;  %v827_v16 = vsub.f32 0.0, %v2224_v44  ;;  %v834_v28 = vmul.f32 1.442695, %v830_v7 }
 0x503   : > { %v1338_v41 = vsub.f32 1.0, %v1334_v1  ;;  %v1313_v43 = vmul.f32 %v2186_v19, %v1309_v25  ;;  %v1296_v45 = vadd.f32 1.4214138, %v1292_v31  ;;  %v1311_v50 = vadd.f32 0.2548296, %v1307_v10 }
 0x504   : > { %v2237_v29 = vpop.eup %1847  ;;  %v2246_v19 = vmul.f32 0.70710677, %v2234_v54 }
 0x505   : > { %v1346_v52 = vsub.f32 0.0, %v1338_v41  ;;  %v1333_v57 = vmul.f32 %v1846_v39, %v1313_v43  ;;  %v1300_v30 = vmul.f32 %v2214_v8, %v1296_v45  ;;  %v792_v59 = vmul.f32 1.0614054, %v2237_v29  ;;  %v1850_v0 = vpop.eup %1849 }
 0x506   : > { %v1315_v63 = vmul.f32 %v2196_v60, %v1311_v50  ;;  %v2252_v49 = vand.u32 2147483647, %v2246_v19  ;;  %v2256_v46 = vpop.eup %1851  ;;  %v831_v43 = vmul.f32 %v827_v16, %v2224_v44  ;;  %vm853_vm2 = vcmp.ge.f32.partialorder %v2246_v19, 0.0 }
 0x507   : > { %v1350_v3 = vsel %vm1342_vm11, %v1338_v41, %v1346_v52  ;;  %v1337_v4 = vsub.f32 1.0, %v1333_v57  ;;  %v1304_v6 = vadd.f32 -0.28449672, %v1300_v30  ;;  %v796_v11 = vadd.f32 -1.4531521, %v792_v59 }
 0x508   : > { %v1354_v12 = vadd.f32 1.0, %v1350_v3  ;;  %v1335_v40 = vmul.f32 %v1850_v0, %v1315_v63  ;;  %v781_v17 = vmul.f32 0.3275911, %v2252_v49  ;;  %v790_v27 = vmul.f32 1.0614054, %v2256_v46  ;;  %v1854_v25 = vpop.eup %1853 }
 0x509   : > { %v1345_v60 = vsub.f32 0.0, %v1337_v4  ;;  %v1308_v13 = vmul.f32 %v2214_v8, %v1304_v6  ;;  %v800_v14 = vmul.f32 %v2237_v29, %v796_v11  ;;  %v836_v44 = vmul.f32 1.442695, %v831_v43 }
 0x50a   : > { %v1358_v37 = vmul.f32 %v1354_v12, %v1258_v9  ;;  %v1339_v26 = vsub.f32 1.0, %v1335_v40  ;;  %v785_v1 = vadd.f32 1.0, %v781_v17  ;;  %v794_v10 = vadd.f32 -1.4531521, %v790_v27  ;;  %v2266_v39 = vpop.eup %1855 }
 0x50b   : > { %v1349_v58 = vsel %vm1341_vm12, %v1337_v4, %v1345_v60  ;;  %v1312_v18 = vadd.f32 0.2548296, %v1308_v13  ;;  %v804_v20 = vadd.f32 1.4214138, %v800_v14  ;;  %v829_v11 = vsub.f32 0.0, %v2252_v49 }
 0x50c   : > { %v1353_v22 = vadd.f32 1.0, %v1349_v58  ;;  %v1347_v62 = vsub.f32 0.0, %v1339_v26  ;;  %v1362_v32 = vadd.f32 %v1358_v37, %v2040_v36  ;;  %1859 = vrcp.f32 %v785_v1  ;;  %v1858_v63 = vpop.eup %1857 }
 0x50d   : > { %v1316_v31 = vmul.f32 %v2214_v8, %v1312_v18  ;;  %v808_v9 = vmul.f32 %v2237_v29, %v804_v20  ;;  %v798_v51 = vmul.f32 %v2256_v46, %v794_v10  ;;  %v791_v8 = vmul.f32 1.0614054, %v2266_v39 }
 0x50e   : > { %v1357_v48 = vmul.f32 %v1353_v22, %v1257_v24  ;;  %v1351_v41 = vsel %vm1343_vm13, %v1339_v26, %v1347_v62  ;;  %1371 = vrot.lane.b32.xlu0 %v1362_v32, %s1882_s17  ;;  %1861 = vpow2.f32 %v834_v28  ;;  %v1260_v60 = vmul.f32 0.5, %v2173_v2 }
 0x50f   : > { %v1355_v45 = vadd.f32 1.0, %v1351_v41  ;;  %v1336_v50 = vmul.f32 %v1854_v25, %v1316_v31  ;;  %v812_v42 = vadd.f32 -0.28449672, %v808_v9  ;;  %v802_v53 = vadd.f32 1.4214138, %v798_v51 }
 0x510   : > { %v1361_v52 = vadd.f32 %v1357_v48, %v2036_v34  ;;  %v795_v59 = vadd.f32 -1.4531521, %v791_v8  ;;  %1863 = vpow2.f32 %v836_v44  ;;  %v833_v58 = vmul.f32 %v829_v11, %v2252_v49 }
 0x511   : > { %v1359_v57 = vmul.f32 %v1355_v45, %v1259_v61  ;;  %v1340_v30 = vsub.f32 1.0, %v1336_v50  ;;  %v816_v24 = vmul.f32 %v2237_v29, %v812_v42  ;;  %v806_v4 = vmul.f32 %v2256_v46, %v802_v53 }
 0x512   : > { %1369 = vrot.lane.b32.xlu1 %v1361_v52, %s1882_s17  ;;  %v799_v61 = vmul.f32 %v2266_v39, %v795_v59  ;;  %v840_v31 = vmul.f32 1.442695, %v833_v58  ;;  %v768_v32 = vmul.f32 0.5, %v2183_v15 }
 0x513   : > { %v1348_v0 = vsub.f32 0.0, %v1340_v30  ;;  %v820_v3 = vadd.f32 0.2548296, %v816_v24  ;;  %v1363_v6 = vadd.f32 %v2034_v33, %v1359_v57  ;;  %v810_v7 = vadd.f32 -0.28449672, %v806_v4 }
 0x514   : > { %v803_v14 = vadd.f32 1.4214138, %v799_v61  ;;  %1865 = vpow2.f32 %v840_v31 }
 0x515   : > { %v1352_v12 = vsel %vm1344_vm14, %v1340_v30, %v1348_v0  ;;  %v824_v40 = vmul.f32 %v2237_v29, %v820_v3  ;;  %v814_v26 = vmul.f32 %v2256_v46, %v810_v7  ;;  %v767_v0 = vmul.f32 0.5, %v2205_v55 }
 0x516   : > { %v1356_v13 = vadd.f32 1.0, %v1352_v12  ;;  %1373 = vrot.lane.b32.xlu1 %v1363_v6, %s1882_s17  ;;  %v1860_v16 = vpop.eup %1859  ;;  %v807_v17 = vmul.f32 %v2266_v39, %v803_v14 }
 0x517   : > { %v844_v37 = vmul.f32 %v1858_v63, %v824_v40  ;;  %v818_v29 = vadd.f32 0.2548296, %v814_v26  ;;  %v793_v20 = vmul.f32 1.0614054, %v1860_v16  ;;  %v769_v40 = vmul.f32 0.5, %v2234_v54 }
 0x518   : > { %v1360_v5 = vmul.f32 %v1356_v13, %v1260_v60  ;;  %v811_v27 = vadd.f32 -0.28449672, %v807_v17  ;;  %v1862_v1 = vpop.eup %1861 }
 0x519   : > { %v848_v18 = vsub.f32 1.0, %v844_v37  ;;  %v822_v62 = vmul.f32 %v2256_v46, %v818_v29  ;;  %v797_v28 = vadd.f32 -1.4531521, %v793_v20 }
 0x51a   : > { %v1364_v2 = vadd.f32 %v2038_v35, %v1360_v5  ;;  %v815_v25 = vmul.f32 %v2266_v39, %v811_v27  ;;  %v1864_v21 = vpop.eup %1863 }
 0x51b   : > { %v856_v22 = vsub.f32 0.0, %v848_v18  ;;  %v842_v9 = vmul.f32 %v1862_v1, %v822_v62  ;;  %v801_v10 = vmul.f32 %v1860_v16, %v797_v28 }
 0x51c   : > { %1375 = vrot.lane.b32.xlu0 %v1364_v2, %s1882_s17  ;;  %v819_v41 = vadd.f32 0.2548296, %v815_v25  ;;  %s2301_s17 = scalar_lea.vmem %s2368_s6, %s1664_s11 }
 0x51d   : > { %v860_v49 = vsel %vm852_vm15, %v848_v18, %v856_v22  ;;  %v846_v43 = vsub.f32 1.0, %v842_v9  ;;  %v805_v46 = vadd.f32 1.4214138, %v801_v10 }
 0x51e   : > { %v864_v48 = vadd.f32 1.0, %v860_v49  ;;  %v823_v50 = vmul.f32 %v2266_v39, %v819_v41  ;;  %v766_v39 = vmul.f32 0.5, %v2193_v56  ;;  %v1866_v6 = vpop.eup %1865 }
 0x51f   : > { %v854_v42 = vsub.f32 0.0, %v846_v43  ;;  %v809_v51 = vmul.f32 %v1860_v16, %v805_v46 }
 0x520   : > { %v868_v45 = vmul.f32 %v864_v48, %v768_v32  ;;  %v843_v8 = vmul.f32 %v1864_v21, %v823_v50 }
 0x521   : > { %v858_v52 = vsel %vm850_vm0, %v846_v43, %v854_v42  ;;  %v813_v57 = vadd.f32 -0.28449672, %v809_v51 }
 0x522   : > { %v872_v15 = vadd.f32 %v2034_v33, %v868_v45  ;;  %v862_v30 = vadd.f32 1.0, %v858_v52  ;;  %v847_v24 = vsub.f32 1.0, %v843_v8 }
 0x523   : > { %v817_v53 = vmul.f32 %v1860_v16, %v813_v57 }
 0x524   : > { %876 = vst.msk [vmem:[%s2301_s17 + $0x10] sm:$0xff] %vm419_vm3, %v872_v15  ;;  %v866_v59 = vmul.f32 %v862_v30, %v766_v39  ;;  %v855_v44 = vsub.f32 0.0, %v847_v24 }
 0x525   : > { %v821_v63 = vadd.f32 0.2548296, %v817_v53 }
 0x526   : > { %v870_v33 = vadd.f32 %v866_v59, %v2036_v34  ;;  %v859_v47 = vsel %vm851_vm1, %v847_v24, %v855_v44 }
 0x527   : > { %v863_v3 = vadd.f32 1.0, %v859_v47  ;;  %v825_v4 = vmul.f32 %v1860_v16, %v821_v63 }
 0x528   : > { %874 = vst.msk [vmem:[%s2301_s17] sm:$0xff] %vm419_vm3, %v870_v33 }
 0x529   : > { %v867_v56 = vmul.f32 %v863_v3, %v767_v0  ;;  %v845_v61 = vmul.f32 %v1866_v6, %v825_v4 }
 0x52b   : > { %v871_v11 = vadd.f32 %v867_v56, %v2040_v36  ;;  %v849_v38 = vsub.f32 1.0, %v845_v61  ;;  %v880_v14 = vld [vmem:[%s2301_s17 + $0x10] sm:$0xff] }
 0x52d   : > { %875 = vst.msk [vmem:[%s2301_s17 + $0x8] sm:$0xff] %vm419_vm3, %v871_v11  ;;  %v857_v34 = vsub.f32 0.0, %v849_v38 }
 0x52f   : > { %v861_v55 = vsel %vm853_vm2, %v849_v38, %v857_v34  ;;  %v878_v12 = vld [vmem:[%s2301_s17] sm:$0xff] }
 0x530   : > { %v865_v7 = vadd.f32 1.0, %v861_v55  ;;  %1727 = vmatprep.mubr.msk.f32.mxu1 %vm419_vm3, %v878_v12 }
 0x532   : > { %v869_v60 = vmul.f32 %v865_v7, %v769_v40 }
 0x534   : > { %v873_v36 = vadd.f32 %v2038_v35, %v869_v60  ;;  %v879_v13 = vld [vmem:[%s2301_s17 + $0x8] sm:$0xff] }
 0x535   : > { %1728 = vmatmul.mubr.msk.f32.vlgmr.msra.gmra.mrb[4].mxu1 %vm419_vm3, %v879_v13 }
 0x536   : > { %877 = vst.msk [vmem:[%s2301_s17 + $0x18] sm:$0xff] %vm419_vm3, %v873_v36  ;;  %1730 = vmatprep.mubr.msk.f32.mxu1 %vm419_vm3, %v880_v14  ;;  %1780 = vmatpush3.bf16.msra.mxu1 %v2146_v23 }
 0x53d   : > { %v881_v54 = vld [vmem:[%s2301_s17 + $0x18] sm:$0xff] }
 0x53e   : > { %1731 = vmatmul.mubr.msk.f32.gmra.mrb[6].mxu1 %vm419_vm3, %v881_v54 }
 0x580   : > { %v1372_v19 = vpop.permute.xlu0 %1371 }
 0x581   : > { %1647 = vst.msk [vmem:[%s2301_s17 + $0x28] sm:$0xff] %vm419_vm3, %v1372_v19 }
 0x584   : > { %v1370_v35 = vpop.permute.xlu1 %1369 }
 0x585   : > { %1646 = vst.msk [vmem:[%s2301_s17 + $0x20] sm:$0xff] %vm419_vm3, %v1370_v35 }
 0x588   : > { %v1374_v37 = vpop.permute.xlu1 %1373  ;;  %v1651_v16 = vld [vmem:[%s2301_s17 + $0x28] sm:$0xff] }
 0x589   : > { %1648 = vst.msk [vmem:[%s2301_s17 + $0x30] sm:$0xff] %vm419_vm3, %v1374_v37 }
 0x58c   : > { %v1650_v26 = vld [vmem:[%s2301_s17 + $0x20] sm:$0xff] }
 0x58d   : > { %1751 = vmatprep.mubr.msk.f32.mxu1 %vm419_vm3, %v1650_v26 }
 0x58e   : > { %v1376_v5 = vpop.permute.xlu0 %1375  ;;  %1752 = vmatmul.mubr.msk.f32.vlgmr.msra.gmra.mrb[8].mxu1 %vm419_vm3, %v1651_v16 }
 0x58f   : > { %1649 = vst.msk [vmem:[%s2301_s17 + $0x38] sm:$0xff] %vm419_vm3, %v1376_v5 }
 0x590   : > { %v1652_v23 = vld [vmem:[%s2301_s17 + $0x30] sm:$0xff] }
 0x591   : > { %1754 = vmatprep.mubr.msk.f32.mxu1 %vm419_vm3, %v1652_v23 }
 0x596   : > { %v1653_v17 = vld [vmem:[%s2301_s17 + $0x38] sm:$0xff] }
 0x597   : > { %1755 = vmatmul.mubr.msk.f32.gmra.mrb[10].mxu1 %vm419_vm3, %v1653_v17  ;;  %vm999_vm3 = vcmask 64512  }
 0x608   : > { %v1729_v58 = vpop.f32.mrb[4].mxu1 }
 0x609   : > { %985 = vrot.lane.b32.xlu0 %v1729_v58, %s1886_s14  ;;  %v960_v18 = vpop.f32.mrb[5].mxu1 }
 0x60a   : > { %983 = vrot.lane.b32.xlu1 %v960_v18, %s1886_s14 }
 0x611   : > { %v1732_v29 = vpop.f32.mrb[6].mxu1 }
 0x612   : > { %989 = vrot.lane.b32.xlu0 %v1732_v29, %s1886_s14  ;;  %v970_v20 = vpop.f32.mrb[7].mxu1 }
 0x613   : > { %987 = vrot.lane.b32.xlu1 %v970_v20, %s1886_s14 }
 0x661   : > { %v1753_v27 = vpop.f32.mrb[8].mxu1 }
 0x662   : > { %1493 = vrot.lane.b32.xlu0 %v1753_v27, %s1886_s14  ;;  %v1468_v2 = vpop.f32.mrb[9].mxu1 }
 0x663   : > { %1491 = vrot.lane.b32.xlu1 %v1468_v2, %s1886_s14 }
 0x66a   : > { %v1756_v22 = vpop.f32.mrb[10].mxu1 }
 0x66b   : > { %1497 = vrot.lane.b32.xlu0 %v1756_v22, %s1886_s14  ;;  %v1478_v62 = vpop.f32.mrb[11].mxu1 }
 0x66c   : > { %1495 = vrot.lane.b32.xlu1 %v1478_v62, %s1886_s14 }
 0x67b   : > { %v986_v28 = vpop.permute.xlu0 %985 }
 0x67c   : > { %v996_v1 = vmax.f32 %v1729_v58, %v986_v28  ;;  %v984_v25 = vpop.permute.xlu1 %983 }
 0x67d   : > { %v995_v31 = vmax.f32 %v960_v18, %v984_v25 }
 0x67e   : > { %1001 = vst.msk [vmem:[%s298_s18 + $0x8] sm:$0xff] %vm999_vm3, %v996_v1 }
 0x67f   : > { %1000 = vst.msk [vmem:[%s298_s18] sm:$0xff] %vm999_vm3, %v995_v31 }
 0x684   : > { %v990_v49 = vpop.permute.xlu0 %989 }
 0x685   : > { %v998_v9 = vmax.f32 %v1732_v29, %v990_v49  ;;  %v988_v10 = vpop.permute.xlu1 %987 }
 0x686   : > { %v997_v32 = vmax.f32 %v970_v20, %v988_v10 }
 0x687   : > { %1003 = vst.msk [vmem:[%s298_s18 + $0x18] sm:$0xff] %vm999_vm3, %v998_v9 }
 0x688   : > { %1002 = vst.msk [vmem:[%s298_s18 + $0x10] sm:$0xff] %vm999_vm3, %v997_v32 }
 0x6d4   : > { %v1494_v48 = vpop.permute.xlu0 %1493 }
 0x6d5   : > { %v1504_v41 = vmax.f32 %v1753_v27, %v1494_v48  ;;  %v1492_v43 = vpop.permute.xlu1 %1491 }
 0x6d6   : > { %v1503_v46 = vmax.f32 %v1468_v2, %v1492_v43 }
 0x6d7   : > { %1659 = vst.msk [vmem:[%s298_s18 + $0x28] sm:$0xff] %vm999_vm3, %v1504_v41 }
 0x6d8   : > { %1658 = vst.msk [vmem:[%s298_s18 + $0x20] sm:$0xff] %vm999_vm3, %v1503_v46 }
 0x6dd   : > { %v1498_v45 = vpop.permute.xlu0 %1497 }
 0x6de   : > { %v1506_v50 = vmax.f32 %v1756_v22, %v1498_v45  ;;  %v1496_v21 = vpop.permute.xlu1 %1495 }
 0x6df   : > { %v1505_v42 = vmax.f32 %v1478_v62, %v1496_v21 }
 0x6e0   : > { %1661 = vst.msk [vmem:[%s298_s18 + $0x38] sm:$0xff] %vm999_vm3, %v1506_v50 }
 0x6e1   : > { %1660 = vst.msk [vmem:[%s298_s18 + $0x30] sm:$0xff] %vm999_vm3, %v1505_v42 }
 0x6e2 PF: > { %s18_s24 = sadd.s32 1, %s1873_s24  }
 0x6e3   : > { %p15_p4 = scmp.ge.s32.totalorder %s18_s24, 4  }
 0x6e5   :  { %17 = sbr.rel (!%p15_p4) target bundleno = 1 (0x1), region = 89 }

</bundles_post_ra>
